<compile_context>
chip_gen: v5e
topology: v5e:2x2
jax: 0.10.0
libtpu: 0.0.40
codegen_flags: <defaults>
</compile_context>

<pallas_src>
import jax
import jax.numpy as jnp
from jax.experimental import pallas as pl
from jax.experimental.pallas import tpu as pltpu

BN_EPS = 1e-5


# ----------------------------------------------------------------------------
# Fused kernel: conv1(1x1)+bn1+relu -> conv2(3x3,s1,p1)+bn2+relu
#               -> conv3(1x1)+bn3 + residual + relu
# One grid step processes one image (NHWC); everything stays in VMEM.
# BN scales are pre-folded into the (bf16) weights; b*_ref are the BN biases.
# ----------------------------------------------------------------------------
def _bottleneck_kernel(x_ref, w1_ref, w2_ref, w3_ref, b1_ref, b2_ref, b3_ref,
                       o_ref, mid_ref, slab_ref):
    # x_ref  : (H, W, Cin)        bf16   (leading N dim squeezed by BlockSpec)
    # w1_ref : (Cin, Cmid)        bf16   (BN1 scale folded in)
    # w2_ref : (9*Cmid, Cmid)     bf16   (im2col layout, BN2 scale folded in)
    # w3_ref : (Cmid, Cout)       bf16   (BN3 scale folded in)
    # b*_ref : (1, C)             f32    (folded BatchNorm biases)
    # o_ref  : (H, W, Cout)       bf16
    # mid_ref: VMEM (H+2, W+2, Cmid) bf16  zero-halo padded conv1 output
    # slab_ref: VMEM (RT, W, 9*Cmid) bf16  im2col patch slab for one row chunk
    H, W, cin = x_ref.shape
    cmid = w1_ref.shape[1]
    cout = w3_ref.shape[1]
    RT = slab_ref.shape[0]            # rows per chunk (divides H)
    n_chunks = H // RT

    # ---- zero ONLY the 1-px halo (every step; never gate on program_id) ----
    zrow = jnp.zeros((1, W + 2, cmid), jnp.bfloat16)
    zcol = jnp.zeros((H + 2, 1, cmid), jnp.bfloat16)
    mid_ref[0:1, :, :] = zrow
    mid_ref[H + 1:H + 2, :, :] = zrow
    mid_ref[:, 0:1, :] = zcol
    mid_ref[:, W + 1:W + 2, :] = zcol

    # ---- pass 1: conv1 (1x1) + bias + relu into padded scratch interior ----
    def conv1_chunk(r0):
        xs = x_ref[pl.ds(r0, RT), :, :].reshape(RT * W, cin)         # bf16
        a1 = jnp.dot(xs, w1_ref[...], preferred_element_type=jnp.float32)
        y1 = jnp.maximum(a1 + b1_ref[...], 0.0)
        mid_ref[pl.ds(r0 + 1, RT), 1:W + 1, :] = (
            y1.reshape(RT, W, cmid).astype(jnp.bfloat16))

    # ---- pass 2: conv2 (3x3 via im2col, one big-K matmul) + bias + relu,
    #              conv3 (1x1) + bias + residual (f32) + relu ---------------
    def conv2_chunk(r0):
        rows = mid_ref[pl.ds(r0, RT + 2), :, :]        # (RT+2, W+2, cmid) bf16
        for dy in range(3):
            for dx in range(3):
                t = dy * 3 + dx
                slab_ref[:, :, t * cmid:(t + 1) * cmid] = \
                    rows[dy:dy + RT, dx:dx + W, :]
        patches = slab_ref[...].reshape(RT * W, 9 * cmid)            # bf16
        a2 = jnp.dot(patches, w2_ref[...], preferred_element_type=jnp.float32)
        y2 = jnp.maximum(a2 + b2_ref[...], 0.0).astype(jnp.bfloat16)
        a3 = jnp.dot(y2, w3_ref[...], preferred_element_type=jnp.float32)
        res = x_ref[pl.ds(r0, RT), :, :].reshape(RT * W, cin).astype(jnp.float32)
        out = jnp.maximum(a3 + b3_ref[...] + res, 0.0)               # f32
        o_ref[pl.ds(r0, RT), :, :] = out.reshape(RT, W, cout).astype(o_ref.dtype)

    if n_chunks == 1:
        conv1_chunk(0)
        conv2_chunk(0)
    else:
        @pl.loop(0, n_chunks)
        def _(c):
            conv1_chunk(pl.multiple_of(c * RT, RT))

        @pl.loop(0, n_chunks)
        def _(c):
            conv2_chunk(pl.multiple_of(c * RT, RT))


# ----------------------------------------------------------------------------
# Parameter prep (BN folding + weight layout) shared by kernel and reference
# ----------------------------------------------------------------------------
def fold_bn(gamma, beta, mean, var):
    scale = gamma / jnp.sqrt(var + BN_EPS)
    bias = beta - mean * scale
    return scale[None, :].astype(jnp.float32), bias[None, :].astype(jnp.float32)


def prepare_weights(params):
    cmid = params["w1"].shape[0]
    s1, b1 = fold_bn(*params["bn1"])
    s2, b2 = fold_bn(*params["bn2"])
    s3, b3 = fold_bn(*params["bn3"])
    # PyTorch OIHW -> matmul layouts, BN scale folded in (f32), then bf16.
    w1 = (params["w1"][:, :, 0, 0].T * s1).astype(jnp.bfloat16)          # (Cin, Cmid)
    w2 = (jnp.transpose(params["w2"], (2, 3, 1, 0))
          .reshape(9 * cmid, cmid) * s2).astype(jnp.bfloat16)            # (9*Cmid, Cmid)
    w3 = (params["w3"][:, :, 0, 0].T * s3).astype(jnp.bfloat16)          # (Cmid, Cout)
    return w1, w2, w3, b1, b2, b3


def _pick_row_chunk(H, W, target_rows=512):
    """Largest divisor of H such that chunk*W <= target_rows (>=1)."""
    best = 1
    for rt in range(1, H + 1):
        if H % rt == 0 and rt * W <= target_rows:
            best = rt
    return best


# ----------------------------------------------------------------------------
# Wrappers
# ----------------------------------------------------------------------------
@jax.jit
def bottleneck_forward_nhwc(x_nhwc, params):
    """Fused Pallas forward. NHWC input; bf16 activation I/O at the boundary."""
    N, H, W, cin = x_nhwc.shape
    cmid = params["w1"].shape[0]
    cout = params["w3"].shape[0]
    assert cout == cin, "identity residual (downsample=None) needs Cin == Cout"

    x_bf16 = x_nhwc.astype(jnp.bfloat16)
    w1, w2, w3, b1, b2, b3 = prepare_weights(params)
    rt = _pick_row_chunk(H, W)

    flops = 2 * N * H * W * (cin * cmid + 9 * cmid * cmid + cmid * cout)
    bytes_accessed = (2 * N * H * W * (cin + cout)              # bf16 activations
                      + 2 * (w1.size + w2.size + w3.size)       # bf16 weights
                      + 4 * (b1.size + b2.size + b3.size))      # f32 biases

    return pl.pallas_call(
        _bottleneck_kernel,
        out_shape=jax.ShapeDtypeStruct((N, H, W, cout), jnp.bfloat16),
        grid_spec=pltpu.PrefetchScalarGridSpec(
            num_scalar_prefetch=0,
            grid=(N,),
            in_specs=[
                pl.BlockSpec((None, H, W, cin), lambda n: (n, 0, 0, 0)),
                pl.BlockSpec((cin, cmid), lambda n: (0, 0)),
                pl.BlockSpec((9 * cmid, cmid), lambda n: (0, 0)),
                pl.BlockSpec((cmid, cout), lambda n: (0, 0)),
                pl.BlockSpec((1, cmid), lambda n: (0, 0)),
                pl.BlockSpec((1, cmid), lambda n: (0, 0)),
                pl.BlockSpec((1, cout), lambda n: (0, 0)),
            ],
            out_specs=pl.BlockSpec((None, H, W, cout), lambda n: (n, 0, 0, 0)),
            scratch_shapes=[
                pltpu.VMEM((H + 2, W + 2, cmid), jnp.bfloat16),   # padded conv1 out
                pltpu.VMEM((rt, W, 9 * cmid), jnp.bfloat16),      # im2col slab
            ],
        ),
        compiler_params=pltpu.CompilerParams(
            dimension_semantics=("parallel",),
            vmem_limit_bytes=32 * 1024 * 1024),   # modest; leaves headroom on v7x (64 MiB)
        cost_estimate=pl.CostEstimate(flops=flops, transcendentals=0,
                                      bytes_accessed=bytes_accessed),
    )(x_bf16, w1, w2, w3, b1, b2, b3)


@jax.jit
def bottleneck_forward(x_nchw, params):
    """PyTorch-layout (NCHW, f32) wrapper around the fused NHWC kernel."""
    # TODO(synk): keep the surrounding model in NHWC/bf16 (use
    #             bottleneck_forward_nhwc) to avoid these XLA transposes/casts.
    x_nhwc = jnp.transpose(x_nchw, (0, 2, 3, 1))
    y = bottleneck_forward_nhwc(x_nhwc, params)
    return jnp.transpose(y, (0, 3, 1, 2)).astype(jnp.float32)


def init_params(key, in_channel, out_channel, expansion=4):
    ks = jax.random.split(key, 6)
    cmid, cout = out_channel, out_channel * expansion

    def bn(k, c):
        k1, k2, k3, k4 = jax.random.split(k, 4)
        gamma = 1.0 + 0.1 * jax.random.normal(k1, (c,), jnp.float32)
        beta = 0.1 * jax.random.normal(k2, (c,), jnp.float32)
        mean = 0.1 * jax.random.normal(k3, (c,), jnp.float32)
        var = 1.0 + 0.1 * jax.random.uniform(k4, (c,), jnp.float32)
        return gamma, beta, mean, var

    return {
        # PyTorch conv weight layout: (O, I, KH, KW)
        "w1": 0.1 * jax.random.normal(ks[0], (cmid, in_channel, 1, 1), jnp.float32),
        "w2": 0.1 * jax.random.normal(ks[1], (cmid, cmid, 3, 3), jnp.float32),
        "w3": 0.1 * jax.random.normal(ks[2], (cout, cmid, 1, 1), jnp.float32),
        "bn1": bn(ks[3], cmid),
        "bn2": bn(ks[4], cmid),
        "bn3": bn(ks[5], cout),
    }


# ----------------------------------------------------------------------------
# References
# ----------------------------------------------------------------------------
def reference_matched_nhwc(x_nhwc, params):
    """Pure-JAX reference mirroring the kernel math exactly (folded BN scales,
    bf16 operands, f32 accumulation, bf16 intermediates/output)."""
    w1, w2, w3, b1, b2, b3 = prepare_weights(params)
    N, H, W, cin = x_nhwc.shape
    cmid = w1.shape[1]
    cout = w3.shape[1]
    xb = x_nhwc.astype(jnp.bfloat16)

    a1 = jnp.dot(xb.reshape(-1, cin), w1, preferred_element_type=jnp.float32)
    y1 = jnp.maximum(a1 + b1, 0.0).reshape(N, H, W, cmid).astype(jnp.bfloat16)

    y1p = jnp.pad(y1, ((0, 0), (1, 1), (1, 1), (0, 0)))
    patches = jnp.concatenate(
        [y1p[:, dy:dy + H, dx:dx + W, :] for dy in range(3) for dx in range(3)],
        axis=-1).reshape(-1, 9 * cmid)
    a2 = jnp.dot(patches, w2, preferred_element_type=jnp.float32)
    y2 = jnp.maximum(a2 + b2, 0.0).astype(jnp.bfloat16)

    a3 = jnp.dot(y2, w3, preferred_element_type=jnp.float32)
    out = jnp.maximum(a3 + b3 + xb.reshape(-1, cin).astype(jnp.float32), 0.0)
    return out.reshape(N, H, W, cout).astype(jnp.bfloat16)


def reference_forward_f32(x_nchw, params):
    """Full-f32 PyTorch eval-mode forward (loose sanity reference)."""
    dn = ("NCHW", "OIHW", "NCHW")

    def conv(x, w, padding):
        return jax.lax.conv_general_dilated(x, w, (1, 1), padding,
                                            dimension_numbers=dn)

    def bn(y, bnp):
        gamma, beta, mean, var = bnp
        sh = (1, -1, 1, 1)
        return (y - mean.reshape(sh)) / jnp.sqrt(var.reshape(sh) + BN_EPS) \
            * gamma.reshape(sh) + beta.reshape(sh)

    out = jax.nn.relu(bn(conv(x_nchw, params["w1"], "VALID"), params["bn1"]))
    out = jax.nn.relu(bn(conv(out, params["w2"], [(1, 1), (1, 1)]), params["bn2"]))
    out = bn(conv(out, params["w3"], "VALID"), params["bn3"]) + x_nchw
    return jax.nn.relu(out)


if __name__ == "__main__":
    key = jax.random.PRNGKey(0)
    kx, kp = jax.random.split(key)

    N, out_channel, H, W = 2, 32, 16, 16
    in_channel = out_channel * 4          # identity residual requires this

    x = jax.random.normal(kx, (N, in_channel, H, W), jnp.float32)
    params = init_params(kp, in_channel, out_channel)

    y = bottleneck_forward(x, params)
    jax.block_until_ready(y)
    assert y.shape == (N, in_channel, H, W)

    # Tight check: reference with matched precision / folded BN / bf16 I/O.
    y_ref_m = reference_matched_nhwc(jnp.transpose(x, (0, 2, 3, 1)), params)
    y_ref_m = jnp.transpose(y_ref_m.astype(jnp.float32), (0, 3, 1, 2))
    assert jnp.allclose(y, y_ref_m, atol=2e-2, rtol=2e-2), \
        float(jnp.max(jnp.abs(y - y_ref_m)))

    # Loose sanity check against the full-f32 PyTorch-semantics reference.
    y_ref_f32 = reference_forward_f32(x, params)
    assert jnp.allclose(y, y_ref_f32, atol=1e-1, rtol=1e-1), \
        float(jnp.max(jnp.abs(y - y_ref_f32)))

    print("KERNEL_OK")
</pallas_src>

<mosaic_0001>
module attributes {stable_mosaic.version = 11 : i64} {
  func.func @_bottleneck_kernel(%arg0: i32, %arg1: memref<1x16x16x128xbf16, #tpu.memory_space<vmem>>, %arg2: memref<128x32xbf16, #tpu.memory_space<vmem>>, %arg3: memref<288x32xbf16, #tpu.memory_space<vmem>>, %arg4: memref<32x128xbf16, #tpu.memory_space<vmem>>, %arg5: memref<1x32xf32, #tpu.memory_space<vmem>>, %arg6: memref<1x32xf32, #tpu.memory_space<vmem>>, %arg7: memref<1x128xf32, #tpu.memory_space<vmem>>, %arg8: memref<1x16x16x128xbf16, #tpu.memory_space<vmem>>, %arg9: memref<18x18x32xbf16, #tpu.memory_space<vmem>>, %arg10: memref<16x16x288xbf16, #tpu.memory_space<vmem>>) attributes {dimension_semantics = [#tpu.dimension_semantics<parallel>], iteration_bounds = array<i64: 2>, scalar_prefetch = 0 : i64, scratch_operands = 2 : i64, tpu.core_type = #tpu.core_type<tc>, window_params = [{transform_indices = @transform_0, window_bounds = array<i64: 1, 16, 16, 128>}, {pipeline_mode = #tpu.pipeline_mode<synchronous>, transform_indices = @transform_1, window_bounds = array<i64: 128, 32>}, {pipeline_mode = #tpu.pipeline_mode<synchronous>, transform_indices = @transform_2, window_bounds = array<i64: 288, 32>}, {pipeline_mode = #tpu.pipeline_mode<synchronous>, transform_indices = @transform_3, window_bounds = array<i64: 32, 128>}, {pipeline_mode = #tpu.pipeline_mode<synchronous>, transform_indices = @transform_4, window_bounds = array<i64: 1, 32>}, {pipeline_mode = #tpu.pipeline_mode<synchronous>, transform_indices = @transform_5, window_bounds = array<i64: 1, 32>}, {pipeline_mode = #tpu.pipeline_mode<synchronous>, transform_indices = @transform_6, window_bounds = array<i64: 1, 128>}, {transform_indices = @transform_7, window_bounds = array<i64: 1, 16, 16, 128>}]} {
    %cst = arith.constant 0.000000e+00 : bf16
    %0 = vector.broadcast %cst : bf16 to vector<1x18x32xbf16>
    %cst_0 = arith.constant 0.000000e+00 : bf16
    %1 = vector.broadcast %cst_0 : bf16 to vector<18x1x32xbf16>
    %c0 = arith.constant 0 : index
    %c0_1 = arith.constant 0 : index
    %c0_2 = arith.constant 0 : index
    %2 = vector.load %arg9[%c0, %c0_1, %c0_2] : memref<18x18x32xbf16, #tpu.memory_space<vmem>>, vector<1x18x32xbf16>
    tpu.vector_store %arg9[%c0, %c0_1, %c0_2], %0 {strides = array<i32>} : memref<18x18x32xbf16, #tpu.memory_space<vmem>>, vector<1x18x32xbf16>,
    %c17 = arith.constant 17 : index
    %c0_3 = arith.constant 0 : index
    %c0_4 = arith.constant 0 : index
    %3 = vector.load %arg9[%c17, %c0_3, %c0_4] : memref<18x18x32xbf16, #tpu.memory_space<vmem>>, vector<1x18x32xbf16>
    tpu.vector_store %arg9[%c17, %c0_3, %c0_4], %0 {strides = array<i32>} : memref<18x18x32xbf16, #tpu.memory_space<vmem>>, vector<1x18x32xbf16>,
    %c0_5 = arith.constant 0 : index
    %c0_6 = arith.constant 0 : index
    %c0_7 = arith.constant 0 : index
    %4 = vector.load %arg9[%c0_5, %c0_6, %c0_7] : memref<18x18x32xbf16, #tpu.memory_space<vmem>>, vector<18x1x32xbf16>
    tpu.vector_store %arg9[%c0_5, %c0_6, %c0_7], %1 {strides = array<i32>} : memref<18x18x32xbf16, #tpu.memory_space<vmem>>, vector<18x1x32xbf16>,
    %c0_8 = arith.constant 0 : index
    %c17_9 = arith.constant 17 : index
    %c0_10 = arith.constant 0 : index
    %5 = vector.load %arg9[%c0_8, %c17_9, %c0_10] : memref<18x18x32xbf16, #tpu.memory_space<vmem>>, vector<18x1x32xbf16>
    tpu.vector_store %arg9[%c0_8, %c17_9, %c0_10], %1 {strides = array<i32>} : memref<18x18x32xbf16, #tpu.memory_space<vmem>>, vector<18x1x32xbf16>,
    %c0_11 = arith.constant 0 : index
    %c0_12 = arith.constant 0 : index
    %c0_13 = arith.constant 0 : index
    %c0_14 = arith.constant 0 : index
    %6 = vector.load %arg1[%c0_11, %c0_12, %c0_13, %c0_14] : memref<1x16x16x128xbf16, #tpu.memory_space<vmem>>, vector<1x16x16x128xbf16>
    %7 = vector.shape_cast %6 : vector<1x16x16x128xbf16> to vector<16x16x128xbf16>
    %8 = vector.shape_cast %7 : vector<16x16x128xbf16> to vector<256x128xbf16>
    %c0_15 = arith.constant 0 : index
    %c0_16 = arith.constant 0 : index
    %9 = vector.load %arg2[%c0_15, %c0_16] : memref<128x32xbf16, #tpu.memory_space<vmem>>, vector<128x32xbf16>
    %cst_17 = arith.constant dense<0.000000e+00> : vector<256x32xf32>
    %10 = tpu.matmul %8, %9, %cst_17 {dimension_numbers = #tpu.dot_dimension_numbers<[1], [0], [0], [1], [0, 0, 1, 1], [], []>} : vector<256x128xbf16>, vector<128x32xbf16>, vector<256x32xf32> -> vector<256x32xf32>
    %c0_18 = arith.constant 0 : index
    %c0_19 = arith.constant 0 : index
    %11 = vector.load %arg5[%c0_18, %c0_19] : memref<1x32xf32, #tpu.memory_space<vmem>>, vector<1x32xf32>
    %12 = vector.broadcast %11 : vector<1x32xf32> to vector<256x32xf32>
    %13 = arith.addf %10, %12 : vector<256x32xf32>
    %cst_20 = arith.constant 0.000000e+00 : f32
    %14 = vector.broadcast %cst_20 : f32 to vector<256x32xf32>
    %15 = arith.maximumf %13, %14 : vector<256x32xf32>
    %16 = vector.shape_cast %15 : vector<256x32xf32> to vector<16x16x32xf32>
    %17 = arith.truncf %16 : vector<16x16x32xf32> to vector<16x16x32xbf16>
    %c1 = arith.constant 1 : index
    %c1_21 = arith.constant 1 : index
    %c0_22 = arith.constant 0 : index
    %18 = vector.load %arg9[%c1, %c1_21, %c0_22] : memref<18x18x32xbf16, #tpu.memory_space<vmem>>, vector<16x16x32xbf16>
    tpu.vector_store %arg9[%c1, %c1_21, %c0_22], %17 {strides = array<i32>} : memref<18x18x32xbf16, #tpu.memory_space<vmem>>, vector<16x16x32xbf16>,
    %c0_23 = arith.constant 0 : index
    %c0_24 = arith.constant 0 : index
    %c0_25 = arith.constant 0 : index
    %19 = vector.load %arg9[%c0_23, %c0_24, %c0_25] : memref<18x18x32xbf16, #tpu.memory_space<vmem>>, vector<18x18x32xbf16>
    %20 = vector.extract_strided_slice %19 {offsets = [0, 0, 0], sizes = [16, 16, 32], strides = [1, 1, 1]} : vector<18x18x32xbf16> to vector<16x16x32xbf16>
    %c0_26 = arith.constant 0 : index
    %c0_27 = arith.constant 0 : index
    %c0_28 = arith.constant 0 : index
    %21 = vector.load %arg10[%c0_26, %c0_27, %c0_28] : memref<16x16x288xbf16, #tpu.memory_space<vmem>>, vector<16x16x32xbf16>
    tpu.vector_store %arg10[%c0_26, %c0_27, %c0_28], %20 {strides = array<i32>} : memref<16x16x288xbf16, #tpu.memory_space<vmem>>, vector<16x16x32xbf16>,
    %22 = vector.extract_strided_slice %19 {offsets = [0, 1, 0], sizes = [16, 16, 32], strides = [1, 1, 1]} : vector<18x18x32xbf16> to vector<16x16x32xbf16>
    %c0_29 = arith.constant 0 : index
    %c0_30 = arith.constant 0 : index
    %c32 = arith.constant 32 : index
    %23 = vector.load %arg10[%c0_29, %c0_30, %c32] : memref<16x16x288xbf16, #tpu.memory_space<vmem>>, vector<16x16x32xbf16>
    tpu.vector_store %arg10[%c0_29, %c0_30, %c32], %22 {strides = array<i32>} : memref<16x16x288xbf16, #tpu.memory_space<vmem>>, vector<16x16x32xbf16>,
    %24 = vector.extract_strided_slice %19 {offsets = [0, 2, 0], sizes = [16, 16, 32], strides = [1, 1, 1]} : vector<18x18x32xbf16> to vector<16x16x32xbf16>
    %c0_31 = arith.constant 0 : index
    %c0_32 = arith.constant 0 : index
    %c64 = arith.constant 64 : index
    %25 = vector.load %arg10[%c0_31, %c0_32, %c64] : memref<16x16x288xbf16, #tpu.memory_space<vmem>>, vector<16x16x32xbf16>
    tpu.vector_store %arg10[%c0_31, %c0_32, %c64], %24 {strides = array<i32>} : memref<16x16x288xbf16, #tpu.memory_space<vmem>>, vector<16x16x32xbf16>,
    %26 = vector.extract_strided_slice %19 {offsets = [1, 0, 0], sizes = [16, 16, 32], strides = [1, 1, 1]} : vector<18x18x32xbf16> to vector<16x16x32xbf16>
    %c0_33 = arith.constant 0 : index
    %c0_34 = arith.constant 0 : index
    %c96 = arith.constant 96 : index
    %27 = vector.load %arg10[%c0_33, %c0_34, %c96] : memref<16x16x288xbf16, #tpu.memory_space<vmem>>, vector<16x16x32xbf16>
    tpu.vector_store %arg10[%c0_33, %c0_34, %c96], %26 {strides = array<i32>} : memref<16x16x288xbf16, #tpu.memory_space<vmem>>, vector<16x16x32xbf16>,
    %28 = vector.extract_strided_slice %19 {offsets = [1, 1, 0], sizes = [16, 16, 32], strides = [1, 1, 1]} : vector<18x18x32xbf16> to vector<16x16x32xbf16>
    %c0_35 = arith.constant 0 : index
    %c0_36 = arith.constant 0 : index
    %c128 = arith.constant 128 : index
    %29 = vector.load %arg10[%c0_35, %c0_36, %c128] : memref<16x16x288xbf16, #tpu.memory_space<vmem>>, vector<16x16x32xbf16>
    tpu.vector_store %arg10[%c0_35, %c0_36, %c128], %28 {strides = array<i32>} : memref<16x16x288xbf16, #tpu.memory_space<vmem>>, vector<16x16x32xbf16>,
    %30 = vector.extract_strided_slice %19 {offsets = [1, 2, 0], sizes = [16, 16, 32], strides = [1, 1, 1]} : vector<18x18x32xbf16> to vector<16x16x32xbf16>
    %c0_37 = arith.constant 0 : index
    %c0_38 = arith.constant 0 : index
    %c160 = arith.constant 160 : index
    %31 = vector.load %arg10[%c0_37, %c0_38, %c160] : memref<16x16x288xbf16, #tpu.memory_space<vmem>>, vector<16x16x32xbf16>
    tpu.vector_store %arg10[%c0_37, %c0_38, %c160], %30 {strides = array<i32>} : memref<16x16x288xbf16, #tpu.memory_space<vmem>>, vector<16x16x32xbf16>,
    %32 = vector.extract_strided_slice %19 {offsets = [2, 0, 0], sizes = [16, 16, 32], strides = [1, 1, 1]} : vector<18x18x32xbf16> to vector<16x16x32xbf16>
    %c0_39 = arith.constant 0 : index
    %c0_40 = arith.constant 0 : index
    %c192 = arith.constant 192 : index
    %33 = vector.load %arg10[%c0_39, %c0_40, %c192] : memref<16x16x288xbf16, #tpu.memory_space<vmem>>, vector<16x16x32xbf16>
    tpu.vector_store %arg10[%c0_39, %c0_40, %c192], %32 {strides = array<i32>} : memref<16x16x288xbf16, #tpu.memory_space<vmem>>, vector<16x16x32xbf16>,
    %34 = vector.extract_strided_slice %19 {offsets = [2, 1, 0], sizes = [16, 16, 32], strides = [1, 1, 1]} : vector<18x18x32xbf16> to vector<16x16x32xbf16>
    %c0_41 = arith.constant 0 : index
    %c0_42 = arith.constant 0 : index
    %c224 = arith.constant 224 : index
    %35 = vector.load %arg10[%c0_41, %c0_42, %c224] : memref<16x16x288xbf16, #tpu.memory_space<vmem>>, vector<16x16x32xbf16>
    tpu.vector_store %arg10[%c0_41, %c0_42, %c224], %34 {strides = array<i32>} : memref<16x16x288xbf16, #tpu.memory_space<vmem>>, vector<16x16x32xbf16>,
    %36 = vector.extract_strided_slice %19 {offsets = [2, 2, 0], sizes = [16, 16, 32], strides = [1, 1, 1]} : vector<18x18x32xbf16> to vector<16x16x32xbf16>
    %c0_43 = arith.constant 0 : index
    %c0_44 = arith.constant 0 : index
    %c256 = arith.constant 256 : index
    %37 = vector.load %arg10[%c0_43, %c0_44, %c256] : memref<16x16x288xbf16, #tpu.memory_space<vmem>>, vector<16x16x32xbf16>
    tpu.vector_store %arg10[%c0_43, %c0_44, %c256], %36 {strides = array<i32>} : memref<16x16x288xbf16, #tpu.memory_space<vmem>>, vector<16x16x32xbf16>,
    %c0_45 = arith.constant 0 : index
    %c0_46 = arith.constant 0 : index
    %c0_47 = arith.constant 0 : index
    %38 = vector.load %arg10[%c0_45, %c0_46, %c0_47] : memref<16x16x288xbf16, #tpu.memory_space<vmem>>, vector<16x16x288xbf16>
    %39 = vector.shape_cast %38 : vector<16x16x288xbf16> to vector<256x288xbf16>
    %c0_48 = arith.constant 0 : index
    %c0_49 = arith.constant 0 : index
    %40 = vector.load %arg3[%c0_48, %c0_49] : memref<288x32xbf16, #tpu.memory_space<vmem>>, vector<288x32xbf16>
    %cst_50 = arith.constant dense<0.000000e+00> : vector<256x32xf32>
    %41 = tpu.matmul %39, %40, %cst_50 {dimension_numbers = #tpu.dot_dimension_numbers<[1], [0], [0], [1], [0, 0, 1, 1], [], []>} : vector<256x288xbf16>, vector<288x32xbf16>, vector<256x32xf32> -> vector<256x32xf32>
    %c0_51 = arith.constant 0 : index
    %c0_52 = arith.constant 0 : index
    %42 = vector.load %arg6[%c0_51, %c0_52] : memref<1x32xf32, #tpu.memory_space<vmem>>, vector<1x32xf32>
    %43 = vector.broadcast %42 : vector<1x32xf32> to vector<256x32xf32>
    %44 = arith.addf %41, %43 : vector<256x32xf32>
    %cst_53 = arith.constant 0.000000e+00 : f32
    %45 = vector.broadcast %cst_53 : f32 to vector<256x32xf32>
    %46 = arith.maximumf %44, %45 : vector<256x32xf32>
    %47 = arith.truncf %46 : vector<256x32xf32> to vector<256x32xbf16>
    %c0_54 = arith.constant 0 : index
    %c0_55 = arith.constant 0 : index
    %48 = vector.load %arg4[%c0_54, %c0_55] : memref<32x128xbf16, #tpu.memory_space<vmem>>, vector<32x128xbf16>
    %cst_56 = arith.constant dense<0.000000e+00> : vector<256x128xf32>
    %49 = tpu.matmul %47, %48, %cst_56 {dimension_numbers = #tpu.dot_dimension_numbers<[1], [0], [0], [1], [0, 0, 1, 1], [], []>} : vector<256x32xbf16>, vector<32x128xbf16>, vector<256x128xf32> -> vector<256x128xf32>
    %c0_57 = arith.constant 0 : index
    %c0_58 = arith.constant 0 : index
    %c0_59 = arith.constant 0 : index
    %c0_60 = arith.constant 0 : index
    %50 = vector.load %arg1[%c0_57, %c0_58, %c0_59, %c0_60] : memref<1x16x16x128xbf16, #tpu.memory_space<vmem>>, vector<1x16x16x128xbf16>
    %51 = vector.shape_cast %50 : vector<1x16x16x128xbf16> to vector<16x16x128xbf16>
    %52 = vector.shape_cast %51 : vector<16x16x128xbf16> to vector<256x128xbf16>
    %53 = arith.extf %52 : vector<256x128xbf16> to vector<256x128xf32>
    %c0_61 = arith.constant 0 : index
    %c0_62 = arith.constant 0 : index
    %54 = vector.load %arg7[%c0_61, %c0_62] : memref<1x128xf32, #tpu.memory_space<vmem>>, vector<1x128xf32>
    %55 = vector.broadcast %54 : vector<1x128xf32> to vector<256x128xf32>
    %56 = arith.addf %49, %55 : vector<256x128xf32>
    %57 = arith.addf %56, %53 : vector<256x128xf32>
    %cst_63 = arith.constant 0.000000e+00 : f32
    %58 = vector.broadcast %cst_63 : f32 to vector<256x128xf32>
    %59 = arith.maximumf %57, %58 : vector<256x128xf32>
    %60 = vector.shape_cast %59 : vector<256x128xf32> to vector<16x16x128xf32>
    %61 = arith.truncf %60 : vector<16x16x128xf32> to vector<16x16x128xbf16>
    %c0_64 = arith.constant 0 : index
    %c0_65 = arith.constant 0 : index
    %c0_66 = arith.constant 0 : index
    %c0_67 = arith.constant 0 : index
    %62 = vector.load %arg8[%c0_64, %c0_65, %c0_66, %c0_67] : memref<1x16x16x128xbf16, #tpu.memory_space<vmem>>, vector<1x16x16x128xbf16>
    %63 = vector.shape_cast %62 : vector<1x16x16x128xbf16> to vector<16x16x128xbf16>
    %64 = vector.shape_cast %61 : vector<16x16x128xbf16> to vector<1x16x16x128xbf16>
    tpu.vector_store %arg8[%c0_64, %c0_65, %c0_66, %c0_67], %64 {strides = array<i32>} : memref<1x16x16x128xbf16, #tpu.memory_space<vmem>>, vector<1x16x16x128xbf16>,
    return
  }
  func.func @transform_0(%arg0: i32) -> (i32, i32, i32, i32) {
    %c0_i32 = arith.constant 0 : i32
    %c0_i32_0 = arith.constant 0 : i32
    %c0_i32_1 = arith.constant 0 : i32
    %c0_i32_2 = arith.constant 0 : i32
    return %arg0, %c0_i32, %c0_i32_0, %c0_i32_1 : i32, i32, i32, i32
  }
  func.func @transform_1(%arg0: i32) -> (i32, i32) {
    %c0_i32 = arith.constant 0 : i32
    %c0_i32_0 = arith.constant 0 : i32
    %c0_i32_1 = arith.constant 0 : i32
    return %c0_i32, %c0_i32_0 : i32, i32
  }
  func.func @transform_2(%arg0: i32) -> (i32, i32) {
    %c0_i32 = arith.constant 0 : i32
    %c0_i32_0 = arith.constant 0 : i32
    %c0_i32_1 = arith.constant 0 : i32
    return %c0_i32, %c0_i32_0 : i32, i32
  }
  func.func @transform_3(%arg0: i32) -> (i32, i32) {
    %c0_i32 = arith.constant 0 : i32
    %c0_i32_0 = arith.constant 0 : i32
    %c0_i32_1 = arith.constant 0 : i32
    return %c0_i32, %c0_i32_0 : i32, i32
  }
  func.func @transform_4(%arg0: i32) -> (i32, i32) {
    %c0_i32 = arith.constant 0 : i32
    %c0_i32_0 = arith.constant 0 : i32
    %c0_i32_1 = arith.constant 0 : i32
    return %c0_i32, %c0_i32_0 : i32, i32
  }
  func.func @transform_5(%arg0: i32) -> (i32, i32) {
    %c0_i32 = arith.constant 0 : i32
    %c0_i32_0 = arith.constant 0 : i32
    %c0_i32_1 = arith.constant 0 : i32
    return %c0_i32, %c0_i32_0 : i32, i32
  }
  func.func @transform_6(%arg0: i32) -> (i32, i32) {
    %c0_i32 = arith.constant 0 : i32
    %c0_i32_0 = arith.constant 0 : i32
    %c0_i32_1 = arith.constant 0 : i32
    return %c0_i32, %c0_i32_0 : i32, i32
  }
  func.func @transform_7(%arg0: i32) -> (i32, i32, i32, i32) {
    %c0_i32 = arith.constant 0 : i32
    %c0_i32_0 = arith.constant 0 : i32
    %c0_i32_1 = arith.constant 0 : i32
    %c0_i32_2 = arith.constant 0 : i32
    return %arg0, %c0_i32, %c0_i32_0, %c0_i32_1 : i32, i32, i32, i32
  }
}

</mosaic_0001>

<bundles_post_ra>
// kernel: bottleneck_forward_nhwc.1
= control target key start
LH: loop header
LB: loop body
LE: loop exit
PB: predicated region body
PF: predicated region fallthrough
CT: control target
= control target key end

     0   :  { %12 = vsyncpa [#allocation5], 0  ;;  %s6944_s0 = inlined_call_operand.vmem [shape: bf16[2,16,16,128], index: 0, kind: input, shape index: {}]   ;;  %s6945_s1 = inlined_call_operand.vmem [shape: bf16[128,32], index: 1, kind: input, shape index: {}]   ;;  %s6946_s2 = inlined_call_operand.vmem [shape: bf16[288,32], index: 2, kind: input, shape index: {}]   ;;  %s6947_s3 = inlined_call_operand.vmem [shape: bf16[32,128], index: 3, kind: input, shape index: {}]   ;;  %s6948_s4 = inlined_call_operand.vmem [shape: f32[1,32], index: 4, kind: input, shape index: {}]   ;;  %s6949_s5 = inlined_call_operand.vmem [shape: f32[1,32], index: 5, kind: input, shape index: {}]   ;;  %s6950_s6 = inlined_call_operand.vmem [shape: f32[1,128], index: 6, kind: input, shape index: {}]   ;;  %s6951_s7 = inlined_call_operand.hbm [shape: bf16[2,16,16,128], index: 7, kind: output, shape index: {}]  }
   0x1   :  { %14 = vsyncpa [#allocation5 + $0x1], 0  ;;  %s4911_s24 = smov 0   ;;  %s4913_s25 = smov 0  }
   0x2   :  { %s4915_s26 = smov 0   ;;  %s4917_s27 = smov 0  }
   0x3 LB: > { %s4932_s28 = sadd.s32 4294967295, %s4864_s27   ;;  %s4032_s29 = sadd.s32 4294967294, %s4864_s27   ;;  %s4864_s27 = sphi %s4917_s27, %s6989_s27   ;;  %s4860_s26 = sphi %s4915_s26, %s6988_s26   ;;  %s4856_s25 = sphi %s4913_s25, %s6987_s25   ;;  %s4852_s24 = sphi %s4911_s24, %s6986_s24  }
   0x4   : > { %s4936_s30 = sadd.s32 1, %s4864_s27   ;;  %s179_s8 = sadd.s32 1, %s4860_s26 }
   0x5   : > { %s176_s9 = ssub.s32 %s4864_s27, %s4936_s30  ;;  %p189_p0 = scmp.ne.s32.totalorder %s4860_s26, %s4856_s25 }
   0x6   : > { %p177_p1 = scmp.eq.s32.totalorder %s176_s9, 0  ;;  %p190_p2 = scmp.eq.s32.totalorder %s4932_s28, 1 }
   0x7   : > { %p195_p3 = scmp.ne.s32.totalorder %s4856_s25, %s4852_s24  ;;  %p196_p4 = scmp.eq.s32.totalorder %s4032_s29, 1 }
   0x8   : > { %s4947_s10 = scalar_select %p177_p1, %s4860_s26, %s179_s8  }
   0x9   : > { %p4949_p5 = por %p190_p2, %p189_p0  ;;  %p4953_p6 = por %p196_p4, %p195_p3 }
   0xa   : > { %p4035_p7 = scmp.ge.s32.totalorder %s4864_s27, 1  ;;  %p240_p8 = scmp.lt.s32.totalorder %s4864_s27, 3 }
   0xc   : > { %p241_p9 = pnand %p4035_p7, %p240_p8 }
   0xe   : > { %244 = sbr.rel (%p241_p9) target bundleno = 1122 (0x462), region = 48 }
  0x13   : > { %v4486_v0 = vld [vmem:[%s6945_s1 + $0x38] sm:$0xff]  ;;  %v4485_v1 = vld [vmem:[%s6945_s1 + $0x30] sm:$0xff]  ;;  %v4484_v2 = vld [vmem:[%s6945_s1 + $0x28] sm:$0xff]  ;;  %p272_p10 = scmp.lt.s32.totalorder %s4932_s28, 1  ;;  %vm281_vm0 = vcmask 253952   ;;  %v4866_v16 = vmov 0  }
  0x14   : > { %596 = vmatpush.bf16.msra.mxu0 %v4486_v0  ;;  %4730 = vmatpush.bf16.msra.mxu1 %v4486_v0  ;;  %v4483_v3 = vld [vmem:[%s6945_s1 + $0x20] sm:$0xff]  ;;  %v4482_v4 = vld [vmem:[%s6945_s1 + $0x18] sm:$0xff]  ;;  %v4481_v5 = vld [vmem:[%s6945_s1 + $0x10] sm:$0xff]  ;;  %282 = vst.msk [vmem:[#allocation2 + $0x8] sm:$0x1] %vm281_vm0, %v4866_v16  ;;  %vm278_vm1 = vcmask 257024  }
  0x15   : > { %4731 = vmatpush.bf16.msra.mxu2 %v4486_v0  ;;  %s273_s8 = scalar_select %p272_p10, %s4932_s28, 1  ;;  %v4480_v6 = vld [vmem:[%s6945_s1 + $0x8] sm:$0xff]  ;;  %v4479_v7 = vld [vmem:[%s6945_s1] sm:$0xff]  ;;  %286 = vst.msk [vmem:[#allocation2 + $0xd4] sm:$0x1] %vm281_vm0, %v4866_v16  ;;  %vm1836_vm9 = vcmask 1042432  }
  0x16   : > { %vm288_vm2 = vsmask.f32 256  ;;  %v293_v17 = vld [vmem:[#allocation2 + $0xc] sm:$0x1]  ;;  %vm344_vm3 = vsmask.f32 7938 }
  0x17   : > { %s4462_s14 = sshll.u32 %s273_s8, 7  ;;  %vm5002_vm4 = vmand %vm281_vm0, %vm288_vm2  ;;  %280 = vst.msk [vmem:[#allocation2 + $0x4] sm:$0xf] %vm278_vm1, %v4866_v16  ;;  %vm1272_vm6 = vsmask.f32 3328  ;;  %vm1837_vm10 = vcmask 1046532  }
  0x18   : > { %597 = vmatpush.bf16.msra.mxu0 %v4485_v1  ;;  %4732 = vmatpush.bf16.msra.mxu1 %v4485_v1  ;;  %s4988_s19 = scalar_lea.vmem %s6944_s0, %s4462_s14  ;;  %v294_v19 = vsel %vm5002_vm4, 0, %v293_v17  ;;  %284 = vst.msk [vmem:[#allocation2 + $0xcc] sm:$0xf] %vm278_vm1, %v4866_v16  ;;  %vm5012_vm5 = vmand %vm281_vm0, %vm344_vm3  ;;  %vm1273_vm7 = vsmask.f32 7440  ;;  %s4867_s20 = smov 32  }
  0x19   : > { %4733 = vmatpush.bf16.msra.mxu2 %v4485_v1  ;;  %v4463_v8 = vld [vmem:[%s4988_s19] sm:$0xff]  ;;  %v4473_v9 = vld [vmem:[%s4988_s19 + $0x50] sm:$0xff]  ;;  %v4464_v10 = vld [vmem:[%s4988_s19 + $0x8] sm:$0xff]  ;;  %295 = vst [vmem:[#allocation2 + $0xc] sm:$0x1] %v294_v19  ;;  %s4868_s21 = smov 64  }
  0x1a   : > { %v4474_v11 = vld [vmem:[%s4988_s19 + $0x58] sm:$0xff]  ;;  %v4465_v12 = vld [vmem:[%s4988_s19 + $0x10] sm:$0xff]  ;;  %v4467_v14 = vld [vmem:[%s4988_s19 + $0x20] sm:$0xff]  ;;  %285 = vst.msk [vmem:[#allocation2 + $0xd0] sm:$0xf] %vm278_vm1, %v4866_v16  ;;  %s4869_s29 = smov 96  }
  0x1b   : > { %v4466_v13 = vld [vmem:[%s4988_s19 + $0x18] sm:$0xff]  ;;  %v4468_v15 = vld [vmem:[%s4988_s19 + $0x28] sm:$0xff]  ;;  %279 = vst.msk [vmem:[#allocation2] sm:$0xf] %vm278_vm1, %v4866_v16  ;;  %v4469_v28 = vld [vmem:[%s4988_s19 + $0x30] sm:$0xff]  ;;  %vm3241_vm15 = vcmask 261120  }
  0x1c   : > { %598 = vmatpush.bf16.msra.mxu0 %v4484_v2  ;;  %4734 = vmatpush.bf16.msra.mxu1 %v4484_v2  ;;  %v346_v21 = vld [vmem:[#allocation2 + $0x8] sm:$0x1]  ;;  %v323_v34 = vld [vmem:[#allocation2 + $0x84] sm:$0x1]  ;;  %vm5022_vm8 = vmor %vm1272_vm6, %vm1273_vm7  ;;  %vm749_vm13 = vsmask.f32 4368 }
  0x1d   : > { %4735 = vmatpush.bf16.msra.mxu2 %v4484_v2  ;;  %v347_v22 = vsel %vm5012_vm5, 0, %v346_v21  ;;  %v324_v38 = vsel %vm5002_vm4, 0, %v323_v34  ;;  %vm5028_vm11 = vmor %vm1836_vm9, %vm1837_vm10  ;;  %v349_v45 = vld [vmem:[#allocation2 + $0x14] sm:$0x1]  ;;  %v379_v47 = vld [vmem:[#allocation2 + $0x8c] sm:$0x1] }
  0x1e   : > { %348 = vst [vmem:[#allocation2 + $0x8] sm:$0x1] %v347_v22  ;;  %v1187_v23 = vld [vmem:[#allocation2 + $0x4] sm:$0xf]  ;;  %v350_v46 = vsel %vm5012_vm5, 0, %v349_v45  ;;  %v380_v49 = vsel %vm5012_vm5, 0, %v379_v47  ;;  %vm5074_vm12 = vmand %vm278_vm1, %vm344_vm3 }
  0x1f   : > { %v1285_v24 = vshll.u32 %v1187_v23, 16  ;;  %v1289_v25 = vshrl.u32 %v1187_v23, 16  ;;  %1241 = vst.msk [vmem:[#allocation3 + $0xc] sm:$0xf] %vm278_vm1, %v1187_v23  ;;  %v1841_v32 = vrot.slane %v1187_v23, 5  ;;  %v4470_v52 = vld [vmem:[%s4988_s19 + $0x38] sm:$0xff]  ;;  %vm5089_vm14 = vmor %vm288_vm2, %vm749_vm13 }
  0x20   : > { %599 = vmatpush.bf16.msra.mxu0 %v4483_v3  ;;  %4736 = vmatpush.bf16.msra.mxu1 %v4483_v3  ;;  %325 = vst [vmem:[#allocation2 + $0x84] sm:$0x1] %v324_v38  ;;  %v341_v53 = vld [vmem:[#allocation2 + $0xcc] sm:$0x1]  ;;  %v397_v54 = vld [vmem:[#allocation2 + $0xd4] sm:$0x1] }
  0x21   : > { %4737 = vmatpush.bf16.msra.mxu2 %v4483_v3  ;;  %v1287_v26 = vrot.slane %v1285_v24, 5  ;;  %v1291_v27 = vrot.slane %v1289_v25, 4  ;;  %v1843_v37 = vrot.slane %v1841_v32, 4  ;;  %351 = vst [vmem:[#allocation2 + $0x14] sm:$0x1] %v350_v46  ;;  %v342_v55 = vsel %vm5002_vm4, 0, %v341_v53 }
  0x22   : > { %v290_v41 = vld [vmem:[#allocation2] sm:$0x1]  ;;  %v398_v56 = vsel %vm5012_vm5, 0, %v397_v54  ;;  %381 = vst [vmem:[#allocation2 + $0x8c] sm:$0x1] %v380_v49  ;;  %vm1755_vm0 = vcmask 519424  }
  0x23   : > { %v1292_v30 = vor.u32 %v1291_v27, %v1287_v26  ;;  %v291_v43 = vsel %vm5002_vm4, 0, %v290_v41  ;;  %343 = vst [vmem:[#allocation2 + $0xcc] sm:$0x1] %v342_v55  ;;  %v296_v0 = vld [vmem:[#allocation2 + $0x18] sm:$0x1]  ;;  %vm2047_vm2 = vcmask 781824  }
  0x24   : > { %600 = vmatpush.bf16.msra.mxu0 %v4482_v4  ;;  %4738 = vmatpush.bf16.msra.mxu1 %v4482_v4  ;;  %292 = vst [vmem:[#allocation2] sm:$0x1] %v291_v43  ;;  %v297_v1 = vsel %vm5002_vm4, 0, %v296_v0  ;;  %v5061_v2 = vld [vmem:[%s6948_s4] ss:$0 sm:$0xff]  ;;  %v4472_v43 = vld [vmem:[%s4988_s19 + $0x48] sm:$0xff] }
  0x25   : > { %4739 = vmatpush.bf16.msra.mxu2 %v4482_v4  ;;  %v1188_v29 = vld [vmem:[#allocation2 + $0x8] sm:$0x1]  ;;  %v1293_v33 = vrot.slane %v1292_v30, 4  ;;  %399 = vst [vmem:[#allocation2 + $0xd4] sm:$0x1] %v398_v56  ;;  %v4471_v4 = vld [vmem:[%s4988_s19 + $0x40] sm:$0xff] }
  0x26   : > { %v1295_v31 = vshll.u32 %v1188_v29, 16  ;;  %v1844_v40 = vrot.slane %v1188_v29, 5  ;;  %298 = vst [vmem:[#allocation2 + $0x18] sm:$0x1] %v297_v1  ;;  %v352_v3 = vld [vmem:[#allocation2 + $0x20] sm:$0x1] }
  0x27   : > { %v299_v24 = vld [vmem:[#allocation2 + $0x24] sm:$0x1]  ;;  %v1074_v30 = vld [vmem:[#allocation2 + $0xc] sm:$0xf]  ;;  %vm2178_vm3 = vcmask 1044224   ;;  %s269_s22 = sand.u32 1, %s4856_s25  }
  0x28   : > { %601 = vmatpush.bf16.msra.mxu0 %v4481_v5  ;;  %4740 = vmatpush.bf16.msra.mxu1 %v4481_v5  ;;  %v1297_v36 = vrot.slane %v1295_v31, 5  ;;  %v1845_v44 = vsel %vm5028_vm11, %v1843_v37, %v1844_v40  ;;  %v1144_v31 = vld [vmem:[#allocation2 + $0x84] sm:$0xf]  ;;  %v1078_v49 = vld [vmem:[#allocation2 + $0x14] sm:$0x1]  ;;  %v4554_v39 = vld [vmem:[%s6947_s3 + $0x8] sm:$0xff] }
  0x29   : > { %4741 = vmatpush.bf16.msra.mxu2 %v4481_v5  ;;  %1953 = vrot.lane.b32.xlu0 %v1845_v44, %s4868_s21  ;;  %v353_v5 = vsel %vm5012_vm5, 0, %v352_v3  ;;  %v355_v56 = vld [vmem:[#allocation2 + $0x2c] sm:$0x1]  ;;  %s4036_s23 = sshll.u32 %s269_s22, 7  ;;  %s4555_s14 = sshll.u32 %s4932_s28, 7 }
  0x2a   : > { %v1298_v42 = vsel %vm5022_vm8, %v1293_v33, %v1297_v36  ;;  %354 = vst [vmem:[#allocation2 + $0x20] sm:$0x1] %v353_v5  ;;  %s6723_s8 = scalar_lea.vmem [#allocation4], %s4036_s23  ;;  %s3966_s17 = scalar_lea.hbm %s6951_s7, %s4555_s14 }
  0x2b   : > { %1661 = vrot.lane.b32.xlu1 %v1298_v42, %s4867_s20  ;;  %v1186_v48 = vld [vmem:[#allocation2] sm:$0xf]  ;;  %s3967_s18 = sshll.u32 %s6723_s8, 4  ;;  %s3969_s23 = sshll.u32 %s3966_s17, 4  ;;  %s3968_s18 = int_to_ptr.vmem [resolvable:$true] %s3967_s18  ;;  %s3970_s23 = int_to_ptr.hbm [resolvable:$true] %s3969_s23 }
  0x2c   : > { %602 = vmatpush.bf16.msra.mxu0 %v4480_v6  ;;  %4742 = vmatpush.bf16.msra.mxu1 %v4480_v6  ;;  %v1276_v50 = vshrl.u32 %v1186_v48, 16  ;;  %v1279_v51 = vshll.u32 %v1186_v48, 16  ;;  %v4135_v57 = vrot.slane %v1186_v48, 9  ;;  %1240 = vst.msk [vmem:[#allocation3] sm:$0xf] %vm278_vm1, %v1186_v48  ;;  %s3955_s28 = scalar_lea.sflag [#allocation5], %s269_s22 }
  0x2d   : > { %4743 = vmatpush.bf16.msra.mxu2 %v4480_v6  ;;  %s4822_s13 = scalar_lea.hbm %s6951_s7, 256 }
  0x2e   : > { %v1278_v58 = vrot.slane %v1276_v50, 4  ;;  %v1281_v59 = vrot.slane %v1279_v51, 5  ;;  %v1842_v60 = vsel %vm5028_vm11, %v4135_v57, %v1841_v32  ;;  %v300_v32 = vsel %vm5002_vm4, 0, %v299_v24 }
  0x2f   : > { %1951 = vrot.lane.b32.xlu2 %v1842_v60, %s4868_s21  ;;  %301 = vst [vmem:[#allocation2 + $0x24] sm:$0x1] %v300_v32 }
  0x30   : > { %603 = vmatpush.bf16.msra.mxu0 %v4479_v7  ;;  %4744 = vmatpush.bf16.msra.mxu1 %v4479_v7  ;;  %v1282_v61 = vor.u32 %v1281_v59, %v1278_v58  ;;  %v1148_v59 = vld [vmem:[#allocation2 + $0x8c] sm:$0x1] }
  0x31   : > { %4745 = vmatpush.bf16.msra.mxu2 %v4479_v7 }
  0x32   : > { %v1283_v62 = vrot.slane %v1282_v61, 4 }
  0x33   : > { %604 = vmatmul.bf16.vlgmr.msra.gmra.mxu0 %v4463_v8  ;;  %654 = vmatmul.bf16.vlgmr.msra.gmra.mxu1 %v4473_v9  ;;  %v326_v8 = vld [vmem:[#allocation2 + $0x90] sm:$0x1] }
  0x34   : > { %v1288_v63 = vsel %vm5022_vm8, %v1283_v62, %v1287_v26  ;;  %v356_v62 = vsel %vm5012_vm5, 0, %v355_v56 }
  0x35   : > { %1659 = vrot.lane.b32.xlu0 %v1288_v63, %s4867_s20  ;;  %357 = vst [vmem:[#allocation2 + $0x2c] sm:$0x1] %v356_v62 }
  0x43   : > { %609 = vmatmul.bf16.gmra.mxu0 %v4464_v10  ;;  %659 = vmatmul.bf16.gmra.mxu1 %v4474_v11  ;;  %v327_v11 = vsel %vm5002_vm4, 0, %v326_v8 }
  0x44   : > { %328 = vst [vmem:[#allocation2 + $0x90] sm:$0x1] %v327_v11 }
  0x53   : > { %614 = vmatmul.bf16.gmra.mxu0 %v4465_v12 }
  0x63   : > { %619 = vmatmul.bf16.gmra.mxu0 %v4466_v13 }
  0x73   : > { %624 = vmatmul.bf16.gmra.mxu0 %v4467_v14 }
  0x83   : > { %629 = vmatmul.bf16.gmra.mxu0 %v4468_v15 }
  0x93   : > { %634 = vmatmul.bf16.gmra.mxu0 %v4469_v28 }
  0xa3   : > { %639 = vmatmul.bf16.gmra.mxu0 %v4470_v52 }
  0xb0   : > { %v605_v6 = vpop.f32.mrf.mxu0  ;;  %v655_v7 = vpop.f32.mrf.mxu1 }
  0xb1   : > { %v606_v9 = vadd.f32 %v5061_v2, %v605_v6  ;;  %v656_v10 = vadd.f32 %v5061_v2, %v655_v7 }
  0xb3   : > { %v685_v12 = vmax.f32 %v606_v9, 0.0  ;;  %v705_v13 = vmax.f32 %v656_v10, 0.0  ;;  %644 = vmatmul.bf16.gmra.mxu0 %v4471_v4 }
  0xb5   : > { %v717_v14 = vpack.c.bf16 %v685_v12, %v685_v12  ;;  %v737_v15 = vpack.c.bf16 %v705_v13, %v705_v13  ;;  %v382_v12 = vld [vmem:[#allocation2 + $0x98] sm:$0x1] }
  0xb6   : > { %v383_v32 = vsel %vm5012_vm5, 0, %v382_v12 }
  0xb7   : > { %v752_v16 = vshrl.u32 %v717_v14, 16  ;;  %v755_v17 = vshll.u32 %v717_v14, 16  ;;  %v922_v19 = vshrl.u32 %v737_v15, 16  ;;  %v925_v21 = vshll.u32 %v737_v15, 16  ;;  %384 = vst [vmem:[#allocation2 + $0x98] sm:$0x1] %v383_v32 }
  0xb8   : > { %v607_v22 = vpop.f32.mrf.mxu0  ;;  %v657_v23 = vpop.f32.mrf.mxu1 }
  0xb9   : > { %v754_v25 = vrot.slane %v752_v16, 7  ;;  %v924_v26 = vrot.slane %v922_v19, 7  ;;  %v608_v27 = vadd.f32 %v5061_v2, %v607_v22  ;;  %v658_v28 = vadd.f32 %v5061_v2, %v657_v23 }
  0xbb   : > { %v757_v33 = vor.u32 %v755_v17, %v754_v25  ;;  %v927_v34 = vor.u32 %v925_v21, %v924_v26  ;;  %v686_v36 = vmax.f32 %v608_v27, 0.0  ;;  %v706_v37 = vmax.f32 %v658_v28, 0.0  ;;  %v1081_v17 = vld [vmem:[#allocation2 + $0x18] sm:$0xf]  ;;  %v1151_v27 = vld [vmem:[#allocation2 + $0x90] sm:$0xf] }
  0xbc   : > { %v758_v48 = vrot.slane %v754_v25, 4  ;;  %v928_v57 = vrot.slane %v924_v26, 4 }
  0xbd   : > { %v1075_v38 = vsel %vm5074_vm12, %v757_v33, %v1074_v30  ;;  %v1145_v40 = vsel %vm5074_vm12, %v927_v34, %v1144_v31  ;;  %v718_v41 = vpack.c.bf16 %v686_v36, %v686_v36  ;;  %v738_v42 = vpack.c.bf16 %v706_v37, %v706_v37 }
  0xbe   : > { %1076 = vst [vmem:[#allocation2 + $0xc] sm:$0xf] %v1075_v38 }
  0xbf   : > { %1146 = vst [vmem:[#allocation2 + $0x84] sm:$0xf] %v1145_v40  ;;  %v760_v44 = vshrl.u32 %v718_v41, 16  ;;  %v930_v45 = vshrl.u32 %v738_v42, 16  ;;  %v763_v53 = vshll.u32 %v718_v41, 16  ;;  %v933_v55 = vshll.u32 %v738_v42, 16 }
  0xc0   : > { %v610_v46 = vpop.f32.mrf.mxu0  ;;  %v660_v47 = vpop.f32.mrf.mxu1 }
  0xc1   : > { %v611_v50 = vadd.f32 %v5061_v2, %v610_v46  ;;  %v661_v51 = vadd.f32 %v5061_v2, %v660_v47  ;;  %v762_v52 = vrot.slane %v760_v44, 7  ;;  %v932_v54 = vrot.slane %v930_v45, 7 }
  0xc3   : > { %v687_v60 = vmax.f32 %v611_v50, 0.0  ;;  %649 = vmatmul.bf16.gmra.mxu0 %v4472_v43  ;;  %v707_v61 = vmax.f32 %v661_v51, 0.0  ;;  %v765_v63 = vor.u32 %v763_v53, %v762_v52  ;;  %v767_v0 = vrot.slane %v762_v52, 4  ;;  %v4552_v43 = vld [vmem:[%s6946_s2 + $0x88] sm:$0xff] }
  0xc4   : > { %v935_v1 = vor.u32 %v933_v55, %v932_v54  ;;  %v937_v3 = vrot.slane %v932_v54, 4  ;;  %3474 = vmatpush.bf16.msrb.mxu0 %v4552_v43  ;;  %4746 = vmatpush.bf16.msra.mxu3 %v4552_v43 }
  0xc5   : > { %v719_v4 = vpack.c.bf16 %v687_v60, %v687_v60  ;;  %v5095_v5 = vld [vmem:[#allocation2 + $0xc] sm:$0xf]  ;;  %v739_v6 = vpack.c.bf16 %v707_v61, %v707_v61  ;;  %v766_v7 = vsel %vm5089_vm14, %v758_v48, %v765_v63  ;;  %v1079_v8 = vsel %vm5002_vm4, %v767_v0, %v1078_v49 }
  0xc6   : > { %v936_v9 = vsel %vm5089_vm14, %v928_v57, %v935_v1  ;;  %v1149_v10 = vsel %vm5002_vm4, %v937_v3, %v1148_v59  ;;  %v5105_v11 = vld [vmem:[#allocation2 + $0x84] sm:$0xf]  ;;  %2082 = vrot.lane.b32.xlu1 %v5095_v5, %s4869_s29  ;;  %1077 = vst.msk [vmem:[#allocation2 + $0x10] sm:$0xf] %vm278_vm1, %v766_v7  ;;  %v1300_v33 = vshrl.u32 %v5095_v5, 16  ;;  %v1303_v38 = vshll.u32 %v5095_v5, 16 }
  0xc7   : > { %v769_v13 = vshrl.u32 %v719_v4, 16  ;;  %v772_v14 = vshll.u32 %v719_v4, 16  ;;  %2473 = vrot.lane.b32.xlu2 %v5105_v11, %s4868_s21  ;;  %v939_v15 = vshrl.u32 %v739_v6, 16  ;;  %v942_v16 = vshll.u32 %v739_v6, 16  ;;  %1080 = vst [vmem:[#allocation2 + $0x14] sm:$0x1] %v1079_v8 }
  0xc8   : > { %v612_v19 = vpop.f32.mrf.mxu0  ;;  %v1540_v21 = vshrl.u32 %v5105_v11, 16  ;;  %v1543_v22 = vshll.u32 %v5105_v11, 16  ;;  %v662_v23 = vpop.f32.mrf.mxu1  ;;  %1147 = vst.msk [vmem:[#allocation2 + $0x88] sm:$0xf] %vm278_vm1, %v936_v9  ;;  %v4136_v40 = vrot.slane %v5095_v5, 9  ;;  %v4146_v42 = vrot.slane %v5105_v11, 9 }
  0xc9   : > { %v5115_v24 = vrot.slane %v769_v13, 7  ;;  %v613_v25 = vadd.f32 %v5061_v2, %v612_v19  ;;  %v5118_v26 = vrot.slane %v939_v15, 7  ;;  %v663_v28 = vadd.f32 %v5061_v2, %v662_v23  ;;  %1150 = vst [vmem:[#allocation2 + $0x8c] sm:$0x1] %v1149_v10  ;;  %v1085_v1 = vld [vmem:[#allocation2 + $0x20] sm:$0x1] }
  0xca   : > { %v1542_v30 = vrot.slane %v1540_v21, 4  ;;  %v1545_v31 = vrot.slane %v1543_v22, 5  ;;  %1262 = vst.msk [vmem:[#allocation3 + $0x108] sm:$0xf] %vm278_vm1, %v5105_v11  ;;  %v5146_v54 = vrot.slane %v1300_v33, 4  ;;  %v5148_v55 = vrot.slane %v1303_v38, 5 }
  0xcb   : > { %v774_v34 = vor.u32 %v772_v14, %v5115_v24  ;;  %v688_v36 = vmax.f32 %v613_v25, 0.0  ;;  %v944_v37 = vor.u32 %v942_v16, %v5118_v26  ;;  %1242 = vst.msk [vmem:[#allocation3 + $0x18] sm:$0xf] %vm278_vm1, %v5095_v5  ;;  %v708_v41 = vmax.f32 %v663_v28, 0.0  ;;  %v1155_v15 = vld [vmem:[#allocation2 + $0x98] sm:$0x1] }
  0xcc   : > { %v1546_v47 = vor.u32 %v1545_v31, %v1542_v30  ;;  %v775_v48 = vrot.slane %v5115_v24, 4  ;;  %v945_v49 = vrot.slane %v5118_v26, 4  ;;  %v302_v24 = vld [vmem:[#allocation2 + $0x30] sm:$0x1]  ;;  %v4551_v30 = vld [vmem:[%s6946_s2 + $0x80] sm:$0xff] }
  0xcd   : > { %v1082_v44 = vsel %vm5074_vm12, %v774_v34, %v1081_v17  ;;  %v720_v45 = vpack.c.bf16 %v688_v36, %v688_v36  ;;  %v1152_v46 = vsel %vm5074_vm12, %v944_v37, %v1151_v27  ;;  %v5142_v50 = vld [vmem:[#allocation2 + $0x10] sm:$0xf]  ;;  %v740_v51 = vpack.c.bf16 %v708_v41, %v708_v41  ;;  %v1088_v38 = vld [vmem:[#allocation2 + $0x24] sm:$0xf]  ;;  %3475 = vmatpush.bf16.msrb.mxu0 %v4551_v30 }
  0xce   : > { %1083 = vst [vmem:[#allocation2 + $0x18] sm:$0xf] %v1082_v44  ;;  %v1547_v63 = vrot.slane %v1546_v47, 4  ;;  %v1848_v3 = vrot.slane %v5142_v50, 5  ;;  %v5184_v28 = vld [vmem:[#allocation2 + $0x14] sm:$0x1]  ;;  %v1306_v37 = vor.u32 %v5148_v55, %v5146_v54  ;;  %4747 = vmatpush.bf16.msra.mxu3 %v4551_v30 }
  0xcf   : > { %v777_v52 = vshrl.u32 %v720_v45, 16  ;;  %v780_v53 = vshll.u32 %v720_v45, 16  ;;  %1153 = vst [vmem:[#allocation2 + $0x90] sm:$0xf] %v1152_v46  ;;  %2084 = vrot.lane.b32.xlu2 %v5142_v50, %s4869_s29  ;;  %v5150_v56 = vld [vmem:[#allocation2 + $0x88] sm:$0xf] }
  0xd0   : > { %1243 = vst.msk [vmem:[#allocation3 + $0x24] sm:$0xf] %vm278_vm1, %v5142_v50  ;;  %v615_v57 = vpop.f32.mrf.mxu0  ;;  %v947_v59 = vshrl.u32 %v740_v51, 16  ;;  %v950_v60 = vshll.u32 %v740_v51, 16  ;;  %2475 = vrot.lane.b32.xlu0 %v5150_v56, %s4868_s21  ;;  %v1549_v0 = vshll.u32 %v5150_v56, 16  ;;  %v1918_v5 = vrot.slane %v5150_v56, 5 }
  0xd1   : > { %v779_v61 = vrot.slane %v777_v52, 7  ;;  %1263 = vst.msk [vmem:[#allocation3 + $0x114] sm:$0xf] %vm278_vm1, %v5150_v56  ;;  %v616_v62 = vadd.f32 %v5061_v2, %v615_v57  ;;  %v1553_v6 = vshrl.u32 %v5150_v56, 16  ;;  %v1221_v12 = vld [vmem:[#allocation2 + $0x8c] sm:$0x1]  ;;  %v1849_v25 = vsel %vm5028_vm11, %v4136_v40, %v1848_v3 }
  0xd2   : > { %v949_v4 = vrot.slane %v947_v59, 7  ;;  %v1551_v10 = vrot.slane %v1549_v0, 5  ;;  %v1920_v16 = vrot.slane %v1918_v5, 4  ;;  %v5165_v17 = vsel %vm5028_vm11, %v4146_v42, %v1918_v5  ;;  %3743 = vmatpush.bf16.msrb.mxu3 %v4554_v39 }
  0xd3   : > { %v782_v7 = vor.u32 %v780_v53, %v779_v61  ;;  %v784_v8 = vrot.slane %v779_v61, 4  ;;  %v689_v9 = vmax.f32 %v616_v62, 0.0  ;;  %2775 = vst.msk [vmem:[#allocation3 + $0xe0] sm:$0xf] %vm278_vm1, %v5165_v17  ;;  %v1921_v27 = vrot.slane %v1221_v12, 5 }
  0xd4   : > { %v952_v13 = vor.u32 %v950_v60, %v949_v4  ;;  %v954_v14 = vrot.slane %v949_v4, 4  ;;  %v5173_v23 = vsel %vm5022_vm8, %v1547_v63, %v1551_v10  ;;  %v303_v42 = vsel %vm5002_vm4, 0, %v302_v24 }
  0xd5   : > { %v783_v19 = vsel %vm5089_vm14, %v775_v48, %v782_v7  ;;  %v1086_v21 = vsel %vm5002_vm4, %v784_v8, %v1085_v1  ;;  %v721_v22 = vpack.c.bf16 %v689_v9, %v689_v9  ;;  %2625 = vrot.lane.b32.xlu1 %v5173_v23, %s4869_s29  ;;  %v5194_v36 = vld [vmem:[#allocation2 + $0x18] sm:$0xf]  ;;  %2287 = vst.msk [vmem:[#allocation3 + $0xf4] sm:$0xf] %vm278_vm1, %v5173_v23  ;;  %v1555_v43 = vrot.slane %v1553_v6, 4 }
  0xd6   : > { %1084 = vst.msk [vmem:[#allocation2 + $0x1c] sm:$0xf] %vm278_vm1, %v783_v19  ;;  %v953_v26 = vsel %vm5089_vm14, %v945_v49, %v952_v13  ;;  %v1156_v33 = vsel %vm5002_vm4, %v954_v14, %v1155_v15  ;;  %v5192_v34 = vld [vmem:[#allocation2 + $0x90] sm:$0xf]  ;;  %v5202_v41 = vsel %vm5028_vm11, %v1920_v16, %v1921_v27  ;;  %v1559_v44 = vshll.u32 %v1221_v12, 16 }
  0xd7   : > { %1087 = vst [vmem:[#allocation2 + $0x20] sm:$0x1] %v1086_v21  ;;  %v786_v31 = vshrl.u32 %v721_v22, 16  ;;  %v789_v32 = vshll.u32 %v721_v22, 16  ;;  %1955 = vrot.lane.b32.xlu2 %v1849_v25, %s4868_s21  ;;  %v4147_v47 = vrot.slane %v5192_v34, 9  ;;  %v4137_v49 = vrot.slane %v5194_v36, 9 }
  0xd8   : > { %6970 = vst [vmem:[#allocation7_spill] sm:$0xff] %v5192_v34  ;;  %v617_v40 = vpop.f32.mrf.mxu0  ;;  %2307 = vrot.lane.b32.xlu0 %v1849_v25, %s4867_s20  ;;  %v5212_v48 = vld [vmem:[#allocation2 + $0x38] sm:$0x1]  ;;  %v1556_v51 = vor.u32 %v1555_v43, %v1551_v10  ;;  %v5215_v52 = vrot.slane %v1848_v3, 4  ;;  %v1851_v53 = vrot.slane %v5184_v28, 5  ;;  %v1561_v57 = vrot.slane %v1559_v44, 5 }
  0xd9   : > { %6971 = vst [vmem:[#allocation8_spill] sm:$0xff] %v5202_v41  ;;  %v5206_v45 = vrot.slane %v786_v31, 7  ;;  %v618_v46 = vadd.f32 %v5061_v2, %v617_v40  ;;  %v5221_v59 = vrot.slane %v1306_v37, 4  ;;  %v359_v61 = vsel %vm5012_vm5, 0, %v5212_v48  ;;  %v1092_v27 = vld [vmem:[#allocation2 + $0x2c] sm:$0x1] }
  0xda   : > { %1154 = vst.msk [vmem:[#allocation2 + $0x94] sm:$0xf] %vm278_vm1, %v953_v26  ;;  %v1309_v62 = vshll.u32 %v5142_v50, 16  ;;  %v1313_v63 = vshrl.u32 %v5142_v50, 16  ;;  %v1557_v4 = vrot.slane %v1556_v51, 4  ;;  %v1319_v5 = vshll.u32 %v5184_v28, 16 }
  0xdb   : > { %1157 = vst [vmem:[#allocation2 + $0x98] sm:$0x1] %v1156_v33  ;;  %v791_v54 = vor.u32 %v789_v32, %v5206_v45  ;;  %v690_v55 = vmax.f32 %v618_v46, 0.0  ;;  %v792_v60 = vrot.slane %v5206_v45, 4  ;;  %v1324_v19 = vshrl.u32 %v5194_v36, 16 }
  0xdc   : > { %2776 = vst.msk [vmem:[#allocation3 + $0xec] sm:$0xf] %vm278_vm1, %v5202_v41  ;;  %v1311_v8 = vrot.slane %v1309_v62, 5  ;;  %v1315_v12 = vrot.slane %v1313_v63, 4  ;;  %v5272_v32 = vsel %vm5022_vm8, %v1557_v4, %v1561_v57  ;;  %v1327_v33 = vshll.u32 %v5194_v36, 16 }
  0xdd   : > { %1264 = vst.msk [vmem:[#allocation3 + $0x120] sm:$0xf] %vm278_vm1, %v5192_v34  ;;  %v1089_v0 = vsel %vm5074_vm12, %v791_v54, %v1088_v38  ;;  %v722_v1 = vpack.c.bf16 %v690_v55, %v690_v55  ;;  %v5233_v3 = vld [vmem:[#allocation2 + $0x1c] sm:$0xf]  ;;  %2349 = vrot.lane.b32.xlu1 %v5202_v41, %s4867_s20  ;;  %v1326_v45 = vrot.slane %v1324_v19, 4  ;;  %v5309_v63 = vsel %vm5028_vm11, %v5215_v52, %v1851_v53 }
  0xde   : > { %304 = vst [vmem:[#allocation2 + $0x30] sm:$0x1] %v303_v42  ;;  %v5238_v6 = vld [vmem:[#allocation2 + $0x20] sm:$0x1]  ;;  %v1855_v7 = vrot.slane %v5233_v3, 5  ;;  %v1316_v26 = vor.u32 %v1315_v12, %v1311_v8  ;;  %v1329_v57 = vrot.slane %v1327_v33, 5 }
  0xdf   : > { %1090 = vst [vmem:[#allocation2 + $0x24] sm:$0xf] %v1089_v0  ;;  %v794_v50 = vshrl.u32 %v722_v1, 16  ;;  %v797_v9 = vshll.u32 %v722_v1, 16  ;;  %2477 = vrot.lane.b32.xlu2 %v5192_v34, %s4868_s21  ;;  %v1858_v10 = vrot.slane %v5238_v6, 5  ;;  %v1337_v62 = vshrl.u32 %v5233_v3, 16 }
  0xe0   : > { %1244 = vst.msk [vmem:[#allocation3 + $0x30] sm:$0xf] %vm278_vm1, %v5194_v36  ;;  %v620_v14 = vpop.f32.mrf.mxu0  ;;  %v5250_v15 = vsel %vm5028_vm11, %v4137_v49, %v1855_v7  ;;  %v1857_v16 = vrot.slane %v1855_v7, 4  ;;  %2347 = vrot.lane.b32.xlu0 %v5165_v17, %s4867_s20  ;;  %v305_v44 = vld [vmem:[#allocation2 + $0x3c] sm:$0x1]  ;;  %v1317_v54 = vrot.slane %v1316_v26, 4  ;;  %v1312_v0 = vsel %vm5022_vm8, %v5221_v59, %v1311_v8 }
  0xe1   : > { %v5246_v13 = vld [vmem:[#allocation2 + $0x94] sm:$0xf]  ;;  %1245 = vst.msk [vmem:[#allocation3 + $0x3c] sm:$0xf] %vm278_vm1, %v5233_v3  ;;  %v796_v21 = vrot.slane %v794_v50, 7  ;;  %v621_v25 = vadd.f32 %v5061_v2, %v620_v14  ;;  %v1321_v1 = vrot.slane %v1319_v5, 5  ;;  %v1330_v59 = vor.u32 %v1329_v57, %v1326_v45 }
  0xe2   : > { %v5255_v22 = vld [vmem:[#allocation2 + $0x98] sm:$0x1]  ;;  %v1925_v24 = vrot.slane %v5246_v13, 5  ;;  %1265 = vst.msk [vmem:[#allocation3 + $0x12c] sm:$0xf] %vm278_vm1, %v5246_v13  ;;  %v5266_v31 = vsel %vm5028_vm11, %v1857_v16, %v1858_v10  ;;  %v306_v10 = vsel %vm5002_vm4, 0, %v305_v44 }
  0xe3   : > { %v1928_v30 = vrot.slane %v5255_v22, 5  ;;  %2757 = vst.msk [vmem:[#allocation3 + $0x8] sm:$0xf] %vm278_vm1, %v5250_v15  ;;  %v799_v37 = vor.u32 %v797_v9, %v796_v21  ;;  %v801_v38 = vrot.slane %v796_v21, 4  ;;  %v691_v43 = vmax.f32 %v621_v25, 0.0 }
  0xe4   : > { %v5277_v40 = vsel %vm5028_vm11, %v4147_v47, %v1925_v24  ;;  %v1927_v42 = vrot.slane %v1925_v24, 4  ;;  %2758 = vst.msk [vmem:[#allocation3 + $0x14] sm:$0xf] %vm278_vm1, %v5266_v31  ;;  %v361_v4 = vld [vmem:[#allocation2 + $0x44] sm:$0x1]  ;;  %v1343_v28 = vshll.u32 %v5238_v6, 16  ;;  %v5330_v14 = vsel %vm5022_vm8, %v1317_v54, %v1321_v1 }
  0xe5   : > { %2777 = vst.msk [vmem:[#allocation3 + $0xf8] sm:$0xf] %vm278_vm1, %v5277_v40  ;;  %v800_v49 = vsel %vm5089_vm14, %v792_v60, %v799_v37  ;;  %v1093_v51 = vsel %vm5002_vm4, %v801_v38, %v1092_v27  ;;  %v723_v55 = vpack.c.bf16 %v691_v43, %v691_v43  ;;  %2437 = vrot.lane.b32.xlu1 %v5194_v36, %s4868_s21  ;;  %v1333_v60 = vshll.u32 %v5233_v3, 16  ;;  %v1095_v19 = vld [vmem:[#allocation2 + $0x30] sm:$0xf] }
  0xe6   : > { %v5283_v46 = vld [vmem:[#allocation2 + $0x24] sm:$0xf]  ;;  %v5291_v47 = vsel %vm5028_vm11, %v1927_v42, %v1928_v30  ;;  %2288 = vst.msk [vmem:[#allocation3 + $0x100] sm:$0xf] %vm278_vm1, %v5272_v32  ;;  %v1339_v8 = vrot.slane %v1337_v62, 4  ;;  %v362_v16 = vsel %vm5012_vm5, 0, %v361_v4 }
  0xe7   : > { %1246 = vst.msk [vmem:[#allocation3 + $0x48] sm:$0xf] %vm278_vm1, %v5283_v46  ;;  %2627 = vrot.lane.b32.xlu2 %v5272_v32, %s4869_s29  ;;  %v803_v7 = vshrl.u32 %v723_v55, 16  ;;  %v806_v50 = vshll.u32 %v723_v55, 16  ;;  %v1335_v5 = vrot.slane %v1333_v60, 5  ;;  %v1331_v25 = vrot.slane %v1330_v59, 4 }
  0xe8   : > { %1091 = vst.msk [vmem:[#allocation2 + $0x28] sm:$0xf] %vm278_vm1, %v800_v49  ;;  %v622_v9 = vpop.f32.mrf.mxu0  ;;  %2309 = vrot.lane.b32.xlu0 %v5309_v63, %s4867_s20  ;;  %v4138_v48 = vrot.slane %v5283_v46, 9  ;;  %v1567_v30 = vshll.u32 %v5192_v34, 16  ;;  %v1345_v42 = vrot.slane %v1343_v28, 5 }
  0xe9   : > { %1094 = vst [vmem:[#allocation2 + $0x2c] sm:$0x1] %v1093_v51  ;;  %v623_v52 = vadd.f32 %v5061_v2, %v622_v9  ;;  %v5322_v12 = vrot.slane %v803_v7, 7  ;;  %v1340_v26 = vor.u32 %v1339_v8, %v1335_v5  ;;  %v5357_v57 = vsel %vm5022_vm8, %v1331_v25, %v1335_v5 }
  0xea   : > { %2778 = vst.msk [vmem:[#allocation3 + $0x104] sm:$0xf] %vm278_vm1, %v5291_v47  ;;  %v4163_v53 = vld [vmem:[#allocation3 + $0x8] sm:$0xf]  ;;  %v1569_v49 = vrot.slane %v1567_v30, 5 }
  0xeb   : > { %360 = vst [vmem:[#allocation2 + $0x38] sm:$0x1] %v359_v61  ;;  %v4489_v6 = vld [vmem:[#allocation3 + $0x10] sm:$0xf0]  ;;  %v692_v21 = vmax.f32 %v623_v52, 0.0  ;;  %v808_v27 = vor.u32 %v806_v50, %v5322_v12  ;;  %v1564_v61 = vshrl.u32 %v5192_v34, 16 }
  0xec   : > { %v4164_v24 = vor.u32 %v4489_v6, %v4163_v53  ;;  %2267 = vst.msk [vmem:[#allocation3 + $0x4] sm:$0xf] %vm278_vm1, %v1312_v0  ;;  %v809_v33 = vrot.slane %v5322_v12, 4  ;;  %v1341_v38 = vrot.slane %v1340_v26, 4  ;;  %v4283_v1 = vld [vmem:[#allocation3 + $0xf8] sm:$0xf] }
  0xed   : > { %307 = vst [vmem:[#allocation2 + $0x3c] sm:$0x1] %v306_v10  ;;  %v724_v37 = vpack.c.bf16 %v692_v21, %v692_v21  ;;  %v1096_v44 = vsel %vm5074_vm12, %v808_v27, %v1095_v19  ;;  %2086 = vrot.lane.b32.xlu1 %v5194_v36, %s4869_s29  ;;  %v1566_v45 = vrot.slane %v1564_v61, 4  ;;  %v1573_v10 = vshll.u32 %v5246_v13, 16  ;;  %v308_v6 = vld [vmem:[#allocation2 + $0x48] sm:$0x1] }
  0xee   : > { %4417 = vmatmul.msk.bf16.vlgmr.msrb.gmra.mxu0 %vm3241_vm15, %v4164_v24  ;;  %2268 = vst.msk [vmem:[#allocation3 + $0x10] sm:$0xf] %vm278_vm1, %v5330_v14  ;;  %v5366_v28 = vsel %vm5022_vm8, %v1341_v38, %v1345_v42  ;;  %v1577_v24 = vshrl.u32 %v5246_v13, 16  ;;  %v309_v61 = vsel %vm5002_vm4, 0, %v308_v6  ;;  %v364_v42 = vld [vmem:[#allocation2 + $0x50] sm:$0x1] }
  0xef   : > { %v5343_v43 = vld [vmem:[#allocation2 + $0x28] sm:$0xf]  ;;  %363 = vst [vmem:[#allocation2 + $0x44] sm:$0x1] %v362_v16  ;;  %v811_v51 = vshrl.u32 %v724_v37, 16  ;;  %v814_v54 = vshll.u32 %v724_v37, 16  ;;  %2088 = vrot.lane.b32.xlu2 %v5233_v3, %s4869_s29  ;;  %v1570_v4 = vor.u32 %v1569_v49, %v1566_v45 }
  0xf0   : > { %1247 = vst.msk [vmem:[#allocation3 + $0x54] sm:$0xf] %vm278_vm1, %v5343_v43  ;;  %v5353_v55 = vld [vmem:[#allocation2 + $0x2c] sm:$0x1]  ;;  %v625_v60 = vpop.f32.mrf.mxu0  ;;  %v1862_v36 = vrot.slane %v5343_v43, 5  ;;  %1663 = vrot.lane.b32.xlu0 %v1312_v0, %s4867_s20  ;;  %v1575_v21 = vrot.slane %v1573_v10, 5 }
  0xf1   : > { %1097 = vst [vmem:[#allocation2 + $0x30] sm:$0xf] %v1096_v44  ;;  %v1865_v62 = vrot.slane %v5353_v55, 5  ;;  %v813_v7 = vrot.slane %v811_v51, 7  ;;  %v626_v50 = vadd.f32 %v5061_v2, %v625_v60  ;;  %v4519_v9 = vld [vmem:[#allocation3 + $0x100] sm:$0xf0] }
  0xf2   : > { %v1099_v52 = vld [vmem:[#allocation2 + $0x38] sm:$0x1]  ;;  %v5370_v53 = vsel %vm5028_vm11, %v4138_v48, %v1862_v36  ;;  %v1864_v59 = vrot.slane %v1862_v36, 4  ;;  %v4284_v5 = vor.u32 %v4519_v9, %v4283_v1  ;;  %2269 = vst.msk [vmem:[#allocation3 + $0x1c] sm:$0xf] %vm278_vm1, %v5357_v57  ;;  %v1571_v19 = vrot.slane %v1570_v4, 4 }
  0xf3   : > { %v816_v0 = vor.u32 %v814_v54, %v813_v7  ;;  %v818_v8 = vrot.slane %v813_v7, 4  ;;  %v693_v12 = vmax.f32 %v626_v50, 0.0  ;;  %2759 = vst.msk [vmem:[#allocation3 + $0x20] sm:$0xf] %vm278_vm1, %v5370_v53  ;;  %v1583_v48 = vshll.u32 %v5255_v22, 16  ;;  %v4475_v6 = vld [vmem:[%s4988_s19 + $0x60] sm:$0xff] }
  0xf4   : > { %v5378_v16 = vsel %vm5028_vm11, %v1864_v59, %v1865_v62  ;;  %4427 = vmatmul.msk.bf16.vlgmr.msra.gmra.mxu3 %vm3241_vm15, %v4284_v5  ;;  %2270 = vst.msk [vmem:[#allocation3 + $0x28] sm:$0xf] %vm278_vm1, %v5366_v28  ;;  %v1579_v30 = vrot.slane %v1577_v24, 4  ;;  %v1102_v51 = vld [vmem:[#allocation2 + $0x3c] sm:$0xf]  ;;  %v365_v60 = vsel %vm5012_vm5, 0, %v364_v42  ;;  %664 = vmatmul.bf16.vlgmr.msra.gmra.mxu2 %v4475_v6 }
  0xf5   : > { %v817_v25 = vsel %vm5089_vm14, %v809_v33, %v816_v0  ;;  %v1100_v26 = vsel %vm5002_vm4, %v818_v8, %v1099_v52  ;;  %v725_v27 = vpack.c.bf16 %v693_v12, %v693_v12  ;;  %2760 = vst.msk [vmem:[#allocation3 + $0x2c] sm:$0xf] %vm278_vm1, %v5378_v16  ;;  %1665 = vrot.lane.b32.xlu1 %v5330_v14, %s4867_s20  ;;  %v1585_v45 = vrot.slane %v1583_v48, 5 }
  0xf6   : > { %1098 = vst.msk [vmem:[#allocation2 + $0x34] sm:$0xf] %vm278_vm1, %v817_v25  ;;  %v5404_v14 = vsel %vm5022_vm8, %v1571_v19, %v1575_v21  ;;  %v1580_v44 = vor.u32 %v1579_v30, %v1575_v21  ;;  %v1106_v30 = vld [vmem:[#allocation2 + $0x44] sm:$0x1]  ;;  %v1357_v6 = vshll.u32 %v5343_v43, 16 }
  0xf7   : > { %1101 = vst [vmem:[#allocation2 + $0x38] sm:$0x1] %v1100_v26  ;;  %v820_v33 = vshrl.u32 %v725_v27, 16  ;;  %v823_v38 = vshll.u32 %v725_v27, 16  ;;  %1959 = vrot.lane.b32.xlu2 %v5250_v15, %s4868_s21 }
  0xf8   : > { %v5396_v37 = vld [vmem:[#allocation2 + $0x30] sm:$0xf]  ;;  %v627_v22 = vpop.f32.mrf.mxu0  ;;  %6972 = vst [vmem:[#allocation9_spill] sm:$0xff] %v5404_v14  ;;  %1957 = vrot.lane.b32.xlu0 %v5309_v63, %s4868_s21  ;;  %v1581_v62 = vrot.slane %v1580_v44, 4 }
  0xf9   : > { %1248 = vst.msk [vmem:[#allocation3 + $0x60] sm:$0xf] %vm278_vm1, %v5396_v37  ;;  %v822_v49 = vrot.slane %v820_v33, 7  ;;  %v628_v54 = vadd.f32 %v5061_v2, %v627_v22  ;;  %v4139_v50 = vrot.slane %v5396_v37, 9 }
  0xfa   : > { %310 = vst [vmem:[#allocation2 + $0x48] sm:$0x1] %v309_v61  ;;  %v4175_v36 = vld [vmem:[#allocation3 + $0x20] sm:$0xf]  ;;  %v5416_v63 = vsel %vm5022_vm8, %v1581_v62, %v1585_v45 }
  0xfb   : > { %366 = vst [vmem:[#allocation2 + $0x50] sm:$0x1] %v365_v60  ;;  %v825_v1 = vor.u32 %v823_v38, %v822_v49  ;;  %v694_v4 = vmax.f32 %v628_v54, 0.0  ;;  %v826_v26 = vrot.slane %v822_v49, 4  ;;  %v1351_v60 = vshll.u32 %v5283_v46, 16 }
  0xfc   : > { %2289 = vst.msk [vmem:[#allocation3 + $0x10c] sm:$0xf] %vm278_vm1, %v5404_v14  ;;  %v4492_v7 = vld [vmem:[#allocation3 + $0x28] sm:$0xf0] }
  0xfd   : > { %6973 = vst [vmem:[#allocation10_spill] sm:$0xff] %v5416_v63  ;;  %v5418_v9 = vld [vmem:[#allocation2 + $0x34] sm:$0xf]  ;;  %v1103_v10 = vsel %vm5074_vm12, %v825_v1, %v1102_v51  ;;  %v726_v52 = vpack.c.bf16 %v694_v4, %v694_v4  ;;  %v4176_v59 = vor.u32 %v4492_v7, %v4175_v36  ;;  %2439 = vrot.lane.b32.xlu1 %v5233_v3, %s4868_s21  ;;  %v1348_v51 = vshrl.u32 %v5283_v46, 16  ;;  %v367_v1 = vld [vmem:[#allocation2 + $0x5c] sm:$0x1] }
  0xfe   : > { %2290 = vst.msk [vmem:[#allocation3 + $0x118] sm:$0xf] %vm278_vm1, %v5416_v63  ;;  %v5424_v5 = vld [vmem:[#allocation2 + $0x38] sm:$0x1]  ;;  %v1869_v0 = vrot.slane %v5418_v9, 5 }
  0xff   : > { %1249 = vst.msk [vmem:[#allocation3 + $0x6c] sm:$0xf] %vm278_vm1, %v5418_v9  ;;  %v828_v8 = vshrl.u32 %v726_v52, 16  ;;  %v831_v12 = vshll.u32 %v726_v52, 16  ;;  %4418 = vmatmul.msk.bf16.gmra.mxu0 %vm3241_vm15, %v4176_v59  ;;  %2589 = vrot.lane.b32.xlu2 %v5357_v57, %s4869_s29  ;;  %v1872_v19 = vrot.slane %v5424_v5, 5 }
 0x100   : > { %1104 = vst [vmem:[#allocation2 + $0x3c] sm:$0xf] %v1103_v10  ;;  %v630_v21 = vpop.f32.mrf.mxu0  ;;  %v5438_v24 = vsel %vm5028_vm11, %v4139_v50, %v1869_v0  ;;  %v1871_v25 = vrot.slane %v1869_v0, 4  ;;  %v311_v3 = vld [vmem:[#allocation2 + $0x54] sm:$0x1]  ;;  %2479 = vrot.lane.b32.xlu0 %v5246_v13, %s4868_s21  ;;  %v368_v50 = vsel %vm5012_vm5, 0, %v367_v1 }
 0x101   : > { %v830_v27 = vrot.slane %v828_v8, 7  ;;  %v631_v48 = vadd.f32 %v5061_v2, %v630_v21  ;;  %2761 = vst.msk [vmem:[#allocation3 + $0x38] sm:$0xf] %vm278_vm1, %v5438_v24  ;;  %v312_v61 = vsel %vm5002_vm4, 0, %v311_v3  ;;  %v1109_v52 = vld [vmem:[#allocation2 + $0x48] sm:$0xf] }
 0x102   : > { %v5449_v33 = vsel %vm5028_vm11, %v1871_v25, %v1872_v19  ;;  %313 = vst [vmem:[#allocation2 + $0x54] sm:$0x1] %v312_v61  ;;  %v1350_v0 = vrot.slane %v1348_v51, 4  ;;  %v1361_v19 = vshrl.u32 %v5343_v43, 16  ;;  %v4476_v1 = vld [vmem:[%s4988_s19 + $0x68] sm:$0xff] }
 0x103   : > { %v833_v38 = vor.u32 %v831_v12, %v830_v27  ;;  %v835_v22 = vrot.slane %v830_v27, 4  ;;  %v695_v42 = vmax.f32 %v631_v48, 0.0  ;;  %2762 = vst.msk [vmem:[#allocation3 + $0x44] sm:$0xf] %vm278_vm1, %v5449_v33  ;;  %v1353_v12 = vrot.slane %v1351_v60, 5 }
 0x104   : > { %369 = vst [vmem:[#allocation2 + $0x5c] sm:$0x1] %v368_v50  ;;  %v1359_v48 = vrot.slane %v1357_v6, 5  ;;  %v1363_v61 = vrot.slane %v1361_v19, 4  ;;  %669 = vmatmul.bf16.gmra.mxu2 %v4476_v1 }
 0x105   : > { %v834_v44 = vsel %vm5089_vm14, %v826_v26, %v833_v38  ;;  %v1107_v45 = vsel %vm5002_vm4, %v835_v22, %v1106_v30  ;;  %v727_v49 = vpack.c.bf16 %v695_v42, %v695_v42  ;;  %2313 = vrot.lane.b32.xlu1 %v5266_v31, %s4867_s20  ;;  %v1354_v27 = vor.u32 %v1353_v12, %v1350_v0  ;;  %v314_v0 = vld [vmem:[#allocation2 + $0x60] sm:$0x1]  ;;  %v1113_v12 = vld [vmem:[#allocation2 + $0x50] sm:$0x1] }
 0x106   : > { %1105 = vst.msk [vmem:[#allocation2 + $0x40] sm:$0xf] %vm278_vm1, %v834_v44  ;;  %v315_v19 = vsel %vm5002_vm4, 0, %v314_v0 }
 0x107   : > { %v5458_v54 = vld [vmem:[#allocation2 + $0x3c] sm:$0xf]  ;;  %v837_v36 = vshrl.u32 %v727_v49, 16  ;;  %v840_v62 = vshll.u32 %v727_v49, 16  ;;  %2441 = vrot.lane.b32.xlu2 %v5283_v46, %s4868_s21  ;;  %1108 = vst [vmem:[#allocation2 + $0x44] sm:$0x1] %v1107_v45  ;;  %v1364_v49 = vor.u32 %v1363_v61, %v1359_v48  ;;  %v5531_v61 = vpop.permute.xlu2 %1951 }
 0x108   : > { %1250 = vst.msk [vmem:[#allocation3 + $0x78] sm:$0xf] %vm278_vm1, %v5458_v54  ;;  %v632_v4 = vpop.f32.mrf.mxu0  ;;  %v4187_v7 = vld [vmem:[#allocation3 + $0x38] sm:$0xf]  ;;  %2311 = vrot.lane.b32.xlu0 %v5250_v15, %s4867_s20  ;;  %v4140_v26 = vrot.slane %v5458_v54, 9  ;;  %v1367_v15 = vshll.u32 %v5353_v55, 16 }
 0x109   : > { %v839_v10 = vrot.slane %v837_v36, 7  ;;  %v633_v59 = vadd.f32 %v5061_v2, %v632_v4  ;;  %v1355_v45 = vrot.slane %v1354_v27, 4  ;;  %316 = vst [vmem:[#allocation2 + $0x60] sm:$0x1] %v315_v19  ;;  %v4541_v19 = vld [vmem:[%s6946_s2 + $0x30] sm:$0xff] }
 0x10a   : > { %v4495_v8 = vld [vmem:[#allocation3 + $0x40] sm:$0xf0]  ;;  %v1369_v51 = vrot.slane %v1367_v15, 5 }
 0x10b   : > { %v842_v21 = vor.u32 %v840_v62, %v839_v10  ;;  %v696_v25 = vmax.f32 %v633_v59, 0.0  ;;  %v4188_v3 = vor.u32 %v4495_v8, %v4187_v7  ;;  %v843_v38 = vrot.slane %v839_v10, 4 }
 0x10c   : > { %v5499_v10 = vsel %vm5022_vm8, %v1355_v45, %v1359_v48  ;;  %v1365_v8 = vrot.slane %v1364_v49, 4  ;;  %v1116_v45 = vld [vmem:[#allocation2 + $0x54] sm:$0xf] }
 0x10d   : > { %v5477_v30 = vld [vmem:[#allocation2 + $0x40] sm:$0xf]  ;;  %v1110_v22 = vsel %vm5074_vm12, %v842_v21, %v1109_v52  ;;  %v728_v42 = vpack.c.bf16 %v696_v25, %v696_v25  ;;  %2629 = vrot.lane.b32.xlu1 %v5404_v14, %s4869_s29  ;;  %2271 = vst.msk [vmem:[#allocation3 + $0x34] sm:$0xf] %vm278_vm1, %v5499_v10 }
 0x10e   : > { %1251 = vst.msk [vmem:[#allocation3 + $0x84] sm:$0xf] %vm278_vm1, %v5477_v30  ;;  %v1876_v44 = vrot.slane %v5477_v30, 5  ;;  %v5486_v55 = vld [vmem:[#allocation2 + $0x44] sm:$0x1]  ;;  %v5518_v25 = vsel %vm5022_vm8, %v1365_v8, %v1369_v51 }
 0x10f   : > { %1111 = vst [vmem:[#allocation2 + $0x48] sm:$0xf] %v1110_v22  ;;  %v845_v60 = vshrl.u32 %v728_v42, 16  ;;  %v848_v36 = vshll.u32 %v728_v42, 16  ;;  %4419 = vmatmul.msk.bf16.gmra.mxu0 %vm3241_vm15, %v4188_v3  ;;  %2591 = vrot.lane.b32.xlu2 %v5366_v28, %s4869_s29  ;;  %v1879_v50 = vrot.slane %v5486_v55, 5  ;;  %v4542_v22 = vld [vmem:[%s6946_s2 + $0x38] sm:$0xff]  ;;  %v1662_v42 = vpop.permute.xlu1 %1661 }
 0x110   : > { %v635_v62 = vpop.f32.mrf.mxu0  ;;  %v5494_v4 = vsel %vm5028_vm11, %v4140_v26, %v1876_v44  ;;  %v1878_v7 = vrot.slane %v1876_v44, 4  ;;  %1667 = vrot.lane.b32.xlu0 %v5357_v57, %s4867_s20  ;;  %2272 = vst.msk [vmem:[#allocation3 + $0x40] sm:$0xf] %vm278_vm1, %v5518_v25  ;;  %v1954_v44 = vpop.permute.xlu0 %1953  ;;  %3290 = vmatpush.bf16.msrb.mxu1 %v4542_v22 }
 0x111   : > { %v847_v52 = vrot.slane %v845_v60, 7  ;;  %v636_v59 = vadd.f32 %v5061_v2, %v635_v62  ;;  %2763 = vst.msk [vmem:[#allocation3 + $0x50] sm:$0xf] %vm278_vm1, %v5494_v4  ;;  %v5545_v60 = vld [vmem:[%s6948_s4] ss:$0 sm:$0xff] }
 0x112   : > { %v5508_v6 = vsel %vm5028_vm11, %v1878_v7, %v1879_v50  ;;  %1757 = vst.msk [vmem:[#allocation3 + $0xc] sm:$0xf] %vm1755_vm0, %v1662_v42  ;;  %v370_v62 = vld [vmem:[#allocation2 + $0x68] sm:$0x1] }
 0x113   : > { %v850_v57 = vor.u32 %v848_v36, %v847_v52  ;;  %v852_v21 = vrot.slane %v847_v52, 4  ;;  %v697_v2 = vmax.f32 %v636_v59, 0.0  ;;  %2764 = vst.msk [vmem:[#allocation3 + $0x5c] sm:$0xf] %vm278_vm1, %v5508_v6  ;;  %v371_v7 = vsel %vm5012_vm5, 0, %v370_v62 }
 0x114   : > { %2049 = vst.msk [vmem:[#allocation3 + $0xc] sm:$0xf] %vm2047_vm2, %v1954_v44  ;;  %3291 = vmatpush.bf16.msrb.mxu1 %v4541_v19  ;;  %v1375_v19 = vshll.u32 %v5396_v37, 16 }
 0x115   : > { %v851_v3 = vsel %vm5089_vm14, %v843_v38, %v850_v57  ;;  %v1114_v26 = vsel %vm5002_vm4, %v852_v21, %v1113_v12  ;;  %v729_v27 = vpack.c.bf16 %v697_v2, %v697_v2  ;;  %2090 = vrot.lane.b32.xlu1 %v5283_v46, %s4869_s29  ;;  %372 = vst [vmem:[#allocation2 + $0x68] sm:$0x1] %v371_v7 }
 0x116   : > { %v5526_v48 = vld [vmem:[#allocation2 + $0x48] sm:$0xf]  ;;  %1112 = vst.msk [vmem:[#allocation2 + $0x4c] sm:$0xf] %vm278_vm1, %v851_v3 }
 0x117   : > { %1252 = vst.msk [vmem:[#allocation3 + $0x90] sm:$0xf] %vm278_vm1, %v5526_v48  ;;  %v854_v15 = vshrl.u32 %v729_v27, 16  ;;  %v857_v38 = vshll.u32 %v729_v27, 16  ;;  %2631 = vrot.lane.b32.xlu2 %v5416_v63, %s4869_s29  ;;  %v4141_v59 = vrot.slane %v5526_v48, 9  ;;  %v4477_v27 = vld [vmem:[%s4988_s19 + $0x70] sm:$0xff] }
 0x118   : > { %1115 = vst [vmem:[#allocation2 + $0x50] sm:$0x1] %v1114_v26  ;;  %v637_v46 = vpop.f32.mrf.mxu0  ;;  %v4199_v49 = vld [vmem:[#allocation3 + $0x50] sm:$0xf]  ;;  %1961 = vrot.lane.b32.xlu0 %v5266_v31, %s4868_s21  ;;  %674 = vmatmul.bf16.gmra.mxu2 %v4477_v27 }
 0x119   : > { %v856_v51 = vrot.slane %v854_v15, 7  ;;  %v638_v36 = vadd.f32 %v5545_v60, %v637_v46 }
 0x11a   : > { %v4498_v1 = vld [vmem:[#allocation3 + $0x58] sm:$0xf0] }
 0x11b   : > { %v859_v50 = vor.u32 %v857_v38, %v856_v51  ;;  %v698_v52 = vmax.f32 %v638_v36, 0.0  ;;  %v4200_v31 = vor.u32 %v4498_v1, %v4199_v49  ;;  %v860_v42 = vrot.slane %v856_v51, 4  ;;  %v317_v49 = vld [vmem:[#allocation2 + $0x6c] sm:$0x1]  ;;  %v1120_v36 = vld [vmem:[#allocation2 + $0x5c] sm:$0x1] }
 0x11c   : > { %v318_v51 = vsel %vm5002_vm4, 0, %v317_v49 }
 0x11d   : > { %v5553_v0 = vld [vmem:[#allocation2 + $0x4c] sm:$0xf]  ;;  %v1117_v8 = vsel %vm5074_vm12, %v859_v50, %v1116_v45  ;;  %v730_v12 = vpack.c.bf16 %v698_v52, %v698_v52  ;;  %1669 = vrot.lane.b32.xlu1 %v5366_v28, %s4867_s20  ;;  %319 = vst [vmem:[#allocation2 + $0x6c] sm:$0x1] %v318_v51 }
 0x11e   : > { %1253 = vst.msk [vmem:[#allocation3 + $0x9c] sm:$0xf] %vm278_vm1, %v5553_v0  ;;  %v1883_v57 = vrot.slane %v5553_v0, 5  ;;  %v4540_v28 = vld [vmem:[%s6946_s2 + $0x28] sm:$0xff] }
 0x11f   : > { %v5565_v21 = vld [vmem:[#allocation2 + $0x50] sm:$0x1]  ;;  %1118 = vst [vmem:[#allocation2 + $0x54] sm:$0xf] %v1117_v8  ;;  %v862_v2 = vshrl.u32 %v730_v12, 16  ;;  %v865_v3 = vshll.u32 %v730_v12, 16  ;;  %4420 = vmatmul.msk.bf16.gmra.mxu0 %vm3241_vm15, %v4200_v31  ;;  %2092 = vrot.lane.b32.xlu2 %v5343_v43, %s4869_s29 }
 0x120   : > { %v640_v26 = vpop.f32.mrf.mxu0  ;;  %v5576_v15 = vsel %vm5028_vm11, %v4141_v59, %v1883_v57  ;;  %v1885_v38 = vrot.slane %v1883_v57, 4  ;;  %v1886_v22 = vrot.slane %v5565_v21, 5  ;;  %2443 = vrot.lane.b32.xlu0 %v5343_v43, %s4868_s21  ;;  %3292 = vmatpush.bf16.msrb.mxu1 %v4540_v28  ;;  %v1372_v59 = vshrl.u32 %v5396_v37, 16  ;;  %v4539_v12 = vld [vmem:[%s6946_s2 + $0x20] sm:$0xff] }
 0x121   : > { %v864_v44 = vrot.slane %v862_v2, 7  ;;  %v5581_v45 = vpop.permute.xlu2 %2473  ;;  %v641_v46 = vadd.f32 %v5545_v60, %v640_v26  ;;  %2765 = vst.msk [vmem:[#allocation3 + $0x68] sm:$0xf] %vm278_vm1, %v5576_v15  ;;  %v1660_v26 = vpop.permute.xlu0 %1659 }
 0x122   : > { %6974 = vst [vmem:[#allocation11_spill] sm:$0xff] %v5581_v45  ;;  %v5588_v62 = vsel %vm5028_vm11, %v1885_v38, %v1886_v22  ;;  %v1374_v28 = vrot.slane %v1372_v59, 4  ;;  %v373_v22 = vld [vmem:[#allocation2 + $0x74] sm:$0x1]  ;;  %v1385_v59 = vshrl.u32 %v5418_v9, 16 }
 0x123   : > { %v867_v1 = vor.u32 %v865_v3, %v864_v44  ;;  %v869_v7 = vrot.slane %v864_v44, 4  ;;  %v699_v43 = vmax.f32 %v641_v46, 0.0  ;;  %2766 = vst.msk [vmem:[#allocation3 + $0x74] sm:$0xf] %vm278_vm1, %v5588_v62  ;;  %v4538_v3 = vld [vmem:[%s6946_s2 + $0x18] sm:$0xff] }
 0x124   : > { %3293 = vmatpush.bf16.msrb.mxu1 %v4539_v12  ;;  %v1123_v44 = vld [vmem:[#allocation2 + $0x60] sm:$0xf]  ;;  %1756 = vst.msk [vmem:[#allocation3] sm:$0xf] %vm1755_vm0, %v1660_v26 }
 0x125   : > { %v868_v50 = vsel %vm5089_vm14, %v860_v42, %v867_v1  ;;  %v1121_v52 = vsel %vm5002_vm4, %v869_v7, %v1120_v36  ;;  %v731_v31 = vpack.c.bf16 %v699_v43, %v699_v43  ;;  %2593 = vrot.lane.b32.xlu1 %v5499_v10, %s4869_s29  ;;  %v374_v36 = vsel %vm5012_vm5, 0, %v373_v22  ;;  %2048 = vst.msk [vmem:[#allocation3] sm:$0xf] %vm2047_vm2, %v5531_v61  ;;  %v4537_v61 = vld [vmem:[%s6946_s2 + $0x10] sm:$0xff] }
 0x126   : > { %v5599_v8 = vld [vmem:[#allocation2 + $0x54] sm:$0xf]  ;;  %1119 = vst.msk [vmem:[#allocation2 + $0x58] sm:$0xf] %vm278_vm1, %v868_v50  ;;  %v1377_v1 = vrot.slane %v1375_v19, 5  ;;  %v1381_v7 = vshll.u32 %v5418_v9, 16 }
 0x127   : > { %1254 = vst.msk [vmem:[#allocation3 + $0xa8] sm:$0xf] %vm278_vm1, %v5599_v8  ;;  %v871_v57 = vshrl.u32 %v731_v31, 16  ;;  %v874_v2 = vshll.u32 %v731_v31, 16  ;;  %1963 = vrot.lane.b32.xlu2 %v5370_v53, %s4868_s21 }
 0x128   : > { %1122 = vst [vmem:[#allocation2 + $0x5c] sm:$0x1] %v1121_v52  ;;  %v642_v27 = vpop.f32.mrf.mxu0  ;;  %v4211_v38 = vld [vmem:[#allocation3 + $0x68] sm:$0xf]  ;;  %2315 = vrot.lane.b32.xlu0 %v5370_v53, %s4867_s20  ;;  %3294 = vmatpush.bf16.msrb.mxu1 %v4538_v3  ;;  %v4142_v53 = vrot.slane %v5599_v8, 9  ;;  %v1378_v31 = vor.u32 %v1377_v1, %v1374_v28  ;;  %v1383_v26 = vrot.slane %v1381_v7, 5 }
 0x129   : > { %v5615_v42 = vrot.slane %v871_v57, 7  ;;  %v643_v46 = vadd.f32 %v5545_v60, %v642_v27  ;;  %v2085_v49 = vpop.permute.xlu2 %2084  ;;  %375 = vst [vmem:[#allocation2 + $0x74] sm:$0x1] %v374_v36  ;;  %v1387_v27 = vrot.slane %v1385_v59, 4 }
 0x12a   : > { %2180 = vst.msk [vmem:[#allocation3 + $0xc] sm:$0xf] %vm2178_vm3, %v2085_v49  ;;  %v4501_v51 = vld [vmem:[#allocation3 + $0x70] sm:$0xf0]  ;;  %v1379_v28 = vrot.slane %v1378_v31, 4  ;;  %v4478_v49 = vld [vmem:[%s4988_s19 + $0x78] sm:$0xff] }
 0x12b   : > { %v876_v43 = vor.u32 %v874_v2, %v5615_v42  ;;  %v700_v50 = vmax.f32 %v643_v46, 0.0  ;;  %v4212_v52 = vor.u32 %v4501_v51, %v4211_v38  ;;  %v1391_v2 = vshll.u32 %v5424_v5, 16  ;;  %v4536_v46 = vld [vmem:[%s6946_s2 + $0x8] sm:$0xff]  ;;  %679 = vmatmul.bf16.gmra.mxu2 %v4478_v49 }
 0x12c   : > { %3295 = vmatpush.bf16.msrb.mxu1 %v4537_v61  ;;  %v5659_v7 = vsel %vm5022_vm8, %v1379_v28, %v1383_v26  ;;  %v1388_v59 = vor.u32 %v1387_v27, %v1383_v26  ;;  %v4535_v26 = vld [vmem:[%s6946_s2] sm:$0xff] }
 0x12d   : > { %v5630_v12 = vld [vmem:[#allocation2 + $0x58] sm:$0xf]  ;;  %v1124_v19 = vsel %vm5074_vm12, %v876_v43, %v1123_v44  ;;  %v732_v57 = vpack.c.bf16 %v700_v50, %v700_v50  ;;  %2317 = vrot.lane.b32.xlu1 %v5378_v16, %s4867_s20  ;;  %v877_v43 = vrot.slane %v5615_v42, 4  ;;  %2273 = vst.msk [vmem:[#allocation3 + $0x4c] sm:$0xf] %vm278_vm1, %v5659_v7  ;;  %v1393_v27 = vrot.slane %v1391_v2, 5 }
 0x12e   : > { %1255 = vst.msk [vmem:[#allocation3 + $0xb4] sm:$0xf] %vm278_vm1, %v5630_v12  ;;  %v1890_v3 = vrot.slane %v5630_v12, 5  ;;  %v1389_v28 = vrot.slane %v1388_v59, 4  ;;  %v376_v2 = vld [vmem:[#allocation2 + $0x80] sm:$0x1] }
 0x12f   : > { %v5643_v38 = vld [vmem:[#allocation2 + $0x5c] sm:$0x1]  ;;  %1125 = vst [vmem:[#allocation2 + $0x60] sm:$0xf] %v1124_v19  ;;  %v879_v22 = vshrl.u32 %v732_v57, 16  ;;  %v882_v5 = vshll.u32 %v732_v57, 16  ;;  %4421 = vmatmul.msk.bf16.gmra.mxu0 %vm3241_vm15, %v4212_v52  ;;  %2445 = vrot.lane.b32.xlu2 %v5396_v37, %s4868_s21 }
 0x130   : > { %v645_v44 = vpop.f32.mrf.mxu0  ;;  %v5654_v36 = vsel %vm5028_vm11, %v4142_v53, %v1890_v3  ;;  %v1892_v51 = vrot.slane %v1890_v3, 4  ;;  %v1893_v1 = vrot.slane %v5643_v38, 5  ;;  %1671 = vrot.lane.b32.xlu0 %v5499_v10, %s4867_s20  ;;  %v320_v53 = vld [vmem:[#allocation2 + $0x78] sm:$0x1]  ;;  %v1127_v19 = vld [vmem:[#allocation2 + $0x68] sm:$0x1]  ;;  %3296 = vmatpush.bf16.msrb.mxu1 %v4536_v46 }
 0x131   : > { %v881_v50 = vrot.slane %v879_v22, 7  ;;  %v646_v52 = vadd.f32 %v5545_v60, %v645_v44  ;;  %v5665_v31 = vpop.permute.xlu2 %1955  ;;  %2767 = vst.msk [vmem:[#allocation3 + $0x80] sm:$0xf] %vm278_vm1, %v5654_v36  ;;  %v321_v42 = vsel %vm5002_vm4, 0, %v320_v53 }
 0x132   : > { %v5671_v57 = vsel %vm5028_vm11, %v1892_v51, %v1893_v1  ;;  %322 = vst [vmem:[#allocation2 + $0x78] sm:$0x1] %v321_v42  ;;  %v1130_v42 = vld [vmem:[#allocation2 + $0x6c] sm:$0xf] }
 0x133   : > { %v884_v10 = vor.u32 %v882_v5, %v881_v50  ;;  %v886_v61 = vrot.slane %v881_v50, 4  ;;  %v701_v3 = vmax.f32 %v646_v52, 0.0  ;;  %2768 = vst.msk [vmem:[#allocation3 + $0x8c] sm:$0xf] %vm278_vm1, %v5671_v57  ;;  %v377_v52 = vsel %vm5012_vm5, 0, %v376_v2 }
 0x134   : > { %3297 = vmatpush.bf16.msrb.mxu1 %v4535_v26  ;;  %378 = vst [vmem:[#allocation2 + $0x80] sm:$0x1] %v377_v52 }
 0x135   : > { %v885_v22 = vsel %vm5089_vm14, %v877_v43, %v884_v10  ;;  %v1128_v44 = vsel %vm5002_vm4, %v886_v61, %v1127_v19  ;;  %v733_v5 = vpack.c.bf16 %v701_v3, %v701_v3  ;;  %2094 = vrot.lane.b32.xlu1 %v5396_v37, %s4869_s29  ;;  %v5699_v37 = vsel %vm5022_vm8, %v1389_v28, %v1393_v27 }
 0x136   : > { %v5686_v49 = vld [vmem:[#allocation2 + $0x60] sm:$0xf]  ;;  %1126 = vst.msk [vmem:[#allocation2 + $0x64] sm:$0xf] %vm278_vm1, %v885_v22 }
 0x137   : > { %1256 = vst.msk [vmem:[#allocation3 + $0xc0] sm:$0xf] %vm278_vm1, %v5686_v49  ;;  %v888_v46 = vshrl.u32 %v733_v5, 16  ;;  %v891_v51 = vshll.u32 %v733_v5, 16  ;;  %2595 = vrot.lane.b32.xlu2 %v5518_v25, %s4869_s29  ;;  %v4143_v28 = vrot.slane %v5686_v49, 9 }
 0x138   : > { %1129 = vst [vmem:[#allocation2 + $0x68] sm:$0x1] %v1128_v44  ;;  %v647_v1 = vpop.f32.mrf.mxu0  ;;  %v2083_v43 = vpop.permute.xlu1 %2082  ;;  %v4223_v50 = vld [vmem:[#allocation3 + $0x80] sm:$0xf]  ;;  %1965 = vrot.lane.b32.xlu0 %v5378_v16, %s4868_s21  ;;  %v4488_v44 = vld [vmem:[#allocation3 + $0x8] sm:$0xf0] }
 0x139   : > { %v890_v53 = vrot.slane %v888_v46, 7  ;;  %v648_v59 = vadd.f32 %v5545_v60, %v647_v1  ;;  %2179 = vst.msk [vmem:[#allocation3] sm:$0xf] %vm2178_vm3, %v2083_v43  ;;  %v5705_v19 = vpop.permute.xlu2 %2477 }
 0x13a   : > { %v4504_v10 = vld [vmem:[#allocation3 + $0x88] sm:$0xf0]  ;;  %2274 = vst.msk [vmem:[#allocation3 + $0x58] sm:$0xf] %vm278_vm1, %v5699_v37 }
 0x13b   : > { %v893_v61 = vor.u32 %v891_v51, %v890_v53  ;;  %v702_v3 = vmax.f32 %v648_v59, 0.0  ;;  %v4224_v26 = vor.u32 %v4504_v10, %v4223_v50  ;;  %v4550_v59 = vld [vmem:[%s6946_s2 + $0x78] sm:$0xff] }
 0x13c   : > { %3379 = vmatpush.bf16.msrb.mxu2 %v4550_v59  ;;  %v1399_v59 = vshll.u32 %v5458_v54, 16 }
 0x13d   : > { %v5710_v27 = vld [vmem:[#allocation2 + $0x64] sm:$0xf]  ;;  %v1131_v16 = vsel %vm5074_vm12, %v893_v61, %v1130_v42  ;;  %v734_v22 = vpack.c.bf16 %v702_v3, %v702_v3  ;;  %1673 = vrot.lane.b32.xlu1 %v5518_v25, %s4867_s20  ;;  %v894_v42 = vrot.slane %v890_v53, 4  ;;  %v4549_v53 = vld [vmem:[%s6946_s2 + $0x70] sm:$0xff] }
 0x13e   : > { %1257 = vst.msk [vmem:[#allocation3 + $0xcc] sm:$0xf] %vm278_vm1, %v5710_v27  ;;  %v1897_v5 = vrot.slane %v5710_v27, 5 }
 0x13f   : > { %v5719_v46 = vld [vmem:[#allocation2 + $0x68] sm:$0x1]  ;;  %1132 = vst [vmem:[#allocation2 + $0x6c] sm:$0xf] %v1131_v16  ;;  %v896_v51 = vshrl.u32 %v734_v22, 16  ;;  %v899_v2 = vshll.u32 %v734_v22, 16  ;;  %4422 = vmatmul.msk.bf16.gmra.mxu0 %vm3241_vm15, %v4224_v26  ;;  %2096 = vrot.lane.b32.xlu2 %v5418_v9, %s4869_s29 }
 0x140   : > { %v650_v1 = vpop.f32.mrf.mxu0  ;;  %v4155_v43 = vld [vmem:[#allocation3] sm:$0xf]  ;;  %v5726_v50 = vsel %vm5028_vm11, %v4143_v28, %v1897_v5  ;;  %v1899_v25 = vrot.slane %v1897_v5, 4  ;;  %v1900_v52 = vrot.slane %v5719_v46, 5  ;;  %2447 = vrot.lane.b32.xlu0 %v5418_v9, %s4868_s21  ;;  %v1134_v28 = vld [vmem:[#allocation2 + $0x74] sm:$0x1]  ;;  %3380 = vmatpush.bf16.msrb.mxu2 %v4549_v53 }
 0x141   : > { %v898_v10 = vrot.slane %v896_v51, 7  ;;  %v651_v61 = vadd.f32 %v5545_v60, %v650_v1  ;;  %v5735_v3 = vpop.permute.xlu2 %2627  ;;  %v4156_v26 = vor.u32 %v4488_v44, %v4155_v43  ;;  %2769 = vst.msk [vmem:[#allocation3 + $0x98] sm:$0xf] %vm278_vm1, %v5726_v50 }
 0x142   : > { %6975 = vst [vmem:[#allocation12_spill] sm:$0xff] %v5735_v3  ;;  %v5741_v16 = vsel %vm5028_vm11, %v1899_v25, %v1900_v52  ;;  %v5746_v5 = vpop.permute.xlu0 %2475  ;;  %v1396_v25 = vshrl.u32 %v5458_v54, 16 }
 0x143   : > { %v901_v22 = vor.u32 %v899_v2, %v898_v10  ;;  %v903_v9 = vrot.slane %v898_v10, 4  ;;  %6976 = vst [vmem:[#allocation13_spill] sm:$0xff] %v5746_v5  ;;  %v703_v51 = vmax.f32 %v651_v61, 0.0  ;;  %3298 = vmatmul.bf16.vlgmr.msrb.gmra.mxu1 %v4156_v26  ;;  %v4548_v2 = vld [vmem:[%s6946_s2 + $0x68] sm:$0xff]  ;;  %v1137_v5 = vld [vmem:[#allocation2 + $0x78] sm:$0xf] }
 0x144   : > { %2770 = vst.msk [vmem:[#allocation3 + $0xa4] sm:$0xf] %vm278_vm1, %v5741_v16  ;;  %v1398_v61 = vrot.slane %v1396_v25, 4  ;;  %3381 = vmatpush.bf16.msrb.mxu2 %v4548_v2 }
 0x145   : > { %v902_v44 = vsel %vm5089_vm14, %v894_v42, %v901_v22  ;;  %v1135_v1 = vsel %vm5002_vm4, %v903_v9, %v1134_v28  ;;  %v735_v43 = vpack.c.bf16 %v703_v51, %v703_v51  ;;  %2597 = vrot.lane.b32.xlu1 %v5659_v7, %s4869_s29  ;;  %v1401_v22 = vrot.slane %v1399_v59, 5  ;;  %v4547_v59 = vld [vmem:[%s6946_s2 + $0x60] sm:$0xff] }
 0x146   : > { %v5755_v52 = vld [vmem:[#allocation2 + $0x6c] sm:$0xf]  ;;  %1133 = vst.msk [vmem:[#allocation2 + $0x70] sm:$0xf] %vm278_vm1, %v902_v44  ;;  %v1405_v9 = vshll.u32 %v5477_v30, 16 }
 0x147   : > { %1258 = vst.msk [vmem:[#allocation3 + $0xd8] sm:$0xf] %vm278_vm1, %v5755_v52  ;;  %v905_v42 = vshrl.u32 %v735_v43, 16  ;;  %v908_v10 = vshll.u32 %v735_v43, 16  ;;  %1967 = vrot.lane.b32.xlu2 %v5438_v24, %s4868_s21  ;;  %v5768_v26 = vpop.permute.xlu1 %2625  ;;  %v1409_v43 = vshrl.u32 %v5477_v30, 16 }
 0x148   : > { %1136 = vst [vmem:[#allocation2 + $0x74] sm:$0x1] %v1135_v1  ;;  %v652_v28 = vpop.f32.mrf.mxu0  ;;  %v4235_v53 = vld [vmem:[#allocation3 + $0x98] sm:$0xf]  ;;  %2319 = vrot.lane.b32.xlu0 %v5438_v24, %s4867_s20  ;;  %v1402_v1 = vor.u32 %v1401_v22, %v1398_v61  ;;  %v4144_v24 = vrot.slane %v5755_v52, 9  ;;  %v1407_v14 = vrot.slane %v1405_v9, 5  ;;  %3382 = vmatpush.bf16.msrb.mxu2 %v4547_v59 }
 0x149   : > { %6977 = vst [vmem:[#allocation14_spill] sm:$0xff] %v5768_v26  ;;  %v907_v51 = vrot.slane %v905_v42, 7  ;;  %v653_v44 = vadd.f32 %v5545_v60, %v652_v28  ;;  %v5774_v3 = vpop.permute.xlu2 %2088  ;;  %v1411_v34 = vrot.slane %v1409_v43, 4  ;;  %v4546_v22 = vld [vmem:[%s6946_s2 + $0x58] sm:$0xff] }
 0x14a   : > { %v2308_v42 = vpop.permute.xlu0 %2307  ;;  %v1403_v28 = vrot.slane %v1402_v1, 4 }
 0x14b   : > { %v4507_v25 = vld [vmem:[#allocation3 + $0xa0] sm:$0xf0]  ;;  %v910_v26 = vor.u32 %v908_v10, %v907_v51  ;;  %v704_v45 = vmax.f32 %v653_v44, 0.0  ;;  %2403 = vst.msk [vmem:[#allocation3 + $0x4] sm:$0xf] %vm1755_vm0, %v2308_v42  ;;  %v911_v59 = vrot.slane %v907_v51, 4 }
 0x14c   : > { %v4236_v63 = vor.u32 %v4507_v25, %v4235_v53  ;;  %v5793_v53 = vsel %vm5022_vm8, %v1403_v28, %v1407_v14  ;;  %v1141_v28 = vld [vmem:[#allocation2 + $0x80] sm:$0x1]  ;;  %3383 = vmatpush.bf16.msrb.mxu2 %v4546_v22 }
 0x14d   : > { %v5782_v41 = vld [vmem:[#allocation2 + $0x70] sm:$0xf]  ;;  %v1138_v2 = vsel %vm5074_vm12, %v910_v26, %v1137_v5  ;;  %v736_v61 = vpack.c.bf16 %v704_v45, %v704_v45  ;;  %2321 = vrot.lane.b32.xlu1 %v5449_v33, %s4867_s20  ;;  %v1415_v5 = vshll.u32 %v5486_v55, 16  ;;  %2275 = vst.msk [vmem:[#allocation3 + $0x64] sm:$0xf] %vm278_vm1, %v5793_v53  ;;  %v1412_v55 = vor.u32 %v1411_v34, %v1407_v14 }
 0x14e   : > { %1259 = vst.msk [vmem:[#allocation3 + $0xe4] sm:$0xf] %vm278_vm1, %v5782_v41  ;;  %v1904_v10 = vrot.slane %v5782_v41, 5  ;;  %v4545_v34 = vld [vmem:[%s6946_s2 + $0x50] sm:$0xff] }
 0x14f   : > { %v5799_v45 = vld [vmem:[#allocation2 + $0x74] sm:$0x1]  ;;  %1139 = vst [vmem:[#allocation2 + $0x78] sm:$0xf] %v1138_v2  ;;  %v913_v26 = vshrl.u32 %v736_v61, 16  ;;  %v916_v9 = vshll.u32 %v736_v61, 16  ;;  %4423 = vmatmul.msk.bf16.gmra.mxu0 %vm3241_vm15, %v4236_v63  ;;  %2449 = vrot.lane.b32.xlu2 %v5458_v54, %s4868_s21  ;;  %v2350_v44 = vpop.permute.xlu1 %2349 }
 0x150   : > { %v5806_v43 = vsel %vm5028_vm11, %v4144_v24, %v1904_v10  ;;  %v1906_v25 = vrot.slane %v1904_v10, 4  ;;  %v1907_v1 = vrot.slane %v5799_v45, 5  ;;  %2424 = vst.msk [vmem:[#allocation3 + $0x100] sm:$0xf] %vm1755_vm0, %v2350_v44  ;;  %1675 = vrot.lane.b32.xlu0 %v5659_v7, %s4867_s20  ;;  %v1413_v7 = vrot.slane %v1412_v55, 4  ;;  %3384 = vmatpush.bf16.msrb.mxu2 %v4545_v34 }
 0x151   : > { %v915_v42 = vrot.slane %v913_v26, 7  ;;  %v5814_v63 = vpop.permute.xlu2 %1959  ;;  %2771 = vst.msk [vmem:[#allocation3 + $0xb0] sm:$0xf] %vm278_vm1, %v5806_v43  ;;  %v1417_v61 = vrot.slane %v1415_v5, 5  ;;  %v4544_v5 = vld [vmem:[%s6946_s2 + $0x48] sm:$0xff] }
 0x152   : > { %v5818_v24 = vsel %vm5028_vm11, %v1906_v25, %v1907_v1  ;;  %v2348_v2 = vpop.permute.xlu0 %2347  ;;  %v4543_v1 = vld [vmem:[%s6946_s2 + $0x40] sm:$0xff] }
 0x153   : > { %v918_v14 = vor.u32 %v916_v9, %v915_v42  ;;  %v920_v51 = vrot.slane %v915_v42, 4  ;;  %2772 = vst.msk [vmem:[#allocation3 + $0xbc] sm:$0xf] %vm278_vm1, %v5818_v24  ;;  %v5848_v9 = vsel %vm5022_vm8, %v1413_v7, %v1417_v61 }
 0x154   : > { %2423 = vst.msk [vmem:[#allocation3 + $0xf4] sm:$0xf] %vm1755_vm0, %v2348_v2  ;;  %3385 = vmatpush.bf16.msrb.mxu2 %v4544_v5  ;;  %v1429_v5 = vshll.u32 %v5553_v0, 16 }
 0x155   : > { %v919_v10 = vsel %vm5089_vm14, %v911_v59, %v918_v14  ;;  %v1142_v22 = vsel %vm5002_vm4, %v920_v51, %v1141_v28  ;;  %2553 = vst.msk [vmem:[#allocation3 + $0xf4] sm:$0xf] %vm2047_vm2, %v5705_v19  ;;  %2098 = vrot.lane.b32.xlu1 %v5458_v54, %s4869_s29 }
 0x156   : > { %v5834_v26 = vld [vmem:[#allocation2 + $0x78] sm:$0xf]  ;;  %1140 = vst.msk [vmem:[#allocation2 + $0x7c] sm:$0xf] %vm278_vm1, %v919_v10 }
 0x157   : > { %1260 = vst.msk [vmem:[#allocation3 + $0xf0] sm:$0xf] %vm278_vm1, %v5834_v26  ;;  %2599 = vrot.lane.b32.xlu2 %v5699_v37, %s4869_s29  ;;  %v2438_v19 = vpop.permute.xlu1 %2437  ;;  %v4145_v42 = vrot.slane %v5834_v26, 9 }
 0x158   : > { %1143 = vst [vmem:[#allocation2 + $0x80] sm:$0x1] %v1142_v22  ;;  %1969 = vrot.lane.b32.xlu0 %v5449_v33, %s4868_s21  ;;  %v4247_v44 = vld [vmem:[#allocation3 + $0xb0] sm:$0xf]  ;;  %3386 = vmatpush.bf16.msrb.mxu2 %v4543_v1  ;;  %v1423_v22 = vshll.u32 %v5526_v48, 16 }
 0x159   : > { %2533 = vst.msk [vmem:[#allocation3 + $0x4] sm:$0xf] %vm2047_vm2, %v2438_v19  ;;  %v2590_v54 = vpop.permute.xlu2 %2589 }
 0x15a   : > { %2685 = vst.msk [vmem:[#allocation3 + $0x4] sm:$0xf] %vm2178_vm3, %v2590_v54  ;;  %v4510_v25 = vld [vmem:[#allocation3 + $0xb8] sm:$0xf0]  ;;  %v2310_v55 = vpop.permute.xlu0 %2309  ;;  %v1425_v54 = vrot.slane %v1423_v22, 5 }
 0x15b   : > { %v4248_v59 = vor.u32 %v4510_v25, %v4247_v44  ;;  %2276 = vst.msk [vmem:[#allocation3 + $0x70] sm:$0xf] %vm278_vm1, %v5848_v9  ;;  %v1431_v44 = vrot.slane %v1429_v5, 5  ;;  %v1433_v25 = vshrl.u32 %v5553_v0, 16 }
 0x15c   : > { %2404 = vst.msk [vmem:[#allocation3 + $0x10] sm:$0xf] %vm1755_vm0, %v2310_v55 }
 0x15d   : > { %v5861_v33 = vld [vmem:[#allocation2 + $0x7c] sm:$0xf]  ;;  %1677 = vrot.lane.b32.xlu1 %v5699_v37, %s4867_s20 }
 0x15e   : > { %1261 = vst.msk [vmem:[#allocation3 + $0xfc] sm:$0xf] %vm278_vm1, %v5861_v33  ;;  %v1911_v28 = vrot.slane %v5861_v33, 5 }
 0x15f   : > { %v5868_v34 = vld [vmem:[#allocation2 + $0x80] sm:$0x1]  ;;  %4424 = vmatmul.msk.bf16.gmra.mxu0 %vm3241_vm15, %v4248_v59  ;;  %2100 = vrot.lane.b32.xlu2 %v5477_v30, %s4869_s29  ;;  %v2087_v14 = vpop.permute.xlu1 %2086 }
 0x160   : > { %v5875_v51 = vsel %vm5028_vm11, %v4145_v42, %v1911_v28  ;;  %v1913_v2 = vrot.slane %v1911_v28, 4  ;;  %v1914_v7 = vrot.slane %v5868_v34, 5  ;;  %2451 = vrot.lane.b32.xlu0 %v5477_v30, %s4868_s21  ;;  %v1420_v30 = vshrl.u32 %v5526_v48, 16 }
 0x161   : > { %v5880_v37 = vpop.permute.xlu2 %2441  ;;  %2773 = vst.msk [vmem:[#allocation3 + $0xc8] sm:$0xf] %vm278_vm1, %v5875_v51  ;;  %v1435_v42 = vrot.slane %v1433_v25, 4  ;;  %v329_v25 = vld [vmem:[#allocation2 + $0x9c] sm:$0x1] }
 0x162   : > { %v5886_v61 = vsel %vm5028_vm11, %v1913_v2, %v1914_v7  ;;  %v1664_v10 = vpop.permute.xlu0 %1663  ;;  %v1422_v19 = vrot.slane %v1420_v30, 4  ;;  %v1439_v30 = vshll.u32 %v5565_v21, 16 }
 0x163   : > { %2774 = vst.msk [vmem:[#allocation3 + $0xd4] sm:$0xf] %vm278_vm1, %v5886_v61 }
 0x164   : > { %1758 = vst.msk [vmem:[#allocation3 + $0x18] sm:$0xf] %vm1755_vm0, %v1664_v10  ;;  %v1426_v59 = vor.u32 %v1425_v54, %v1422_v19  ;;  %v1436_v10 = vor.u32 %v1435_v42, %v1431_v44  ;;  %v1441_v5 = vrot.slane %v1439_v30, 5  ;;  %v4487_v42 = vld [vmem:[#allocation3 + $0x4] sm:$0xf] }
 0x165   : > { %2050 = vst.msk [vmem:[#allocation3 + $0x18] sm:$0xf] %vm2047_vm2, %v5665_v31  ;;  %2601 = vrot.lane.b32.xlu1 %v5793_v53, %s4869_s29 }
 0x166   : > { %2181 = vst.msk [vmem:[#allocation3 + $0x18] sm:$0xf] %vm2178_vm3, %v2087_v14  ;;  %v1427_v7 = vrot.slane %v1426_v59, 4 }
 0x167   : > { %1971 = vrot.lane.b32.xlu2 %v5494_v4, %s4868_s21  ;;  %v1666_v31 = vpop.permute.xlu1 %1665 }
 0x168   : > { %v4259_v1 = vld [vmem:[#allocation3 + $0xc8] sm:$0xf]  ;;  %1759 = vst.msk [vmem:[#allocation3 + $0x24] sm:$0xf] %vm1755_vm0, %v1666_v31  ;;  %2323 = vrot.lane.b32.xlu0 %v5494_v4, %s4867_s20  ;;  %v5911_v22 = vsel %vm5022_vm8, %v1427_v7, %v1431_v44  ;;  %v1437_v4 = vrot.slane %v1436_v10, 4 }
 0x169   : > { %v2592_v55 = vpop.permute.xlu2 %2591  ;;  %2277 = vst.msk [vmem:[#allocation3 + $0x7c] sm:$0xf] %vm278_vm1, %v5911_v22  ;;  %v385_v10 = vld [vmem:[#allocation2 + $0xa4] sm:$0x1] }
 0x16a   : > { %v4513_v28 = vld [vmem:[#allocation3 + $0xd0] sm:$0xf0]  ;;  %v1958_v14 = vpop.permute.xlu0 %1957  ;;  %v5922_v21 = vsel %vm5022_vm8, %v1437_v4, %v1441_v5  ;;  %v386_v4 = vsel %vm5012_vm5, 0, %v385_v10  ;;  %v332_v5 = vld [vmem:[#allocation2 + $0xa8] sm:$0x1] }
 0x16b   : > { %v4260_v2 = vor.u32 %v4513_v28, %v4259_v1  ;;  %2051 = vst.msk [vmem:[#allocation3 + $0x24] sm:$0xf] %vm2047_vm2, %v1958_v14  ;;  %v330_v1 = vsel %vm5002_vm4, 0, %v329_v25  ;;  %v1447_v25 = vshll.u32 %v5599_v8, 16 }
 0x16c   : > { %2182 = vst.msk [vmem:[#allocation3 + $0x24] sm:$0xf] %vm2178_vm3, %v5774_v3 }
 0x16d   : > { %2325 = vrot.lane.b32.xlu1 %v5508_v6, %s4867_s20  ;;  %2278 = vst.msk [vmem:[#allocation3 + $0x88] sm:$0xf] %vm278_vm1, %v5922_v21  ;;  %v4167_v44 = vld [vmem:[#allocation3 + $0x18] sm:$0xf] }
 0x16e   : > { %331 = vst [vmem:[#allocation2 + $0x9c] sm:$0x1] %v330_v1  ;;  %v1449_v1 = vrot.slane %v1447_v25, 5 }
 0x16f   : > { %4425 = vmatmul.msk.bf16.gmra.mxu0 %vm3241_vm15, %v4260_v2  ;;  %2453 = vrot.lane.b32.xlu2 %v5526_v48, %s4868_s21  ;;  %v2440_v3 = vpop.permute.xlu1 %2439  ;;  %v4516_v2 = vld [vmem:[#allocation3 + $0xe8] sm:$0xf0]  ;;  %387 = vst [vmem:[#allocation2 + $0xa4] sm:$0x1] %v386_v4 }
 0x170   : > { %2534 = vst.msk [vmem:[#allocation3 + $0x10] sm:$0xf] %vm2047_vm2, %v2440_v3  ;;  %1679 = vrot.lane.b32.xlu0 %v5793_v53, %s4867_s20 }
 0x171   : > { %v2632_v19 = vpop.permute.xlu2 %2631  ;;  %2686 = vst.msk [vmem:[#allocation3 + $0x10] sm:$0xf] %vm2178_vm3, %v2592_v55 }
 0x172   : > { %v2480_v54 = vpop.permute.xlu0 %2479 }
 0x173   : > { %2554 = vst.msk [vmem:[#allocation3 + $0x100] sm:$0xf] %vm2047_vm2, %v2480_v54  ;;  %v4491_v31 = vld [vmem:[#allocation3 + $0x20] sm:$0xf0] }
 0x174   : > { %2706 = vst.msk [vmem:[#allocation3 + $0x100] sm:$0xf] %vm2178_vm3, %v2632_v19  ;;  %v4168_v59 = vor.u32 %v4491_v31, %v4167_v44  ;;  %v333_v19 = vsel %vm5002_vm4, 0, %v332_v5  ;;  %v1444_v44 = vshrl.u32 %v5599_v8, 16 }
 0x175   : > { %2102 = vrot.lane.b32.xlu1 %v5526_v48, %s4869_s29  ;;  %v4271_v48 = vld [vmem:[#allocation3 + $0xe0] sm:$0xf]  ;;  %334 = vst [vmem:[#allocation2 + $0xa8] sm:$0x1] %v333_v19  ;;  %v1463_v19 = vshll.u32 %v5643_v38, 16 }
 0x176   : > { %3303 = vmatmul.bf16.gmra.mxu1 %v4168_v59  ;;  %v4272_v30 = vor.u32 %v4516_v2, %v4271_v48  ;;  %v1446_v31 = vrot.slane %v1444_v44, 4  ;;  %v1453_v59 = vshll.u32 %v5630_v12, 16  ;;  %v1158_v25 = vld [vmem:[#allocation2 + $0x9c] sm:$0xf] }
 0x177   : > { %2603 = vrot.lane.b32.xlu2 %v5848_v9, %s4869_s29  ;;  %v2314_v53 = vpop.permute.xlu1 %2313 }
 0x178   : > { %2406 = vst.msk [vmem:[#allocation3 + $0x28] sm:$0xf] %vm1755_vm0, %v2314_v53  ;;  %1973 = vrot.lane.b32.xlu0 %v5508_v6, %s4868_s21  ;;  %v4157_v28 = vld [vmem:[#allocation3 + $0xc] sm:$0xf0]  ;;  %v1455_v2 = vrot.slane %v1453_v59, 5 }
 0x179   : > { %v5941_v55 = vpop.permute.xlu2 %2092  ;;  %v4160_v14 = vor.u32 %v4487_v42, %v4157_v28 }
 0x17a   : > { %v2312_v7 = vpop.permute.xlu0 %2311 }
 0x17b   : > { %2405 = vst.msk [vmem:[#allocation3 + $0x1c] sm:$0xf] %vm1755_vm0, %v2312_v7  ;;  %3387 = vmatmul.bf16.vlgmr.msrb.gmra.mxu2 %v4160_v14  ;;  %v1450_v14 = vor.u32 %v1449_v1, %v1446_v31 }
 0x17c   : > { %2535 = vst.msk [vmem:[#allocation3 + $0x1c] sm:$0xf] %vm2047_vm2, %v5880_v37 }
 0x17d   : > { %1681 = vrot.lane.b32.xlu1 %v5848_v9, %s4867_s20  ;;  %v665_v9 = vpop.f32.mrf.mxu2  ;;  %v1451_v4 = vrot.slane %v1450_v14, 4 }
 0x17e   : > { %v666_v54 = vadd.f32 %v5545_v60, %v665_v9 }
 0x17f   : > { %4426 = vmatmul.msk.bf16.gmra.mxu0 %vm3241_vm15, %v4272_v30  ;;  %2104 = vrot.lane.b32.xlu2 %v5553_v0, %s4869_s29  ;;  %v2630_v6 = vpop.permute.xlu1 %2629 }
 0x180   : > { %2705 = vst.msk [vmem:[#allocation3 + $0xf4] sm:$0xf] %vm2178_vm3, %v2630_v6  ;;  %2455 = vrot.lane.b32.xlu0 %v5553_v0, %s4868_s21  ;;  %v709_v0 = vmax.f32 %v666_v54, 0.0  ;;  %v388_v6 = vld [vmem:[#allocation2 + $0xb0] sm:$0x1]  ;;  %v5983_v54 = vsel %vm5022_vm8, %v1451_v4, %v1455_v2 }
 0x181   : > { %v5956_v37 = vpop.permute.xlu2 %1963  ;;  %2279 = vst.msk [vmem:[#allocation3 + $0x94] sm:$0xf] %vm278_vm1, %v5983_v54 }
 0x182   : > { %v1668_v3 = vpop.permute.xlu0 %1667  ;;  %v741_v28 = vpack.c.bf16 %v709_v0, %v709_v0 }
 0x183   : > { %1760 = vst.msk [vmem:[#allocation3 + $0x30] sm:$0xf] %vm1755_vm0, %v1668_v3  ;;  %v389_v3 = vsel %vm5012_vm5, 0, %v388_v6 }
 0x184   : > { %2052 = vst.msk [vmem:[#allocation3 + $0x30] sm:$0xf] %vm2047_vm2, %v5814_v63  ;;  %v1457_v63 = vshrl.u32 %v5630_v12, 16  ;;  %v956_v10 = vshrl.u32 %v741_v28, 16  ;;  %v959_v30 = vshll.u32 %v741_v28, 16  ;;  %v1465_v28 = vrot.slane %v1463_v19, 5 }
 0x185   : > { %2605 = vrot.lane.b32.xlu1 %v5911_v22, %s4869_s29  ;;  %v667_v5 = vpop.f32.mrf.mxu2  ;;  %390 = vst [vmem:[#allocation2 + $0xb0] sm:$0x1] %v389_v3 }
 0x186   : > { %v1459_v7 = vrot.slane %v1457_v63, 4  ;;  %v958_v9 = vrot.slane %v956_v10, 7  ;;  %v335_v10 = vld [vmem:[#allocation2 + $0xb4] sm:$0x1] }
 0x187   : > { %1975 = vrot.lane.b32.xlu2 %v5576_v15, %s4868_s21  ;;  %v2091_v53 = vpop.permute.xlu1 %2090  ;;  %v336_v6 = vsel %vm5002_vm4, 0, %v335_v10 }
 0x188   : > { %2183 = vst.msk [vmem:[#allocation3 + $0x30] sm:$0xf] %vm2178_vm3, %v2091_v53  ;;  %2327 = vrot.lane.b32.xlu0 %v5576_v15, %s4867_s20  ;;  %v668_v15 = vadd.f32 %v5545_v60, %v667_v5  ;;  %v1460_v44 = vor.u32 %v1459_v7, %v1455_v2  ;;  %v961_v38 = vor.u32 %v959_v30, %v958_v9  ;;  %v962_v30 = vrot.slane %v958_v9, 4 }
 0x189   : > { %v5975_v42 = vpop.permute.xlu2 %2445  ;;  %337 = vst [vmem:[#allocation2 + $0xb4] sm:$0x1] %v336_v6 }
 0x18a   : > { %v1962_v48 = vpop.permute.xlu0 %1961  ;;  %v710_v0 = vmax.f32 %v668_v15, 0.0  ;;  %v1159_v1 = vsel %vm5074_vm12, %v961_v38, %v1158_v25  ;;  %v1461_v63 = vrot.slane %v1460_v44, 4 }
 0x18b   : > { %1160 = vst [vmem:[#allocation2 + $0x9c] sm:$0xf] %v1159_v1 }
 0x18c   : > { %v742_v53 = vpack.c.bf16 %v710_v0, %v710_v0  ;;  %v6004_v5 = vsel %vm5022_vm8, %v1461_v63, %v1465_v28 }
 0x18d   : > { %2329 = vrot.lane.b32.xlu1 %v5588_v62, %s4867_s20  ;;  %v670_v4 = vpop.f32.mrf.mxu2  ;;  %2280 = vst.msk [vmem:[#allocation3 + $0xa0] sm:$0xf] %vm278_vm1, %v6004_v5 }
 0x18e   : > { %v964_v2 = vshrl.u32 %v742_v53, 16  ;;  %v967_v7 = vshll.u32 %v742_v53, 16 }
 0x18f   : > { %2457 = vrot.lane.b32.xlu2 %v5599_v8, %s4868_s21  ;;  %v1670_v31 = vpop.permute.xlu1 %1669  ;;  %v4179_v38 = vld [vmem:[#allocation3 + $0x30] sm:$0xf] }
 0x190   : > { %1761 = vst.msk [vmem:[#allocation3 + $0x3c] sm:$0xf] %vm1755_vm0, %v1670_v31  ;;  %1683 = vrot.lane.b32.xlu0 %v5911_v22, %s4867_s20  ;;  %v966_v22 = vrot.slane %v964_v2, 7 }
 0x191   : > { %v2596_v59 = vpop.permute.xlu2 %2595  ;;  %2053 = vst.msk [vmem:[#allocation3 + $0x3c] sm:$0xf] %vm2047_vm2, %v1962_v48  ;;  %v671_v48 = vadd.f32 %v5545_v60, %v670_v4 }
 0x192   : > { %2184 = vst.msk [vmem:[#allocation3 + $0x3c] sm:$0xf] %vm2178_vm3, %v5941_v55  ;;  %v2444_v14 = vpop.permute.xlu0 %2443  ;;  %v1162_v55 = vld [vmem:[#allocation2 + $0xa4] sm:$0x1]  ;;  %v969_v3 = vor.u32 %v967_v7, %v966_v22  ;;  %v971_v19 = vrot.slane %v966_v22, 4 }
 0x193   : > { %2536 = vst.msk [vmem:[#allocation3 + $0x28] sm:$0xf] %vm2047_vm2, %v2444_v14  ;;  %v711_v15 = vmax.f32 %v671_v48, 0.0  ;;  %v6024_v1 = vld [vmem:[#allocation2 + $0x9c] sm:$0xf] }
 0x194   : > { %2688 = vst.msk [vmem:[#allocation3 + $0x28] sm:$0xf] %vm2178_vm3, %v2596_v59  ;;  %v1163_v44 = vsel %vm5002_vm4, %v971_v19, %v1162_v55  ;;  %v391_v14 = vld [vmem:[#allocation2 + $0xbc] sm:$0x1] }
 0x195   : > { %2106 = vrot.lane.b32.xlu1 %v5599_v8, %s4869_s29  ;;  %v970_v8 = vsel %vm5089_vm14, %v962_v30, %v969_v3  ;;  %v743_v31 = vpack.c.bf16 %v711_v15, %v711_v15  ;;  %1164 = vst [vmem:[#allocation2 + $0xa4] sm:$0x1] %v1163_v44  ;;  %v672_v28 = vpop.f32.mrf.mxu2  ;;  %v392_v10 = vsel %vm5012_vm5, 0, %v391_v14  ;;  %v1165_v30 = vld [vmem:[#allocation2 + $0xa8] sm:$0xf] }
 0x196   : > { %1161 = vst.msk [vmem:[#allocation2 + $0xa0] sm:$0xf] %vm278_vm1, %v970_v8  ;;  %v673_v7 = vadd.f32 %v5545_v60, %v672_v28  ;;  %v4148_v8 = vrot.slane %v6024_v1, 9 }
 0x197   : > { %2607 = vrot.lane.b32.xlu2 %v5922_v21, %s4869_s29  ;;  %v2594_v9 = vpop.permute.xlu1 %2593  ;;  %1266 = vst.msk [vmem:[#allocation3 + $0x138] sm:$0xf] %vm278_vm1, %v6024_v1  ;;  %v976_v63 = vshll.u32 %v743_v31, 16 }
 0x198   : > { %2687 = vst.msk [vmem:[#allocation3 + $0x1c] sm:$0xf] %vm2178_vm3, %v2594_v9  ;;  %1977 = vrot.lane.b32.xlu0 %v5588_v62, %s4868_s21  ;;  %v973_v62 = vshrl.u32 %v743_v31, 16  ;;  %v712_v48 = vmax.f32 %v673_v7, 0.0  ;;  %v6067_v7 = vld [vmem:[%s6948_s4] ss:$0 sm:$0xff] }
 0x199   : > { %v6021_v25 = vpop.permute.xlu2 %2096  ;;  %v4494_v0 = vld [vmem:[#allocation3 + $0x38] sm:$0xf0]  ;;  %393 = vst [vmem:[#allocation2 + $0xbc] sm:$0x1] %v392_v10 }
 0x19a   : > { %v2316_v59 = vpop.permute.xlu0 %2315  ;;  %v4180_v53 = vor.u32 %v4494_v0, %v4179_v38  ;;  %v975_v2 = vrot.slane %v973_v62, 7  ;;  %v744_v19 = vpack.c.bf16 %v712_v48, %v712_v48  ;;  %v338_v62 = vld [vmem:[#allocation2 + $0xc0] sm:$0x1] }
 0x19b   : > { %2407 = vst.msk [vmem:[#allocation3 + $0x34] sm:$0xf] %vm1755_vm0, %v2316_v59  ;;  %v4169_v55 = vld [vmem:[#allocation3 + $0x24] sm:$0xf0]  ;;  %v339_v10 = vsel %vm5002_vm4, 0, %v338_v62 }
 0x19c   : > { %3308 = vmatmul.bf16.gmra.mxu1 %v4180_v53  ;;  %2537 = vst.msk [vmem:[#allocation3 + $0x34] sm:$0xf] %vm2047_vm2, %v5975_v42  ;;  %v978_v4 = vor.u32 %v976_v63, %v975_v2  ;;  %v6049_v15 = vld [vmem:[#allocation2 + $0xa4] sm:$0x1]  ;;  %v984_v38 = vshll.u32 %v744_v19, 16  ;;  %v1468_v63 = vshrl.u32 %v5686_v49, 16 }
 0x19d   : > { %1685 = vrot.lane.b32.xlu1 %v5922_v21, %s4867_s20  ;;  %v6038_v42 = vld [vmem:[#allocation2 + $0xa0] sm:$0xf]  ;;  %v1935_v0 = vrot.slane %v6049_v15, 5  ;;  %v675_v31 = vpop.f32.mrf.mxu2  ;;  %v979_v28 = vrot.slane %v975_v2, 4  ;;  %v1169_v2 = vld [vmem:[#allocation2 + $0xb0] sm:$0x1] }
 0x19e   : > { %1267 = vst.msk [vmem:[#allocation3 + $0x144] sm:$0xf] %vm278_vm1, %v6038_v42  ;;  %v1166_v3 = vsel %vm5074_vm12, %v978_v4, %v1165_v30  ;;  %v1932_v44 = vrot.slane %v6038_v42, 5  ;;  %v1471_v4 = vshll.u32 %v5686_v49, 16 }
 0x19f   : > { %2108 = vrot.lane.b32.xlu2 %v5630_v12, %s4869_s29  ;;  %v2318_v22 = vpop.permute.xlu1 %2317  ;;  %v4490_v6 = vld [vmem:[#allocation3 + $0x1c] sm:$0xf]  ;;  %1167 = vst [vmem:[#allocation2 + $0xa8] sm:$0xf] %v1166_v3 }
 0x1a0   : > { %2408 = vst.msk [vmem:[#allocation3 + $0x40] sm:$0xf] %vm1755_vm0, %v2318_v22  ;;  %2459 = vrot.lane.b32.xlu0 %v5630_v12, %s4868_s21  ;;  %v4172_v21 = vor.u32 %v4490_v6, %v4169_v55  ;;  %v981_v12 = vshrl.u32 %v744_v19, 16  ;;  %v6059_v59 = vsel %vm5028_vm11, %v4148_v8, %v1932_v44  ;;  %v1934_v53 = vrot.slane %v1932_v44, 4 }
 0x1a1   : > { %v6043_v60 = vpop.permute.xlu2 %1967  ;;  %2779 = vst.msk [vmem:[#allocation3 + $0x110] sm:$0xf] %vm278_vm1, %v6059_v59  ;;  %v1470_v22 = vrot.slane %v1468_v63, 4  ;;  %v1473_v19 = vrot.slane %v1471_v4, 5 }
 0x1a2   : > { %v1672_v9 = vpop.permute.xlu0 %1671  ;;  %3392 = vmatmul.bf16.gmra.mxu2 %v4172_v21  ;;  %v983_v14 = vrot.slane %v981_v12, 7  ;;  %v6078_v30 = vsel %vm5028_vm11, %v1934_v53, %v1935_v0  ;;  %340 = vst [vmem:[#allocation2 + $0xc0] sm:$0x1] %v339_v10 }
 0x1a3   : > { %1762 = vst.msk [vmem:[#allocation3 + $0x48] sm:$0xf] %vm1755_vm0, %v1672_v9  ;;  %v1477_v9 = vshll.u32 %v5710_v27, 16 }
 0x1a4   : > { %2054 = vst.msk [vmem:[#allocation3 + $0x48] sm:$0xf] %vm2047_vm2, %v5956_v37  ;;  %v676_v37 = vadd.f32 %v6067_v7, %v675_v31  ;;  %v986_v55 = vor.u32 %v984_v38, %v983_v14  ;;  %v988_v48 = vrot.slane %v983_v14, 4  ;;  %v1474_v31 = vor.u32 %v1473_v19, %v1470_v22 }
 0x1a5   : > { %2609 = vrot.lane.b32.xlu1 %v5983_v54, %s4869_s29  ;;  %2780 = vst.msk [vmem:[#allocation3 + $0x11c] sm:$0xf] %vm278_vm1, %v6078_v30  ;;  %v1481_v14 = vshrl.u32 %v5710_v27, 16 }
 0x1a6   : > { %v713_v21 = vmax.f32 %v676_v37, 0.0  ;;  %v6089_v8 = vld [vmem:[#allocation2 + $0xa8] sm:$0xf]  ;;  %v987_v44 = vsel %vm5089_vm14, %v979_v28, %v986_v55  ;;  %v1170_v12 = vsel %vm5002_vm4, %v988_v48, %v1169_v2  ;;  %v677_v28 = vpop.f32.mrf.mxu2  ;;  %v1475_v10 = vrot.slane %v1474_v31, 4 }
 0x1a7   : > { %1979 = vrot.lane.b32.xlu2 %v5654_v36, %s4868_s21  ;;  %v2095_v6 = vpop.permute.xlu1 %2094  ;;  %1268 = vst.msk [vmem:[#allocation3 + $0x150] sm:$0xf] %vm278_vm1, %v6089_v8  ;;  %v1479_v2 = vrot.slane %v1477_v9, 5  ;;  %v678_v22 = vadd.f32 %v6067_v7, %v677_v28 }
 0x1a8   : > { %2185 = vst.msk [vmem:[#allocation3 + $0x48] sm:$0xf] %vm2178_vm3, %v2095_v6  ;;  %2331 = vrot.lane.b32.xlu0 %v5654_v36, %s4867_s20  ;;  %v745_v38 = vpack.c.bf16 %v713_v21, %v713_v21  ;;  %v394_v36 = vld [vmem:[#allocation2 + $0xc8] sm:$0x1]  ;;  %v1172_v6 = vld [vmem:[#allocation2 + $0xb4] sm:$0xf] }
 0x1a9   : > { %v6086_v3 = vpop.permute.xlu2 %2449  ;;  %1168 = vst.msk [vmem:[#allocation2 + $0xac] sm:$0xf] %vm278_vm1, %v987_v44  ;;  %v395_v63 = vsel %vm5012_vm5, 0, %v394_v36  ;;  %v4295_v37 = vld [vmem:[#allocation3 + $0x110] sm:$0xf]  ;;  %v6108_v55 = vsel %vm5022_vm8, %v1475_v10, %v1479_v2  ;;  %v714_v19 = vmax.f32 %v678_v22, 0.0 }
 0x1aa   : > { %v1966_v0 = vpop.permute.xlu0 %1965  ;;  %v990_v53 = vshrl.u32 %v745_v38, 16  ;;  %v993_v62 = vshll.u32 %v745_v38, 16  ;;  %1171 = vst [vmem:[#allocation2 + $0xb0] sm:$0x1] %v1170_v12  ;;  %v1483_v12 = vrot.slane %v1481_v14, 4  ;;  %v1487_v22 = vshll.u32 %v5719_v46, 16 }
 0x1ab   : > { %396 = vst [vmem:[#allocation2 + $0xc8] sm:$0x1] %v395_v63  ;;  %v746_v31 = vpack.c.bf16 %v714_v19, %v714_v19 }
 0x1ac   : > { %v992_v4 = vrot.slane %v990_v53, 7  ;;  %v4522_v20 = vld [vmem:[#allocation3 + $0x118] sm:$0xf0]  ;;  %2281 = vst.msk [vmem:[#allocation3 + $0xac] sm:$0xf] %vm278_vm1, %v6108_v55  ;;  %v1484_v10 = vor.u32 %v1483_v12, %v1479_v2 }
 0x1ad   : > { %2333 = vrot.lane.b32.xlu1 %v5671_v57, %s4867_s20  ;;  %v4296_v9 = vor.u32 %v4522_v20, %v4295_v37  ;;  %v1001_v63 = vshll.u32 %v746_v31, 16 }
 0x1ae   : > { %v995_v21 = vor.u32 %v993_v62, %v992_v4  ;;  %v4149_v62 = vrot.slane %v6089_v8, 9  ;;  %v680_v14 = vpop.f32.mrf.mxu2  ;;  %v1485_v12 = vrot.slane %v1484_v10, 4 }
 0x1af   : > { %2461 = vrot.lane.b32.xlu2 %v5686_v49, %s4868_s21  ;;  %v1674_v48 = vpop.permute.xlu1 %1673  ;;  %4428 = vmatmul.msk.bf16.gmra.mxu3 %vm3241_vm15, %v4296_v9  ;;  %v681_v20 = vadd.f32 %v6067_v7, %v680_v14 }
 0x1b0   : > { %1763 = vst.msk [vmem:[#allocation3 + $0x54] sm:$0xf] %vm1755_vm0, %v1674_v48  ;;  %1687 = vrot.lane.b32.xlu0 %v5983_v54, %s4867_s20  ;;  %v1173_v38 = vsel %vm5074_vm12, %v995_v21, %v1172_v6  ;;  %v6119_v36 = vld [vmem:[#allocation2 + $0xac] sm:$0xf]  ;;  %v998_v54 = vshrl.u32 %v746_v31, 16 }
 0x1b1   : > { %v2600_v44 = vpop.permute.xlu2 %2599  ;;  %2055 = vst.msk [vmem:[#allocation3 + $0x54] sm:$0xf] %vm2047_vm2, %v1966_v0  ;;  %v6126_v0 = vld [vmem:[#allocation2 + $0xb0] sm:$0x1]  ;;  %v1939_v28 = vrot.slane %v6119_v36, 5  ;;  %v715_v9 = vmax.f32 %v681_v20, 0.0 }
 0x1b2   : > { %2186 = vst.msk [vmem:[#allocation3 + $0x54] sm:$0xf] %vm2178_vm3, %v6021_v25  ;;  %v2448_v53 = vpop.permute.xlu0 %2447  ;;  %v1942_v37 = vrot.slane %v6126_v0, 5  ;;  %v996_v25 = vrot.slane %v992_v4, 4  ;;  %v1000_v6 = vrot.slane %v998_v54, 7 }
 0x1b3   : > { %1269 = vst.msk [vmem:[#allocation3 + $0x15c] sm:$0xf] %vm278_vm1, %v6119_v36  ;;  %v1176_v48 = vld [vmem:[#allocation2 + $0xbc] sm:$0x1]  ;;  %v6140_v2 = vsel %vm5028_vm11, %v4149_v62, %v1939_v28  ;;  %v1941_v46 = vrot.slane %v1939_v28, 4 }
 0x1b4   : > { %1174 = vst [vmem:[#allocation2 + $0xb4] sm:$0xf] %v1173_v38  ;;  %v1003_v21 = vor.u32 %v1001_v63, %v1000_v6  ;;  %v1005_v19 = vrot.slane %v1000_v6, 4  ;;  %v1489_v38 = vrot.slane %v1487_v22, 5  ;;  %v4191_v62 = vld [vmem:[#allocation3 + $0x48] sm:$0xf]  ;;  %v747_v63 = vpack.c.bf16 %v715_v9, %v715_v9 }
 0x1b5   : > { %2538 = vst.msk [vmem:[#allocation3 + $0x40] sm:$0xf] %vm2047_vm2, %v2448_v53  ;;  %2110 = vrot.lane.b32.xlu1 %v5686_v49, %s4869_s29  ;;  %v1179_v20 = vld [vmem:[#allocation2 + $0xc0] sm:$0xf]  ;;  %v1183_v29 = vld [vmem:[#allocation2 + $0xc8] sm:$0x1] }
 0x1b6   : > { %2690 = vst.msk [vmem:[#allocation3 + $0x40] sm:$0xf] %vm2178_vm3, %v2600_v44  ;;  %v6151_v44 = vsel %vm5028_vm11, %v1941_v46, %v1942_v37  ;;  %v1004_v31 = vsel %vm5089_vm14, %v996_v25, %v1003_v21  ;;  %v1177_v53 = vsel %vm5002_vm4, %v1005_v19, %v1176_v48  ;;  %v1007_v37 = vshrl.u32 %v747_v63, 16  ;;  %v682_v22 = vpop.f32.mrf.mxu2 }
 0x1b7   : > { %2611 = vrot.lane.b32.xlu2 %v6004_v5, %s4869_s29  ;;  %v2598_v4 = vpop.permute.xlu1 %2597  ;;  %2781 = vst.msk [vmem:[#allocation3 + $0x128] sm:$0xf] %vm278_vm1, %v6140_v2  ;;  %v1010_v10 = vshll.u32 %v747_v63, 16  ;;  %v6166_v25 = vsel %vm5022_vm8, %v1485_v12, %v1489_v38  ;;  %v683_v48 = vadd.f32 %v6067_v7, %v682_v22 }
 0x1b8   : > { %2689 = vst.msk [vmem:[#allocation3 + $0x34] sm:$0xf] %vm2178_vm3, %v2598_v4  ;;  %1981 = vrot.lane.b32.xlu0 %v5671_v57, %s4868_s21  ;;  %v1009_v6 = vrot.slane %v1007_v37, 7 }
 0x1b9   : > { %v6147_v49 = vpop.permute.xlu2 %2100  ;;  %v4497_v54 = vld [vmem:[#allocation3 + $0x50] sm:$0xf0]  ;;  %2782 = vst.msk [vmem:[#allocation3 + $0x134] sm:$0xf] %vm278_vm1, %v6151_v44  ;;  %v716_v12 = vmax.f32 %v683_v48, 0.0  ;;  %v1492_v48 = vshrl.u32 %v5755_v52, 16 }
 0x1ba   : > { %1175 = vst.msk [vmem:[#allocation2 + $0xb8] sm:$0xf] %vm278_vm1, %v1004_v31  ;;  %v2320_v57 = vpop.permute.xlu0 %2319  ;;  %v4192_v14 = vor.u32 %v4497_v54, %v4191_v62  ;;  %v1012_v19 = vor.u32 %v1010_v10, %v1009_v6 }
 0x1bb   : > { %v6160_v28 = vld [vmem:[#allocation2 + $0xb4] sm:$0xf]  ;;  %1178 = vst [vmem:[#allocation2 + $0xbc] sm:$0x1] %v1177_v53  ;;  %v748_v62 = vpack.c.bf16 %v716_v12, %v716_v12 }
 0x1bc   : > { %1270 = vst.msk [vmem:[#allocation3 + $0x168] sm:$0xf] %vm278_vm1, %v6160_v28  ;;  %3313 = vmatmul.bf16.gmra.mxu1 %v4192_v14  ;;  %v4150_v38 = vrot.slane %v6160_v28, 9  ;;  %v1180_v53 = vsel %vm5074_vm12, %v1012_v19, %v1179_v20  ;;  %v1501_v19 = vshll.u32 %v5782_v41, 16 }
 0x1bd   : > { %2409 = vst.msk [vmem:[#allocation3 + $0x4c] sm:$0xf] %vm1755_vm0, %v2320_v57  ;;  %1689 = vrot.lane.b32.xlu1 %v6004_v5, %s4867_s20  ;;  %v4181_v46 = vld [vmem:[#allocation3 + $0x3c] sm:$0xf0]  ;;  %v1015_v14 = vshrl.u32 %v748_v62, 16  ;;  %v1018_v37 = vshll.u32 %v748_v62, 16 }
 0x1be   : > { %2539 = vst.msk [vmem:[#allocation3 + $0x4c] sm:$0xf] %vm2047_vm2, %v6086_v3  ;;  %v4307_v4 = vld [vmem:[#allocation3 + $0x128] sm:$0xf] }
 0x1bf   : > { %2112 = vrot.lane.b32.xlu2 %v5710_v27, %s4869_s29  ;;  %v2322_v21 = vpop.permute.xlu1 %2321  ;;  %v4493_v9 = vld [vmem:[#allocation3 + $0x34] sm:$0xf]  ;;  %2282 = vst.msk [vmem:[#allocation3 + $0xb8] sm:$0xf] %vm278_vm1, %v6166_v25 }
 0x1c0   : > { %2410 = vst.msk [vmem:[#allocation3 + $0x58] sm:$0xf] %vm1755_vm0, %v2322_v21  ;;  %2463 = vrot.lane.b32.xlu0 %v5710_v27, %s4868_s21  ;;  %v4184_v7 = vor.u32 %v4493_v9, %v4181_v46  ;;  %v4525_v3 = vld [vmem:[#allocation3 + $0x130] sm:$0xf0]  ;;  %v1495_v46 = vshll.u32 %v5755_v52, 16  ;;  %v1017_v21 = vrot.slane %v1015_v14, 7 }
 0x1c1   : > { %v6181_v5 = vpop.permute.xlu2 %1971  ;;  %v6184_v31 = vld [vmem:[#allocation2 + $0xb8] sm:$0xf]  ;;  %v4308_v54 = vor.u32 %v4525_v3, %v4307_v4  ;;  %1181 = vst [vmem:[#allocation2 + $0xc0] sm:$0xf] %v1180_v53  ;;  %v1013_v4 = vrot.slane %v1009_v6, 4  ;;  %v1494_v6 = vrot.slane %v1492_v48, 4 }
 0x1c2   : > { %1271 = vst.msk [vmem:[#allocation3 + $0x174] sm:$0xf] %vm278_vm1, %v6184_v31  ;;  %v1676_v63 = vpop.permute.xlu0 %1675  ;;  %3397 = vmatmul.bf16.gmra.mxu2 %v4184_v7  ;;  %v6190_v57 = vld [vmem:[#allocation2 + $0xbc] sm:$0x1]  ;;  %v1946_v27 = vrot.slane %v6184_v31, 5  ;;  %v1497_v12 = vrot.slane %v1495_v46, 5  ;;  %v1020_v3 = vor.u32 %v1018_v37, %v1017_v21 }
 0x1c3   : > { %4429 = vmatmul.msk.bf16.gmra.mxu3 %vm3241_vm15, %v4308_v54  ;;  %v1949_v10 = vrot.slane %v6190_v57, 5  ;;  %1764 = vst.msk [vmem:[#allocation3 + $0x60] sm:$0xf] %vm1755_vm0, %v1676_v63  ;;  %v1503_v53 = vrot.slane %v1501_v19, 5  ;;  %v1511_v48 = vshll.u32 %v5799_v45, 16 }
 0x1c4   : > { %v6198_v22 = vsel %vm5028_vm11, %v4150_v38, %v1946_v27  ;;  %v1948_v20 = vrot.slane %v1946_v27, 4  ;;  %2056 = vst.msk [vmem:[#allocation3 + $0x60] sm:$0xf] %vm2047_vm2, %v6043_v60  ;;  %v1505_v60 = vshrl.u32 %v5782_v41, 16  ;;  %v1022_v38 = vrot.slane %v1017_v21, 4 }
 0x1c5   : > { %2613 = vrot.lane.b32.xlu1 %v6108_v55, %s4869_s29  ;;  %2783 = vst.msk [vmem:[#allocation3 + $0x140] sm:$0xf] %vm278_vm1, %v6198_v22  ;;  %v1498_v54 = vor.u32 %v1497_v12, %v1494_v6  ;;  %v1021_v27 = vsel %vm5089_vm14, %v1013_v4, %v1020_v3  ;;  %v1513_v21 = vrot.slane %v1511_v48, 5 }
 0x1c6   : > { %v6211_v9 = vsel %vm5028_vm11, %v1948_v20, %v1949_v10  ;;  %v1507_v63 = vrot.slane %v1505_v60, 4  ;;  %v1184_v14 = vsel %vm5002_vm4, %v1022_v38, %v1183_v29  ;;  %1182 = vst.msk [vmem:[#allocation2 + $0xc4] sm:$0xf] %vm278_vm1, %v1021_v27 }
 0x1c7   : > { %1983 = vrot.lane.b32.xlu2 %v5726_v50, %s4868_s21  ;;  %v2099_v7 = vpop.permute.xlu1 %2098  ;;  %2784 = vst.msk [vmem:[#allocation3 + $0x14c] sm:$0xf] %vm278_vm1, %v6211_v9  ;;  %v1499_v10 = vrot.slane %v1498_v54, 4 }
 0x1c8   : > { %2187 = vst.msk [vmem:[#allocation3 + $0x60] sm:$0xf] %vm2178_vm3, %v2099_v7  ;;  %2335 = vrot.lane.b32.xlu0 %v5726_v50, %s4867_s20  ;;  %v1508_v20 = vor.u32 %v1507_v63, %v1503_v53  ;;  %v6231_v19 = vld [vmem:[#allocation2 + $0xc0] sm:$0xf] }
 0x1c9   : > { %v2454_v62 = vpop.permute.xlu2 %2453  ;;  %1185 = vst [vmem:[#allocation2 + $0xc8] sm:$0x1] %v1184_v14  ;;  %v6229_v50 = vsel %vm5022_vm8, %v1499_v10, %v1503_v53  ;;  %v4151_v12 = vrot.slane %v6231_v19, 9 }
 0x1ca   : > { %v1970_v37 = vpop.permute.xlu0 %1969  ;;  %v1509_v46 = vrot.slane %v1508_v20, 4  ;;  %2283 = vst.msk [vmem:[#allocation3 + $0xc4] sm:$0xf] %vm278_vm1, %v6229_v50 }
 0x1cc   : > { %v4319_v18 = vld [vmem:[#allocation3 + $0x140] sm:$0xf]  ;;  %v6241_v45 = vsel %vm5022_vm8, %v1509_v46, %v1513_v21 }
 0x1cd   : > { %2337 = vrot.lane.b32.xlu1 %v5741_v16, %s4867_s20  ;;  %2284 = vst.msk [vmem:[#allocation3 + $0xd0] sm:$0xf] %vm278_vm1, %v6241_v45  ;;  %v6249_v60 = vld [vmem:[#allocation2 + $0xc4] sm:$0xf] }
 0x1ce   : > { %v4528_v58 = vld [vmem:[#allocation3 + $0x148] sm:$0xf0]  ;;  %v2302_v38 = vrot.slane %v6249_v60, 5 }
 0x1cf   : > { %2465 = vrot.lane.b32.xlu2 %v5755_v52, %s4868_s21  ;;  %v1678_v29 = vpop.permute.xlu1 %1677  ;;  %v4320_v4 = vor.u32 %v4528_v58, %v4319_v18  ;;  %v4203_v27 = vld [vmem:[#allocation3 + $0x60] sm:$0xf] }
 0x1d0   : > { %1765 = vst.msk [vmem:[#allocation3 + $0x6c] sm:$0xf] %vm1755_vm0, %v1678_v29  ;;  %1691 = vrot.lane.b32.xlu0 %v6108_v55, %s4867_s20  ;;  %v6254_v3 = vld [vmem:[#allocation2 + $0xc8] sm:$0x1]  ;;  %v6263_v53 = vsel %vm5028_vm11, %v4151_v12, %v2302_v38  ;;  %v2304_v54 = vrot.slane %v2302_v38, 4  ;;  %v1516_v38 = vshrl.u32 %v5834_v26, 16 }
 0x1d1   : > { %v2604_v6 = vpop.permute.xlu2 %2603  ;;  %2057 = vst.msk [vmem:[#allocation3 + $0x6c] sm:$0xf] %vm2047_vm2, %v1970_v37  ;;  %v2305_v55 = vrot.slane %v6254_v3, 5 }
 0x1d2   : > { %2188 = vst.msk [vmem:[#allocation3 + $0x6c] sm:$0xf] %vm2178_vm3, %v6147_v49  ;;  %v2452_v7 = vpop.permute.xlu0 %2451 }
 0x1d3   : > { %2540 = vst.msk [vmem:[#allocation3 + $0x58] sm:$0xf] %vm2047_vm2, %v2452_v7  ;;  %4430 = vmatmul.msk.bf16.gmra.mxu3 %vm3241_vm15, %v4320_v4  ;;  %v6273_v49 = vsel %vm5028_vm11, %v2304_v54, %v2305_v55  ;;  %v6297_v4 = vld [vmem:[#allocation2 + $0xd0] sm:$0xf]  ;;  %v1519_v55 = vshll.u32 %v5834_v26, 16  ;;  %v1525_v54 = vshll.u32 %v5861_v33, 16 }
 0x1d4   : > { %2692 = vst.msk [vmem:[#allocation3 + $0x58] sm:$0xf] %vm2178_vm3, %v2604_v6  ;;  %v6301_v6 = vld [vmem:[#allocation2 + $0xd4] sm:$0x1]  ;;  %v2720_v12 = vrot.slane %v6297_v4, 5 }
 0x1d5   : > { %2114 = vrot.lane.b32.xlu1 %v5755_v52, %s4869_s29  ;;  %2785 = vst.msk [vmem:[#allocation3 + $0x158] sm:$0xf] %vm278_vm1, %v6263_v53  ;;  %v2723_v7 = vrot.slane %v6301_v6, 5 }
 0x1d6   : > { %2786 = vst.msk [vmem:[#allocation3 + $0x164] sm:$0xf] %vm278_vm1, %v6273_v49 }
 0x1d7   : > { %2615 = vrot.lane.b32.xlu2 %v6166_v25, %s4869_s29  ;;  %v2602_v63 = vpop.permute.xlu1 %2601 }
 0x1d8   : > { %2691 = vst.msk [vmem:[#allocation3 + $0x4c] sm:$0xf] %vm2178_vm3, %v2602_v63  ;;  %1985 = vrot.lane.b32.xlu0 %v5741_v16, %s4868_s21  ;;  %v2722_v63 = vrot.slane %v2720_v12, 4 }
 0x1d9   : > { %v6280_v52 = vpop.permute.xlu2 %2104  ;;  %v4500_v14 = vld [vmem:[#allocation3 + $0x68] sm:$0xf0] }
 0x1da   : > { %v2324_v37 = vpop.permute.xlu0 %2323  ;;  %v4204_v10 = vor.u32 %v4500_v14, %v4203_v27  ;;  %v1529_v27 = vshrl.u32 %v5861_v33, 16 }
 0x1db   : > { %2411 = vst.msk [vmem:[#allocation3 + $0x64] sm:$0xf] %vm1755_vm0, %v2324_v37  ;;  %v4193_v21 = vld [vmem:[#allocation3 + $0x54] sm:$0xf0]  ;;  %v1518_v37 = vrot.slane %v1516_v38, 4 }
 0x1dc   : > { %2541 = vst.msk [vmem:[#allocation3 + $0x64] sm:$0xf] %vm2047_vm2, %v2454_v62  ;;  %3318 = vmatmul.bf16.gmra.mxu1 %v4204_v10  ;;  %v4331_v20 = vld [vmem:[#allocation3 + $0x158] sm:$0xf]  ;;  %v1521_v10 = vrot.slane %v1519_v55, 5 }
 0x1dd   : > { %1693 = vrot.lane.b32.xlu1 %v6166_v25, %s4867_s20  ;;  %v4531_v48 = vld [vmem:[#allocation3 + $0x160] sm:$0xf0]  ;;  %v6295_v25 = vld [vmem:[#allocation2 + $0xcc] sm:$0xf] }
 0x1de   : > { %v4332_v18 = vor.u32 %v4531_v48, %v4331_v20  ;;  %v1527_v20 = vrot.slane %v1525_v54, 5 }
 0x1df   : > { %2116 = vrot.lane.b32.xlu2 %v5782_v41, %s4869_s29  ;;  %v2326_v16 = vpop.permute.xlu1 %2325  ;;  %v4496_v46 = vld [vmem:[#allocation3 + $0x4c] sm:$0xf] }
 0x1e0   : > { %2412 = vst.msk [vmem:[#allocation3 + $0x70] sm:$0xf] %vm1755_vm0, %v2326_v16  ;;  %2467 = vrot.lane.b32.xlu0 %v5782_v41, %s4868_s21  ;;  %v4196_v62 = vor.u32 %v4496_v46, %v4193_v21  ;;  %v4152_v41 = vrot.slane %v6295_v25, 9  ;;  %v2724_v16 = vsel %vm5028_vm11, %v2722_v63, %v2723_v7  ;;  %v1531_v46 = vrot.slane %v1529_v27, 4  ;;  %v4553_v63 = vld [vmem:[%s6947_s3] sm:$0xff] }
 0x1e1   : > { %v6291_v58 = vpop.permute.xlu2 %1975  ;;  %2788 = vst.msk [vmem:[#allocation3 + $0x17c] sm:$0xf] %vm278_vm1, %v2724_v16  ;;  %v1522_v21 = vor.u32 %v1521_v10, %v1518_v37  ;;  %3744 = vmatpush.bf16.msrb.mxu3 %v4553_v63  ;;  %v3299_v37 = vpop.f32.mrf.mxu1 }
 0x1e2   : > { %v1680_v29 = vpop.permute.xlu0 %1679  ;;  %3402 = vmatmul.bf16.gmra.mxu2 %v4196_v62  ;;  %v1532_v62 = vor.u32 %v1531_v46, %v1527_v20 }
 0x1e3   : > { %1766 = vst.msk [vmem:[#allocation3 + $0x78] sm:$0xf] %vm1755_vm0, %v1680_v29  ;;  %4431 = vmatmul.msk.bf16.gmra.mxu3 %vm3241_vm15, %v4332_v18  ;;  %v1535_v29 = vshll.u32 %v5868_v34, 16 }
 0x1e4   : > { %2058 = vst.msk [vmem:[#allocation3 + $0x78] sm:$0xf] %vm2047_vm2, %v6181_v5  ;;  %v2721_v5 = vsel %vm5028_vm11, %v4152_v41, %v2720_v12  ;;  %v1523_v41 = vrot.slane %v1522_v21, 4  ;;  %v1533_v12 = vrot.slane %v1532_v62, 4 }
 0x1e5   : > { %2617 = vrot.lane.b32.xlu1 %v6229_v50, %s4869_s29  ;;  %2787 = vst.msk [vmem:[#allocation3 + $0x170] sm:$0xf] %vm278_vm1, %v2721_v5  ;;  %v1537_v38 = vrot.slane %v1535_v29, 5 }
 0x1e7   : > { %1987 = vrot.lane.b32.xlu2 %v5806_v43, %s4868_s21  ;;  %v2103_v14 = vpop.permute.xlu1 %2102  ;;  %v6339_v34 = vsel %vm5022_vm8, %v1533_v12, %v1537_v38 }
 0x1e8   : > { %2189 = vst.msk [vmem:[#allocation3 + $0x78] sm:$0xf] %vm2178_vm3, %v2103_v14  ;;  %2339 = vrot.lane.b32.xlu0 %v5806_v43, %s4867_s20  ;;  %v6328_v43 = vsel %vm5022_vm8, %v1523_v41, %v1527_v20  ;;  %v4534_v5 = vld [vmem:[#allocation3 + $0x178] sm:$0xf0] }
 0x1e9   : > { %v2458_v48 = vpop.permute.xlu2 %2457  ;;  %2285 = vst.msk [vmem:[#allocation3 + $0xdc] sm:$0xf] %vm278_vm1, %v6328_v43  ;;  %v3301_v38 = vpop.f32.mrf.mxu1 }
 0x1ea   : > { %v1974_v18 = vpop.permute.xlu0 %1973  ;;  %2286 = vst.msk [vmem:[#allocation3 + $0xe8] sm:$0xf] %vm278_vm1, %v6339_v34 }
 0x1ec   : > { %v4343_v7 = vld [vmem:[#allocation3 + $0x170] sm:$0xf] }
 0x1ed   : > { %2341 = vrot.lane.b32.xlu1 %v5818_v24, %s4867_s20  ;;  %v4344_v27 = vor.u32 %v4534_v5, %v4343_v7 }
 0x1ef   : > { %2469 = vrot.lane.b32.xlu2 %v5834_v26, %s4868_s21  ;;  %v1682_v55 = vpop.permute.xlu1 %1681  ;;  %v4215_v10 = vld [vmem:[#allocation3 + $0x78] sm:$0xf] }
 0x1f0   : > { %1767 = vst.msk [vmem:[#allocation3 + $0x84] sm:$0xf] %vm1755_vm0, %v1682_v55  ;;  %1695 = vrot.lane.b32.xlu0 %v6229_v50, %s4867_s20 }
 0x1f1   : > { %v2608_v54 = vpop.permute.xlu2 %2607  ;;  %2059 = vst.msk [vmem:[#allocation3 + $0x84] sm:$0xf] %vm2047_vm2, %v1974_v18 }
 0x1f2   : > { %2190 = vst.msk [vmem:[#allocation3 + $0x84] sm:$0xf] %vm2178_vm3, %v6280_v52  ;;  %v2456_v14 = vpop.permute.xlu0 %2455 }
 0x1f3   : > { %2542 = vst.msk [vmem:[#allocation3 + $0x70] sm:$0xf] %vm2047_vm2, %v2456_v14  ;;  %4432 = vmatmul.msk.bf16.gmra.mxu3 %vm3241_vm15, %v4344_v27 }
 0x1f4   : > { %2694 = vst.msk [vmem:[#allocation3 + $0x70] sm:$0xf] %vm2178_vm3, %v2608_v54 }
 0x1f5   : > { %2118 = vrot.lane.b32.xlu1 %v5834_v26, %s4869_s29  ;;  %v6369_v26 = vld [vmem:[%s6949_s5] ss:$0 sm:$0xff] }
 0x1f6   : > { %v3300_v12 = vadd.f32 %v6369_v26, %v3299_v37  ;;  %v3302_v7 = vadd.f32 %v6369_v26, %v3301_v38  ;;  %v1601_v37 = vshrl.u32 %v6038_v42, 16 }
 0x1f7   : > { %2619 = vrot.lane.b32.xlu2 %v6241_v45, %s4869_s29  ;;  %v2606_v50 = vpop.permute.xlu1 %2605 }
 0x1f8   : > { %2693 = vst.msk [vmem:[#allocation3 + $0x64] sm:$0xf] %vm2178_vm3, %v2606_v50  ;;  %1989 = vrot.lane.b32.xlu0 %v5818_v24, %s4868_s21  ;;  %v3477_v24 = vpop.f32.mrf.mxu0  ;;  %v1597_v50 = vshll.u32 %v6038_v42, 16 }
 0x1f9   : > { %v6362_v52 = vpop.permute.xlu2 %2108  ;;  %v4503_v20 = vld [vmem:[#allocation3 + $0x80] sm:$0xf0] }
 0x1fa   : > { %v2328_v16 = vpop.permute.xlu0 %2327  ;;  %v4216_v46 = vor.u32 %v4503_v20, %v4215_v10  ;;  %v1607_v10 = vshll.u32 %v6049_v15, 16  ;;  %v1588_v20 = vshrl.u32 %v6024_v1, 16 }
 0x1fb   : > { %2413 = vst.msk [vmem:[#allocation3 + $0x7c] sm:$0xf] %vm1755_vm0, %v2328_v16  ;;  %v4205_v29 = vld [vmem:[#allocation3 + $0x6c] sm:$0xf0] }
 0x1fc   : > { %2543 = vst.msk [vmem:[#allocation3 + $0x7c] sm:$0xf] %vm2047_vm2, %v2458_v48  ;;  %3323 = vmatmul.bf16.gmra.mxu1 %v4216_v46 }
 0x1fd   : > { %1697 = vrot.lane.b32.xlu1 %v6241_v45, %s4867_s20 }
 0x1fe   : > { %v3388_v21 = vpop.f32.mrf.mxu2 }
 0x1ff   : > { %2120 = vrot.lane.b32.xlu2 %v5861_v33, %s4869_s29  ;;  %v2330_v18 = vpop.permute.xlu1 %2329  ;;  %v4499_v62 = vld [vmem:[#allocation3 + $0x64] sm:$0xf]  ;;  %v3389_v39 = vadd.f32 %v3388_v21, %v3300_v12  ;;  %v1599_v21 = vrot.slane %v1597_v50, 5  ;;  %v1609_v12 = vrot.slane %v1607_v10, 5 }
 0x200   : > { %2414 = vst.msk [vmem:[#allocation3 + $0x88] sm:$0xf] %vm1755_vm0, %v2330_v18  ;;  %2471 = vrot.lane.b32.xlu0 %v5861_v33, %s4868_s21  ;;  %v4208_v41 = vor.u32 %v4499_v62, %v4205_v29  ;;  %v3479_v63 = vpop.f32.mrf.mxu0  ;;  %v1603_v18 = vrot.slane %v1601_v37, 4  ;;  %v1590_v62 = vrot.slane %v1588_v20, 4 }
 0x201   : > { %v6378_v48 = vpop.permute.xlu2 %1979  ;;  %v3478_v55 = vadd.f32 %v3477_v24, %v3389_v39  ;;  %v1591_v24 = vshll.u32 %v6024_v1, 16 }
 0x202   : > { %v1684_v45 = vpop.permute.xlu0 %1683  ;;  %3407 = vmatmul.bf16.gmra.mxu2 %v4208_v41  ;;  %v1604_v41 = vor.u32 %v1603_v18, %v1599_v21 }
 0x203   : > { %1768 = vst.msk [vmem:[#allocation3 + $0x90] sm:$0xf] %vm1755_vm0, %v1684_v45  ;;  %v3557_v16 = vmax.f32 %v3478_v55, 0.0 }
 0x204   : > { %2060 = vst.msk [vmem:[#allocation3 + $0x90] sm:$0xf] %vm2047_vm2, %v6291_v58  ;;  %v1605_v39 = vrot.slane %v1604_v41, 4  ;;  %v1631_v41 = vshll.u32 %v6126_v0, 16 }
 0x205   : > { %2621 = vrot.lane.b32.xlu1 %v6328_v43, %s4869_s29 }
 0x206   : > { %v3390_v33 = vpop.f32.mrf.mxu2  ;;  %v6410_v55 = vsel %vm5022_vm8, %v1605_v39, %v1609_v12  ;;  %v1612_v12 = vshrl.u32 %v6089_v8, 16 }
 0x207   : > { %1991 = vrot.lane.b32.xlu2 %v5875_v51, %s4868_s21  ;;  %v3391_v54 = vadd.f32 %v3390_v33, %v3302_v7  ;;  %v2107_v5 = vpop.permute.xlu1 %2106  ;;  %2292 = vst.msk [vmem:[#allocation3 + $0x130] sm:$0xf] %vm278_vm1, %v6410_v55 }
 0x208   : > { %2191 = vst.msk [vmem:[#allocation3 + $0x90] sm:$0xf] %vm2178_vm3, %v2107_v5  ;;  %2343 = vrot.lane.b32.xlu0 %v5875_v51, %s4867_s20  ;;  %v1593_v51 = vrot.slane %v1591_v24, 5 }
 0x209   : > { %v2462_v27 = vpop.permute.xlu2 %2461  ;;  %v3480_v58 = vadd.f32 %v3479_v63, %v3391_v54 }
 0x20a   : > { %v1978_v14 = vpop.permute.xlu0 %1977  ;;  %v1594_v38 = vor.u32 %v1593_v51, %v1590_v62  ;;  %v1625_v51 = vshrl.u32 %v6119_v36, 16 }
 0x20b   : > { %v3558_v46 = vmax.f32 %v3480_v58, 0.0 }
 0x20c   : > { %v1595_v7 = vrot.slane %v1594_v38, 4 }
 0x20d   : > { %v3589_v29 = vpack.c.bf16 %v3558_v46, %v3557_v16  ;;  %2345 = vrot.lane.b32.xlu1 %v5886_v61, %s4867_s20 }
 0x20e   : > { %v6415_v54 = vsel %vm5022_vm8, %v1595_v7, %v1599_v21  ;;  %v1627_v7 = vrot.slane %v1625_v51, 4 }
 0x20f   : > { %2623 = vrot.lane.b32.xlu2 %v6339_v34, %s4869_s29  ;;  %v1686_v15 = vpop.permute.xlu1 %1685  ;;  %4441 = vmatmul.msk.bf16.vlgmr.msrb.gmra.mxu3 %vm3241_vm15, %v3589_v29  ;;  %2291 = vst.msk [vmem:[#allocation3 + $0x124] sm:$0xf] %vm278_vm1, %v6415_v54  ;;  %v4227_v5 = vld [vmem:[#allocation3 + $0x90] sm:$0xf]  ;;  %v1621_v29 = vshll.u32 %v6119_v36, 16 }
 0x210   : > { %1769 = vst.msk [vmem:[#allocation3 + $0x9c] sm:$0xf] %vm1755_vm0, %v1686_v15  ;;  %1699 = vrot.lane.b32.xlu0 %v6328_v43, %s4867_s20  ;;  %v1615_v15 = vshll.u32 %v6089_v8, 16 }
 0x211   : > { %v2612_v45 = vpop.permute.xlu2 %2611  ;;  %2061 = vst.msk [vmem:[#allocation3 + $0x9c] sm:$0xf] %vm2047_vm2, %v1978_v14  ;;  %v1623_v39 = vrot.slane %v1621_v29, 5 }
 0x212   : > { %2192 = vst.msk [vmem:[#allocation3 + $0x9c] sm:$0xf] %vm2178_vm3, %v6362_v52  ;;  %v2460_v33 = vpop.permute.xlu0 %2459 }
 0x213   : > { %2544 = vst.msk [vmem:[#allocation3 + $0x88] sm:$0xf] %vm2047_vm2, %v2460_v33  ;;  %v1628_v0 = vor.u32 %v1627_v7, %v1623_v39 }
 0x214   : > { %2696 = vst.msk [vmem:[#allocation3 + $0x88] sm:$0xf] %vm2178_vm3, %v2612_v45 }
 0x215   : > { %1701 = vrot.lane.b32.xlu1 %v6339_v34, %s4867_s20 }
 0x217   : > { %2124 = vrot.lane.b32.xlu2 %v5150_v56, %s4869_s29  ;;  %v2610_v43 = vpop.permute.xlu1 %2609  ;;  %v3304_v56 = vpop.f32.mrf.mxu1 }
 0x218   : > { %2695 = vst.msk [vmem:[#allocation3 + $0x7c] sm:$0xf] %vm2178_vm3, %v2610_v43  ;;  %1993 = vrot.lane.b32.xlu0 %v5886_v61, %s4868_s21  ;;  %v3305_v24 = vadd.f32 %v6369_v26, %v3304_v56  ;;  %v1614_v43 = vrot.slane %v1612_v12, 4 }
 0x219   : > { %v6429_v52 = vpop.permute.xlu2 %2112  ;;  %v4506_v63 = vld [vmem:[#allocation3 + $0x98] sm:$0xf0] }
 0x21a   : > { %v2332_v34 = vpop.permute.xlu0 %2331  ;;  %v4228_v58 = vor.u32 %v4506_v63, %v4227_v5  ;;  %v1617_v5 = vrot.slane %v1615_v15, 5  ;;  %v6979_v15 = vld [vmem:[#allocation7_spill] sm:$0xff] }
 0x21b   : > { %2415 = vst.msk [vmem:[#allocation3 + $0x94] sm:$0xf] %vm1755_vm0, %v2332_v34  ;;  %v4217_v50 = vld [vmem:[#allocation3 + $0x84] sm:$0xf0] }
 0x21c   : > { %2545 = vst.msk [vmem:[#allocation3 + $0x94] sm:$0xf] %vm2047_vm2, %v2462_v27  ;;  %3328 = vmatmul.bf16.gmra.mxu1 %v4228_v58  ;;  %v6442_v27 = vpop.f32.mrf.mxu3  ;;  %v1633_v58 = vrot.slane %v1631_v41, 5 }
 0x21d   : > { %2122 = vrot.lane.b32.xlu1 %v5105_v11, %s4869_s29  ;;  %v3482_v11 = vpop.f32.mrf.mxu0 }
 0x21f   : > { %2481 = vrot.lane.b32.xlu2 %v6024_v1, %s4868_s21  ;;  %v2334_v14 = vpop.permute.xlu1 %2333  ;;  %v4502_v61 = vld [vmem:[#allocation3 + $0x7c] sm:$0xf]  ;;  %v3306_v18 = vpop.f32.mrf.mxu1 }
 0x220   : > { %2416 = vst.msk [vmem:[#allocation3 + $0xa0] sm:$0xf] %vm1755_vm0, %v2334_v14  ;;  %2351 = vrot.lane.b32.xlu0 %v5277_v40, %s4867_s20  ;;  %v4220_v10 = vor.u32 %v4502_v61, %v4217_v50  ;;  %v3307_v45 = vadd.f32 %v6369_v26, %v3306_v18  ;;  %v1618_v61 = vor.u32 %v1617_v5, %v1614_v43 }
 0x221   : > { %v6440_v37 = vpop.permute.xlu2 %1983 }
 0x222   : > { %v1688_v20 = vpop.permute.xlu0 %1687  ;;  %3412 = vmatmul.bf16.gmra.mxu2 %v4220_v10 }
 0x223   : > { %1770 = vst.msk [vmem:[#allocation3 + $0xa8] sm:$0xf] %vm1755_vm0, %v1688_v20  ;;  %v1629_v20 = vrot.slane %v1628_v0, 4 }
 0x224   : > { %2062 = vst.msk [vmem:[#allocation3 + $0xa8] sm:$0xf] %vm2047_vm2, %v6378_v48  ;;  %v6460_v38 = vpop.f32.mrf.mxu3 }
 0x225   : > { %2353 = vrot.lane.b32.xlu1 %v5291_v47, %s4867_s20  ;;  %v3393_v16 = vpop.f32.mrf.mxu2  ;;  %v3484_v56 = vpop.f32.mrf.mxu0 }
 0x226   : > { %v3394_v62 = vadd.f32 %v3393_v16, %v3305_v24  ;;  %v6475_v24 = vsel %vm5022_vm8, %v1629_v20, %v1633_v58  ;;  %v1649_v20 = vshrl.u32 %v6184_v31, 16 }
 0x227   : > { %2635 = vrot.lane.b32.xlu2 %v6410_v55, %s4869_s29  ;;  %v2111_v46 = vpop.permute.xlu1 %2110  ;;  %2294 = vst.msk [vmem:[#allocation3 + $0x148] sm:$0xf] %vm278_vm1, %v6475_v24 }
 0x228   : > { %2193 = vst.msk [vmem:[#allocation3 + $0xa8] sm:$0xf] %vm2178_vm3, %v2111_v46  ;;  %2483 = vrot.lane.b32.xlu0 %v6038_v42, %s4868_s21  ;;  %v3483_v63 = vadd.f32 %v3482_v11, %v3394_v62  ;;  %v1619_v11 = vrot.slane %v1618_v61, 4 }
 0x229   : > { %v2466_v21 = vpop.permute.xlu2 %2465 }
 0x22a   : > { %v1982_v48 = vpop.permute.xlu0 %1981  ;;  %v3559_v16 = vmax.f32 %v3483_v63, 0.0 }
 0x22d   : > { %2633 = vrot.lane.b32.xlu1 %v6415_v54, %s4869_s29  ;;  %v3395_v33 = vpop.f32.mrf.mxu2  ;;  %v3487_v63 = vpop.f32.mrf.mxu0 }
 0x22e   : > { %v3396_v34 = vadd.f32 %v3395_v33, %v3307_v45  ;;  %v3309_v45 = vpop.f32.mrf.mxu1 }
 0x22f   : > { %1995 = vrot.lane.b32.xlu2 %v5165_v17, %s4868_s21  ;;  %v1690_v14 = vpop.permute.xlu1 %1689 }
 0x230   : > { %v3485_v50 = vadd.f32 %v3484_v56, %v3396_v34  ;;  %1771 = vst.msk [vmem:[#allocation3 + $0xb4] sm:$0xf] %vm1755_vm0, %v1690_v14  ;;  %1703 = vrot.lane.b32.xlu0 %v5173_v23, %s4867_s20  ;;  %v6480_v23 = vsel %vm5022_vm8, %v1619_v11, %v1623_v39  ;;  %v3310_v56 = vadd.f32 %v6369_v26, %v3309_v45  ;;  %v1655_v11 = vshll.u32 %v6190_v57, 16 }
 0x231   : > { %v2616_v10 = vpop.permute.xlu2 %2615  ;;  %2063 = vst.msk [vmem:[#allocation3 + $0xb4] sm:$0xf] %vm2047_vm2, %v1982_v48  ;;  %v6978_v48 = vld [vmem:[#allocation8_spill] sm:$0xff] }
 0x232   : > { %v3560_v46 = vmax.f32 %v3485_v50, 0.0  ;;  %2194 = vst.msk [vmem:[#allocation3 + $0xb4] sm:$0xf] %vm2178_vm3, %v6429_v52  ;;  %v2464_v17 = vpop.permute.xlu0 %2463  ;;  %v6483_v62 = vpop.f32.mrf.mxu3  ;;  %v1657_v45 = vrot.slane %v1655_v11, 5 }
 0x233   : > { %2546 = vst.msk [vmem:[#allocation3 + $0xa0] sm:$0xf] %vm2047_vm2, %v2464_v17 }
 0x234   : > { %2698 = vst.msk [vmem:[#allocation3 + $0xa0] sm:$0xf] %vm2178_vm3, %v2616_v10  ;;  %v3590_v18 = vpack.c.bf16 %v3560_v46, %v3559_v16  ;;  %v1645_v10 = vshll.u32 %v6184_v31, 16  ;;  %v1636_v16 = vshrl.u32 %v6160_v28, 16  ;;  %v1639_v46 = vshll.u32 %v6160_v28, 16 }
 0x235   : > { %1705 = vrot.lane.b32.xlu1 %v5272_v32, %s4867_s20  ;;  %2293 = vst.msk [vmem:[#allocation3 + $0x13c] sm:$0xf] %vm278_vm1, %v6480_v23  ;;  %v4239_v32 = vld [vmem:[#allocation3 + $0xa8] sm:$0xf] }
 0x236   : > { %4442 = vmatmul.msk.bf16.gmra.mxu3 %vm3241_vm15, %v3590_v18  ;;  %v1647_v18 = vrot.slane %v1645_v10, 5 }
 0x237   : > { %2128 = vrot.lane.b32.xlu2 %v5246_v13, %s4869_s29  ;;  %v2614_v52 = vpop.permute.xlu1 %2613 }
 0x238   : > { %2697 = vst.msk [vmem:[#allocation3 + $0x94] sm:$0xf] %vm2178_vm3, %v2614_v52  ;;  %1997 = vrot.lane.b32.xlu0 %v6978_v48, %s4868_s21  ;;  %v1651_v52 = vrot.slane %v1649_v20, 4  ;;  %v6981_v20 = vld [vmem:[#allocation10_spill] sm:$0xff] }
 0x239   : > { %v6497_v29 = vpop.permute.xlu2 %2116  ;;  %v4509_v51 = vld [vmem:[#allocation3 + $0xb0] sm:$0xf0] }
 0x23a   : > { %v2336_v41 = vpop.permute.xlu0 %2335  ;;  %v4240_v12 = vor.u32 %v4509_v51, %v4239_v32  ;;  %v6501_v13 = vpop.f32.mrf.mxu3  ;;  %v1638_v32 = vrot.slane %v1636_v16, 4  ;;  %v1641_v51 = vrot.slane %v1639_v46, 5 }
 0x23b   : > { %2417 = vst.msk [vmem:[#allocation3 + $0xac] sm:$0xf] %vm1755_vm0, %v2336_v41  ;;  %v4229_v33 = vld [vmem:[#allocation3 + $0x9c] sm:$0xf0] }
 0x23c   : > { %2547 = vst.msk [vmem:[#allocation3 + $0xac] sm:$0xf] %vm2047_vm2, %v2466_v21  ;;  %3333 = vmatmul.bf16.gmra.mxu1 %v4240_v12 }
 0x23d   : > { %2126 = vrot.lane.b32.xlu1 %v6979_v15, %s4869_s29  ;;  %v1652_v15 = vor.u32 %v1651_v52, %v1647_v18 }
 0x23f   : > { %2485 = vrot.lane.b32.xlu2 %v6089_v8, %s4868_s21  ;;  %v2338_v39 = vpop.permute.xlu1 %2337  ;;  %v4505_v7 = vld [vmem:[#allocation3 + $0x94] sm:$0xf] }
 0x240   : > { %2418 = vst.msk [vmem:[#allocation3 + $0xb8] sm:$0xf] %vm1755_vm0, %v2338_v39  ;;  %2355 = vrot.lane.b32.xlu0 %v6059_v59, %s4867_s20  ;;  %v4232_v21 = vor.u32 %v4505_v7, %v4229_v33  ;;  %v3489_v39 = vpop.f32.mrf.mxu0  ;;  %v1642_v33 = vor.u32 %v1641_v51, %v1638_v32 }
 0x241   : > { %v6510_v43 = vpop.permute.xlu2 %1987 }
 0x242   : > { %v1692_v5 = vpop.permute.xlu0 %1691  ;;  %3417 = vmatmul.bf16.gmra.mxu2 %v4232_v21 }
 0x243   : > { %1772 = vst.msk [vmem:[#allocation3 + $0xc0] sm:$0xf] %vm1755_vm0, %v1692_v5  ;;  %v6980_v5 = vld [vmem:[#allocation9_spill] sm:$0xff] }
 0x244   : > { %2064 = vst.msk [vmem:[#allocation3 + $0xc0] sm:$0xf] %vm2047_vm2, %v6440_v37  ;;  %v3311_v37 = vpop.f32.mrf.mxu1 }
 0x245   : > { %2357 = vrot.lane.b32.xlu1 %v6078_v30, %s4867_s20  ;;  %v3398_v34 = vpop.f32.mrf.mxu2  ;;  %v3312_v17 = vadd.f32 %v6369_v26, %v3311_v37 }
 0x246   : > { %v6519_v0 = vpop.f32.mrf.mxu3  ;;  %v3399_v61 = vadd.f32 %v3398_v34, %v3310_v56 }
 0x247   : > { %2639 = vrot.lane.b32.xlu2 %v6475_v24, %s4869_s29  ;;  %v2115_v58 = vpop.permute.xlu1 %2114 }
 0x248   : > { %2195 = vst.msk [vmem:[#allocation3 + $0xc0] sm:$0xf] %vm2178_vm3, %v2115_v58  ;;  %2487 = vrot.lane.b32.xlu0 %v6119_v36, %s4868_s21  ;;  %v3488_v41 = vadd.f32 %v3487_v63, %v3399_v61  ;;  %v1653_v58 = vrot.slane %v1652_v15, 4  ;;  %v1643_v63 = vrot.slane %v1642_v33, 4 }
 0x249   : > { %v2470_v14 = vpop.permute.xlu2 %2469 }
 0x24a   : > { %v1986_v50 = vpop.permute.xlu0 %1985  ;;  %v3561_v56 = vmax.f32 %v3488_v41, 0.0  ;;  %v6545_v61 = vsel %vm5022_vm8, %v1653_v58, %v1657_v45  ;;  %v6550_v10 = vsel %vm5022_vm8, %v1643_v63, %v1647_v18  ;;  %v2225_v58 = vshrl.u32 %v6249_v60, 16 }
 0x24b   : > { %2296 = vst.msk [vmem:[#allocation3 + $0x160] sm:$0xf] %vm278_vm1, %v6545_v61  ;;  %v2231_v63 = vshll.u32 %v6254_v3, 16 }
 0x24c   : > { %2295 = vst.msk [vmem:[#allocation3 + $0x154] sm:$0xf] %vm278_vm1, %v6550_v10 }
 0x24d   : > { %2637 = vrot.lane.b32.xlu1 %v6480_v23, %s4869_s29  ;;  %v3400_v48 = vpop.f32.mrf.mxu2 }
 0x24e   : > { %v3401_v12 = vadd.f32 %v3400_v48, %v3312_v17  ;;  %v6535_v57 = vpop.f32.mrf.mxu3 }
 0x24f   : > { %1999 = vrot.lane.b32.xlu2 %v5277_v40, %s4868_s21  ;;  %v1694_v7 = vpop.permute.xlu1 %1693  ;;  %v4251_v46 = vld [vmem:[#allocation3 + $0xc0] sm:$0xf] }
 0x250   : > { %v3490_v21 = vadd.f32 %v3489_v39, %v3401_v12  ;;  %1773 = vst.msk [vmem:[#allocation3 + $0xcc] sm:$0xf] %vm1755_vm0, %v1694_v7  ;;  %1707 = vrot.lane.b32.xlu0 %v6980_v5, %s4867_s20 }
 0x251   : > { %v2620_v34 = vpop.permute.xlu2 %2619  ;;  %2065 = vst.msk [vmem:[#allocation3 + $0xcc] sm:$0xf] %vm2047_vm2, %v1986_v50 }
 0x252   : > { %v3562_v40 = vmax.f32 %v3490_v21, 0.0  ;;  %2196 = vst.msk [vmem:[#allocation3 + $0xcc] sm:$0xf] %vm2178_vm3, %v6497_v29  ;;  %v2468_v37 = vpop.permute.xlu0 %2467 }
 0x253   : > { %2548 = vst.msk [vmem:[#allocation3 + $0xb8] sm:$0xf] %vm2047_vm2, %v2468_v37  ;;  %v2227_v37 = vrot.slane %v2225_v58, 4 }
 0x254   : > { %2700 = vst.msk [vmem:[#allocation3 + $0xb8] sm:$0xf] %vm2178_vm3, %v2620_v34  ;;  %v3591_v50 = vpack.c.bf16 %v3562_v40, %v3561_v56  ;;  %v2221_v34 = vshll.u32 %v6249_v60, 16 }
 0x255   : > { %1709 = vrot.lane.b32.xlu1 %v6981_v20, %s4867_s20 }
 0x256   : > { %4443 = vmatmul.msk.bf16.gmra.mxu3 %vm3241_vm15, %v3591_v50  ;;  %v6560_v29 = vpop.f32.mrf.mxu3  ;;  %v2223_v40 = vrot.slane %v2221_v34, 5  ;;  %v2212_v50 = vshrl.u32 %v6231_v19, 16 }
 0x257   : > { %2132 = vrot.lane.b32.xlu2 %v6038_v42, %s4869_s29  ;;  %v2618_v11 = vpop.permute.xlu1 %2617  ;;  %v3314_v42 = vpop.f32.mrf.mxu1 }
 0x258   : > { %2699 = vst.msk [vmem:[#allocation3 + $0xac] sm:$0xf] %vm2178_vm3, %v2618_v11  ;;  %2001 = vrot.lane.b32.xlu0 %v5291_v47, %s4868_s21  ;;  %v3315_v45 = vadd.f32 %v6369_v26, %v3314_v42  ;;  %v2214_v3 = vrot.slane %v2212_v50, 4 }
 0x259   : > { %v6567_v16 = vpop.permute.xlu2 %2120  ;;  %v4512_v17 = vld [vmem:[#allocation3 + $0xc8] sm:$0xf0] }
 0x25a   : > { %v2340_v18 = vpop.permute.xlu0 %2339  ;;  %v4252_v52 = vor.u32 %v4512_v17, %v4251_v46  ;;  %v2215_v46 = vshll.u32 %v6231_v19, 16 }
 0x25b   : > { %2419 = vst.msk [vmem:[#allocation3 + $0xc4] sm:$0xf] %vm1755_vm0, %v2340_v18  ;;  %v4241_v32 = vld [vmem:[#allocation3 + $0xb4] sm:$0xf0]  ;;  %v2228_v18 = vor.u32 %v2227_v37, %v2223_v40 }
 0x25c   : > { %2549 = vst.msk [vmem:[#allocation3 + $0xc4] sm:$0xf] %vm2047_vm2, %v2470_v14  ;;  %3338 = vmatmul.bf16.gmra.mxu1 %v4252_v52  ;;  %v2233_v52 = vrot.slane %v2231_v63, 5 }
 0x25d   : > { %2130 = vrot.lane.b32.xlu1 %v6024_v1, %s4869_s29  ;;  %v3492_v1 = vpop.f32.mrf.mxu0 }
 0x25e   : > { %v6580_v14 = vpop.f32.mrf.mxu3 }
 0x25f   : > { %2489 = vrot.lane.b32.xlu2 %v6160_v28, %s4868_s21  ;;  %v2342_v48 = vpop.permute.xlu1 %2341  ;;  %v4508_v47 = vld [vmem:[#allocation3 + $0xac] sm:$0xf]  ;;  %v3316_v33 = vpop.f32.mrf.mxu1 }
 0x260   : > { %2420 = vst.msk [vmem:[#allocation3 + $0xd0] sm:$0xf] %vm1755_vm0, %v2342_v48  ;;  %2359 = vrot.lane.b32.xlu0 %v6140_v2, %s4867_s20  ;;  %v4244_v41 = vor.u32 %v4508_v47, %v4241_v32  ;;  %v3317_v56 = vadd.f32 %v6369_v26, %v3316_v33  ;;  %v2217_v47 = vrot.slane %v2215_v46, 5 }
 0x261   : > { %v6578_v51 = vpop.permute.xlu2 %1991 }
 0x262   : > { %v1696_v12 = vpop.permute.xlu0 %1695  ;;  %3422 = vmatmul.bf16.gmra.mxu2 %v4244_v41 }
 0x263   : > { %1774 = vst.msk [vmem:[#allocation3 + $0xd8] sm:$0xf] %vm1755_vm0, %v1696_v12  ;;  %v2229_v12 = vrot.slane %v2228_v18, 4 }
 0x264   : > { %2066 = vst.msk [vmem:[#allocation3 + $0xd8] sm:$0xf] %vm2047_vm2, %v6510_v43 }
 0x265   : > { %2361 = vrot.lane.b32.xlu1 %v6151_v44, %s4867_s20  ;;  %v3403_v15 = vpop.f32.mrf.mxu2  ;;  %v3494_v42 = vpop.f32.mrf.mxu0 }
 0x266   : > { %v3404_v21 = vadd.f32 %v3403_v15, %v3315_v45  ;;  %v6593_v5 = vpop.f32.mrf.mxu3 }
 0x267   : > { %2643 = vrot.lane.b32.xlu2 %v6545_v61, %s4869_s29  ;;  %v2119_v39 = vpop.permute.xlu1 %2118 }
 0x268   : > { %2197 = vst.msk [vmem:[#allocation3 + $0xd8] sm:$0xf] %vm2178_vm3, %v2119_v39  ;;  %2491 = vrot.lane.b32.xlu0 %v6184_v31, %s4868_s21  ;;  %v3493_v20 = vadd.f32 %v3492_v1, %v3404_v21  ;;  %v2218_v1 = vor.u32 %v2217_v47, %v2214_v3  ;;  %v2234_v39 = vsel %vm5022_vm8, %v2229_v12, %v2233_v52 }
 0x269   : > { %v2624_v7 = vpop.permute.xlu2 %2623  ;;  %2298 = vst.msk [vmem:[#allocation3 + $0x178] sm:$0xf] %vm278_vm1, %v2234_v39 }
 0x26a   : > { %v1990_v43 = vpop.permute.xlu0 %1989  ;;  %v3563_v15 = vmax.f32 %v3493_v20, 0.0  ;;  %v2219_v33 = vrot.slane %v2218_v1, 4 }
 0x26d   : > { %2641 = vrot.lane.b32.xlu1 %v6550_v10, %s4869_s29  ;;  %v3405_v11 = vpop.f32.mrf.mxu2  ;;  %v3497_v18 = vpop.f32.mrf.mxu0 }
 0x26e   : > { %v3406_v17 = vadd.f32 %v3405_v11, %v3317_v56  ;;  %v6617_v21 = vpop.f32.mrf.mxu3  ;;  %v6982_v56 = vld [vmem:[#allocation11_spill] sm:$0xff] }
 0x26f   : > { %2003 = vrot.lane.b32.xlu2 %v6059_v59, %s4868_s21  ;;  %v1698_v48 = vpop.permute.xlu1 %1697 }
 0x270   : > { %v3495_v32 = vadd.f32 %v3494_v42, %v3406_v17  ;;  %1775 = vst.msk [vmem:[#allocation3 + $0xe4] sm:$0xf] %vm1755_vm0, %v1698_v48  ;;  %1711 = vrot.lane.b32.xlu0 %v6415_v54, %s4867_s20  ;;  %v6984_v17 = vld [vmem:[#allocation13_spill] sm:$0xff] }
 0x271   : > { %v6608_v41 = vpop.permute.xlu2 %2124  ;;  %2067 = vst.msk [vmem:[#allocation3 + $0xe4] sm:$0xf] %vm2047_vm2, %v1990_v43 }
 0x272   : > { %v3564_v59 = vmax.f32 %v3495_v32, 0.0  ;;  %2198 = vst.msk [vmem:[#allocation3 + $0xe4] sm:$0xf] %vm2178_vm3, %v6567_v16  ;;  %v2472_v45 = vpop.permute.xlu0 %2471  ;;  %v2224_v16 = vsel %vm5022_vm8, %v2219_v33, %v2223_v40  ;;  %v3319_v40 = vpop.f32.mrf.mxu1 }
 0x273   : > { %2550 = vst.msk [vmem:[#allocation3 + $0xd0] sm:$0xf] %vm2047_vm2, %v2472_v45  ;;  %v3320_v42 = vadd.f32 %v6369_v26, %v3319_v40 }
 0x274   : > { %2702 = vst.msk [vmem:[#allocation3 + $0xd0] sm:$0xf] %vm2178_vm3, %v2624_v7  ;;  %v3592_v54 = vpack.c.bf16 %v3564_v59, %v3563_v15 }
 0x275   : > { %1713 = vrot.lane.b32.xlu1 %v6410_v55, %s4867_s20  ;;  %2297 = vst.msk [vmem:[#allocation3 + $0x16c] sm:$0xf] %vm278_vm1, %v2224_v16  ;;  %v4263_v55 = vld [vmem:[#allocation3 + $0xd8] sm:$0xf] }
 0x276   : > { %4444 = vmatmul.msk.bf16.gmra.mxu3 %vm3241_vm15, %v3592_v54 }
 0x277   : > { %2136 = vrot.lane.b32.xlu2 %v6119_v36, %s4869_s29  ;;  %v2622_v43 = vpop.permute.xlu1 %2621  ;;  %v6983_v36 = vld [vmem:[#allocation14_spill] sm:$0xff] }
 0x278   : > { %2701 = vst.msk [vmem:[#allocation3 + $0xc4] sm:$0xf] %vm2178_vm3, %v2622_v43  ;;  %2005 = vrot.lane.b32.xlu0 %v6078_v30, %s4868_s21  ;;  %v6642_v30 = vpop.f32.mrf.mxu3 }
 0x279   : > { %v6631_v7 = vpop.permute.xlu2 %2481  ;;  %v4515_v34 = vld [vmem:[#allocation3 + $0xe0] sm:$0xf0] }
 0x27a   : > { %v2344_v58 = vpop.permute.xlu0 %2343  ;;  %v4264_v63 = vor.u32 %v4515_v34, %v4263_v55 }
 0x27b   : > { %2421 = vst.msk [vmem:[#allocation3 + $0xdc] sm:$0xf] %vm1755_vm0, %v2344_v58  ;;  %v4253_v20 = vld [vmem:[#allocation3 + $0xcc] sm:$0xf0] }
 0x27c   : > { %2551 = vst.msk [vmem:[#allocation3 + $0xdc] sm:$0xf] %vm2047_vm2, %v6982_v56  ;;  %3343 = vmatmul.bf16.gmra.mxu1 %v4264_v63  ;;  %v2575_v56 = vshll.u32 %v6297_v4, 16 }
 0x27d   : > { %2703 = vst.msk [vmem:[#allocation3 + $0xdc] sm:$0xf] %vm2178_vm3, %v6983_v36  ;;  %2134 = vrot.lane.b32.xlu1 %v6089_v8, %s4869_s29  ;;  %v6985_v8 = vld [vmem:[#allocation12_spill] sm:$0xff]  ;;  %v2579_v36 = vshrl.u32 %v6297_v4, 16 }
 0x27f   : > { %2493 = vrot.lane.b32.xlu2 %v6231_v19, %s4868_s21  ;;  %v2346_v37 = vpop.permute.xlu1 %2345  ;;  %v4511_v50 = vld [vmem:[#allocation3 + $0xc4] sm:$0xf] }
 0x280   : > { %2422 = vst.msk [vmem:[#allocation3 + $0xe8] sm:$0xf] %vm1755_vm0, %v2346_v37  ;;  %2363 = vrot.lane.b32.xlu0 %v6198_v22, %s4867_s20  ;;  %v4256_v46 = vor.u32 %v4511_v50, %v4253_v20  ;;  %v6663_v48 = vpop.f32.mrf.mxu3 }
 0x281   : > { %v6647_v11 = vpop.permute.xlu2 %2635  ;;  %2552 = vst.msk [vmem:[#allocation3 + $0xe8] sm:$0xf] %vm2047_vm2, %v6984_v17  ;;  %v6696_v17 = vrot.slane %v2575_v56, 5 }
 0x282   : > { %2704 = vst.msk [vmem:[#allocation3 + $0xe8] sm:$0xf] %vm2178_vm3, %v6985_v8  ;;  %v1700_v19 = vpop.permute.xlu0 %1699  ;;  %3427 = vmatmul.bf16.gmra.mxu2 %v4256_v46 }
 0x283   : > { %1776 = vst.msk [vmem:[#allocation3 + $0xf0] sm:$0xf] %vm1755_vm0, %v1700_v19 }
 0x284   : > { %2068 = vst.msk [vmem:[#allocation3 + $0xf0] sm:$0xf] %vm2047_vm2, %v6578_v51  ;;  %v3321_v51 = vpop.f32.mrf.mxu1  ;;  %v4514_v54 = vld [vmem:[#allocation3 + $0xdc] sm:$0xf] }
 0x285   : > { %2365 = vrot.lane.b32.xlu1 %v6211_v9, %s4867_s20  ;;  %v3408_v52 = vpop.f32.mrf.mxu2  ;;  %v3322_v1 = vadd.f32 %v6369_v26, %v3321_v51 }
 0x286   : > { %v3409_v32 = vadd.f32 %v3408_v52, %v3320_v42  ;;  %v2566_v52 = vshrl.u32 %v6295_v25, 16 }
 0x287   : > { %2647 = vrot.lane.b32.xlu2 %v2234_v39, %s4869_s29  ;;  %v1702_v3 = vpop.permute.xlu1 %1701  ;;  %v3499_v39 = vpop.f32.mrf.mxu0 }
 0x288   : > { %1777 = vst.msk [vmem:[#allocation3 + $0xfc] sm:$0xf] %vm1755_vm0, %v1702_v3  ;;  %2495 = vrot.lane.b32.xlu0 %v6249_v60, %s4868_s21  ;;  %v3498_v45 = vadd.f32 %v3497_v18, %v3409_v32  ;;  %v2569_v3 = vshll.u32 %v6295_v25, 16  ;;  %v2585_v32 = vshll.u32 %v6301_v6, 16  ;;  %v4277_v6 = vld [vmem:[#allocation3 + $0xfc] sm:$0xf0] }
 0x289   : > { %v6665_v47 = vpop.permute.xlu2 %1995  ;;  %v4265_v59 = vld [vmem:[#allocation3 + $0xe4] sm:$0xf0] }
 0x28a   : > { %v1994_v12 = vpop.permute.xlu0 %1993  ;;  %v3565_v55 = vmax.f32 %v3498_v45, 0.0 }
 0x28b   : > { %2069 = vst.msk [vmem:[#allocation3 + $0xfc] sm:$0xf] %vm2047_vm2, %v1994_v12 }
 0x28c   : > { %2200 = vst.msk [vmem:[#allocation3 + $0xfc] sm:$0xf] %vm2178_vm3, %v6608_v41  ;;  %v3324_v45 = vpop.f32.mrf.mxu1 }
 0x28d   : > { %2645 = vrot.lane.b32.xlu1 %v2224_v16, %s4869_s29  ;;  %v3410_v15 = vpop.f32.mrf.mxu2  ;;  %v4268_v16 = vor.u32 %v4514_v54, %v4265_v59  ;;  %v2571_v59 = vrot.slane %v2569_v3, 5 }
 0x28e   : > { %v3411_v60 = vadd.f32 %v3410_v15, %v3322_v1  ;;  %v4517_v1 = vld [vmem:[#allocation3 + $0xf4] sm:$0xf]  ;;  %v2568_v15 = vrot.slane %v2566_v52, 4 }
 0x28f   : > { %2007 = vrot.lane.b32.xlu2 %v6140_v2, %s4868_s21  ;;  %v2123_v33 = vpop.permute.xlu1 %2122  ;;  %v6683_v2 = vld [vmem:[%s6950_s6] ss:$0 sm:$0xff] }
 0x290   : > { %v3500_v43 = vadd.f32 %v3499_v39, %v3411_v60  ;;  %2199 = vst.msk [vmem:[#allocation3 + $0xf0] sm:$0xf] %vm2178_vm3, %v2123_v33  ;;  %1715 = vrot.lane.b32.xlu0 %v6480_v23, %s4867_s20  ;;  %v4557_v23 = vld [vmem:[%s4988_s19] sm:$0xff]  }
 0x291   : > { %v6677_v41 = vpop.permute.xlu2 %2128  ;;  %v4558_v37 = vunpack.c.l.bf16 %v4557_v23  ;;  %v4559_v19 = vunpack.c.h.bf16 %v4557_v23  ;;  %v4797_v23 = vld [vmem:[#allocation2 + $0xd0] sm:$0xf] }
 0x292   : > { %v3566_v34 = vmax.f32 %v3500_v43, 0.0  ;;  %v2352_v58 = vpop.permute.xlu0 %2351  ;;  %3432 = vmatmul.bf16.gmra.mxu2 %v4268_v16  ;;  %v3746_v63 = vpop.f32.mrf.mxu3  ;;  %v2587_v43 = vrot.slane %v2585_v32, 5 }
 0x293   : > { %2425 = vst.msk [vmem:[#allocation3 + $0x10c] sm:$0xf] %vm1755_vm0, %v2352_v58  ;;  %v3747_v50 = vadd.f32 %v6683_v2, %v3746_v63  ;;  %v4518_v4 = vld [vmem:[#allocation3 + $0xf8] sm:$0xf0]  ;;  %v3502_v58 = vpop.f32.mrf.mxu0 }
 0x294   : > { %2555 = vst.msk [vmem:[#allocation3 + $0x10c] sm:$0xf] %vm2047_vm2, %v6631_v7  ;;  %v3593_v40 = vpack.c.bf16 %v3566_v34, %v3565_v55  ;;  %v2581_v7 = vrot.slane %v2579_v36, 4  ;;  %v3325_v36 = vadd.f32 %v6369_v26, %v3324_v45 }
 0x295   : > { %1717 = vrot.lane.b32.xlu1 %v6475_v24, %s4867_s20  ;;  %v3826_v42 = vadd.f32 %v4558_v37, %v3747_v50  ;;  %v3326_v37 = vpop.f32.mrf.mxu1 }
 0x296   : > { %4445 = vmatmul.msk.bf16.gmra.mxu3 %vm3241_vm15, %v3593_v40 }
 0x297   : > { %2140 = vrot.lane.b32.xlu2 %v6184_v31, %s4869_s29  ;;  %v2354_v20 = vpop.permute.xlu1 %2353  ;;  %v4275_v46 = vld [vmem:[#allocation3 + $0xf0] sm:$0xf]  ;;  %v3858_v60 = vmax.f32 %v3826_v42, 0.0  ;;  %v4798_v42 = vld [vmem:[#allocation2 + $0xc4] sm:$0xf] }
 0x298   : > { %2426 = vst.msk [vmem:[#allocation3 + $0x118] sm:$0xf] %vm1755_vm0, %v2354_v20  ;;  %2009 = vrot.lane.b32.xlu0 %v6151_v44, %s4868_s21  ;;  %v4276_v8 = vor.u32 %v4518_v4, %v4275_v46  ;;  %v2582_v44 = vor.u32 %v2581_v7, %v6696_v17 }
 0x299   : > { %v6701_v24 = vpop.permute.xlu2 %2485 }
 0x29a   : > { %v2484_v31 = vpop.permute.xlu0 %2483  ;;  %3348 = vmatmul.bf16.gmra.mxu1 %v4276_v8  ;;  %v3748_v18 = vpop.f32.mrf.mxu3  ;;  %v2583_v54 = vrot.slane %v2582_v44, 4 }
 0x29b   : > { %2556 = vst.msk [vmem:[#allocation3 + $0x118] sm:$0xf] %vm2047_vm2, %v2484_v31  ;;  %v3749_v51 = vadd.f32 %v6683_v2, %v3748_v18 }
 0x29c   : > { %2708 = vst.msk [vmem:[#allocation3 + $0x118] sm:$0xf] %vm2178_vm3, %v6647_v11  ;;  %v2588_v34 = vsel %vm5022_vm8, %v2583_v54, %v2587_v43 }
 0x29d   : > { %v3827_v12 = vadd.f32 %v4559_v19, %v3749_v51  ;;  %2138 = vrot.lane.b32.xlu1 %v6160_v28, %s4869_s29  ;;  %v4280_v28 = vor.u32 %v4517_v1, %v4277_v6  ;;  %v3504_v19 = vpop.f32.mrf.mxu0  ;;  %v4700_v1 = vld [vmem:[%s4988_s19 + $0x8] sm:$0xff]  }
 0x29f   : > { %2497 = vrot.lane.b32.xlu2 %v6295_v25, %s4868_s21  ;;  %v3859_v39 = vmax.f32 %v3827_v12, 0.0  ;;  %v2634_v33 = vpop.permute.xlu1 %2633  ;;  %v2572_v25 = vor.u32 %v2571_v59, %v2568_v15  ;;  %v4799_v15 = vld [vmem:[#allocation2 + $0xc0] sm:$0xf]  ;;  %v4562_v59 = vunpack.c.l.bf16 %v4700_v1 }
 0x2a0   : > { %2707 = vst.msk [vmem:[#allocation3 + $0x10c] sm:$0xf] %vm2178_vm3, %v2634_v33  ;;  %2367 = vrot.lane.b32.xlu0 %v6263_v53, %s4867_s20 }
 0x2a1   : > { %v6721_v11 = vpop.permute.xlu2 %2639  ;;  %v4623_v16 = vpack.c.bf16 %v3859_v39, %v3858_v60  ;;  %v2573_v63 = vrot.slane %v2572_v25, 4  ;;  %v3329_v60 = vpop.f32.mrf.mxu1 }
 0x2a2   : > { %v1704_v55 = vpop.permute.xlu0 %1703  ;;  %3437 = vmatmul.bf16.gmra.mxu2 %v4280_v28 }
 0x2a3   : > { %4624 = vst [vmem:[%s6723_s8] sm:$0xff] %v4623_v16   ;;  %v4289_v35 = vld [vmem:[#allocation3 + $0x114] sm:$0xf0] }
 0x2a4   : > { %1778 = vst.msk [vmem:[#allocation3 + $0x108] sm:$0xf] %vm1755_vm0, %v1704_v55 }
 0x2a5   : > { %2070 = vst.msk [vmem:[#allocation3 + $0x108] sm:$0xf] %vm2047_vm2, %v6665_v47  ;;  %2369 = vrot.lane.b32.xlu1 %v6273_v49, %s4867_s20  ;;  %v3413_v53 = vpop.f32.mrf.mxu2  ;;  %v2578_v49 = vsel %vm5022_vm8, %v2573_v63, %v6696_v17  ;;  %v3327_v47 = vadd.f32 %v6369_v26, %v3326_v37 }
 0x2a6   : > { %v3414_v50 = vadd.f32 %v3413_v53, %v3325_v36 }
 0x2a7   : > { %2651 = vrot.lane.b32.xlu2 %v2588_v34, %s4869_s29  ;;  %v1706_v56 = vpop.permute.xlu1 %1705  ;;  %v4520_v4 = vld [vmem:[#allocation3 + $0x10c] sm:$0xf] }
 0x2a8   : > { %1779 = vst.msk [vmem:[#allocation3 + $0x114] sm:$0xf] %vm1755_vm0, %v1706_v56  ;;  %2499 = vrot.lane.b32.xlu0 %v4797_v23, %s4868_s21  ;;  %v3503_v7 = vadd.f32 %v3502_v58, %v3414_v50  ;;  %v4292_v26 = vor.u32 %v4520_v4, %v4289_v35  ;;  %v6773_v56 = vld [vmem:[%s6949_s5] ss:$0 sm:$0xff] }
 0x2a9   : > { %v2000_v40 = vpop.permute.xlu2 %1999  ;;  %v3330_v36 = vadd.f32 %v6773_v56, %v3329_v60 }
 0x2aa   : > { %v1998_v20 = vpop.permute.xlu0 %1997 }
 0x2ab   : > { %2071 = vst.msk [vmem:[#allocation3 + $0x114] sm:$0xf] %vm2047_vm2, %v1998_v20 }
 0x2ac   : > { %2202 = vst.msk [vmem:[#allocation3 + $0x114] sm:$0xf] %vm2178_vm3, %v6677_v41  ;;  %v3567_v41 = vmax.f32 %v3503_v7, 0.0 }
 0x2ad   : > { %2649 = vrot.lane.b32.xlu1 %v2578_v49, %s4869_s29  ;;  %v3415_v46 = vpop.f32.mrf.mxu2 }
 0x2ae   : > { %v3416_v8 = vadd.f32 %v3415_v46, %v3327_v47 }
 0x2af   : > { %2011 = vrot.lane.b32.xlu2 %v6198_v22, %s4868_s21  ;;  %v2127_v31 = vpop.permute.xlu1 %2126 }
 0x2b0   : > { %v3505_v17 = vadd.f32 %v3504_v19, %v3416_v8  ;;  %2201 = vst.msk [vmem:[#allocation3 + $0x108] sm:$0xf] %vm2178_vm3, %v2127_v31  ;;  %1719 = vrot.lane.b32.xlu0 %v6550_v10, %s4867_s20 }
 0x2b1   : > { %v2133_v52 = vpop.permute.xlu2 %2132 }
 0x2b2   : > { %v3568_v18 = vmax.f32 %v3505_v17, 0.0  ;;  %v2356_v3 = vpop.permute.xlu0 %2355  ;;  %3442 = vmatmul.bf16.gmra.mxu2 %v4292_v26 }
 0x2b3   : > { %2427 = vst.msk [vmem:[#allocation3 + $0x124] sm:$0xf] %vm1755_vm0, %v2356_v3  ;;  %v4521_v44 = vld [vmem:[#allocation3 + $0x110] sm:$0xf0] }
 0x2b4   : > { %2557 = vst.msk [vmem:[#allocation3 + $0x124] sm:$0xf] %vm2047_vm2, %v6701_v24  ;;  %v3594_v22 = vpack.c.bf16 %v3568_v18, %v3567_v41 }
 0x2b5   : > { %1721 = vrot.lane.b32.xlu1 %v6545_v61, %s4867_s20 }
 0x2b6   : > { %4446 = vmatmul.msk.bf16.gmra.mxu3 %vm3241_vm15, %v3594_v22 }
 0x2b7   : > { %2144 = vrot.lane.b32.xlu2 %v4798_v42, %s4869_s29  ;;  %v2358_v10 = vpop.permute.xlu1 %2357  ;;  %v4287_v51 = vld [vmem:[#allocation3 + $0x108] sm:$0xf] }
 0x2b8   : > { %2428 = vst.msk [vmem:[#allocation3 + $0x130] sm:$0xf] %vm1755_vm0, %v2358_v10  ;;  %2013 = vrot.lane.b32.xlu0 %v6211_v9, %s4868_s21  ;;  %v4288_v32 = vor.u32 %v4521_v44, %v4287_v51  ;;  %v4563_v9 = vunpack.c.h.bf16 %v4700_v1  ;;  %v4701_v44 = vld [vmem:[%s4988_s19 + $0x10] sm:$0xff]  }
 0x2b9   : > { %v3751_v12 = vpop.f32.mrf.mxu3  ;;  %v2490_v61 = vpop.permute.xlu2 %2489 }
 0x2ba   : > { %v2488_v24 = vpop.permute.xlu0 %2487  ;;  %3353 = vmatmul.bf16.gmra.mxu1 %v4288_v32  ;;  %v3752_v45 = vadd.f32 %v6683_v2, %v3751_v12  ;;  %v4566_v32 = vunpack.c.l.bf16 %v4701_v44 }
 0x2bb   : > { %2558 = vst.msk [vmem:[#allocation3 + $0x130] sm:$0xf] %vm2047_vm2, %v2488_v24 }
 0x2bc   : > { %2710 = vst.msk [vmem:[#allocation3 + $0x130] sm:$0xf] %vm2178_vm3, %v6721_v11  ;;  %v3828_v6 = vadd.f32 %v4562_v59, %v3752_v45  ;;  %v3507_v11 = vpop.f32.mrf.mxu0 }
 0x2bd   : > { %2142 = vrot.lane.b32.xlu1 %v4799_v15, %s4869_s29 }
 0x2be   : > { %v3860_v55 = vmax.f32 %v3828_v6, 0.0 }
 0x2bf   : > { %v2638_v39 = vpop.permute.xlu1 %2637 }
 0x2c0   : > { %2709 = vst.msk [vmem:[#allocation3 + $0x124] sm:$0xf] %vm2178_vm3, %v2638_v39 }
 0x2c1   : > { %v3753_v33 = vpop.f32.mrf.mxu3  ;;  %v2644_v34 = vpop.permute.xlu2 %2643 }
 0x2c2   : > { %v3754_v54 = vadd.f32 %v6683_v2, %v3753_v33  ;;  %v1708_v43 = vpop.permute.xlu0 %1707 }
 0x2c3   : > { %1780 = vst.msk [vmem:[#allocation3 + $0x120] sm:$0xf] %vm1755_vm0, %v1708_v43  ;;  %v4301_v63 = vld [vmem:[#allocation3 + $0x12c] sm:$0xf0] }
 0x2c4   : > { %v3829_v28 = vadd.f32 %v4563_v9, %v3754_v54  ;;  %2072 = vst.msk [vmem:[#allocation3 + $0x120] sm:$0xf] %vm2047_vm2, %v2000_v40  ;;  %v3331_v40 = vpop.f32.mrf.mxu1  ;;  %v3509_v7 = vpop.f32.mrf.mxu0 }
 0x2c5   : > { %v3418_v16 = vpop.f32.mrf.mxu2  ;;  %v3332_v49 = vadd.f32 %v6773_v56, %v3331_v40 }
 0x2c6   : > { %v3861_v25 = vmax.f32 %v3829_v28, 0.0  ;;  %v3419_v50 = vadd.f32 %v3418_v16, %v3330_v36 }
 0x2c7   : > { %v1710_v58 = vpop.permute.xlu1 %1709  ;;  %v4523_v53 = vld [vmem:[#allocation3 + $0x124] sm:$0xf] }
 0x2c8   : > { %v4628_v23 = vpack.c.bf16 %v3861_v25, %v3860_v55  ;;  %1781 = vst.msk [vmem:[#allocation3 + $0x12c] sm:$0xf] %vm1755_vm0, %v1710_v58  ;;  %v4304_v37 = vor.u32 %v4523_v53, %v4301_v63  ;;  %v3508_v46 = vadd.f32 %v3507_v11, %v3419_v50 }
 0x2c9   : > { %v2004_v19 = vpop.permute.xlu2 %2003 }
 0x2ca   : > { %4715 = vst [vmem:[%s6723_s8 + $0x8] sm:$0xff] %v4628_v23   ;;  %v2002_v20 = vpop.permute.xlu0 %2001  ;;  %3447 = vmatmul.bf16.gmra.mxu2 %v4304_v37  ;;  %v3569_v35 = vmax.f32 %v3508_v46, 0.0 }
 0x2cb   : > { %2073 = vst.msk [vmem:[#allocation3 + $0x12c] sm:$0xf] %vm2047_vm2, %v2002_v20 }
 0x2cc   : > { %2204 = vst.msk [vmem:[#allocation3 + $0x12c] sm:$0xf] %vm2178_vm3, %v2133_v52  ;;  %v3334_v24 = vpop.f32.mrf.mxu1  ;;  %v3512_v33 = vpop.f32.mrf.mxu0 }
 0x2cd   : > { %v3420_v47 = vpop.f32.mrf.mxu2  ;;  %v3335_v55 = vadd.f32 %v6773_v56, %v3334_v24 }
 0x2ce   : > { %v3421_v4 = vadd.f32 %v3420_v47, %v3332_v49 }
 0x2cf   : > { %v2131_v8 = vpop.permute.xlu1 %2130 }
 0x2d0   : > { %v3510_v31 = vadd.f32 %v3509_v7, %v3421_v4  ;;  %2203 = vst.msk [vmem:[#allocation3 + $0x120] sm:$0xf] %vm2178_vm3, %v2131_v8 }
 0x2d1   : > { %v2137_v10 = vpop.permute.xlu2 %2136 }
 0x2d2   : > { %v3570_v17 = vmax.f32 %v3510_v31, 0.0  ;;  %v2360_v26 = vpop.permute.xlu0 %2359 }
 0x2d3   : > { %2429 = vst.msk [vmem:[#allocation3 + $0x13c] sm:$0xf] %vm1755_vm0, %v2360_v26  ;;  %v4524_v3 = vld [vmem:[#allocation3 + $0x128] sm:$0xf0] }
 0x2d4   : > { %v3595_v41 = vpack.c.bf16 %v3570_v17, %v3569_v35  ;;  %2559 = vst.msk [vmem:[#allocation3 + $0x13c] sm:$0xf] %vm2047_vm2, %v2490_v61  ;;  %v4567_v61 = vunpack.c.h.bf16 %v4701_v44  ;;  %v3336_v58 = vpop.f32.mrf.mxu1  ;;  %v3514_v20 = vpop.f32.mrf.mxu0 }
 0x2d5   : > { %v3337_v36 = vadd.f32 %v6773_v56, %v3336_v58 }
 0x2d6   : > { %4447 = vmatmul.msk.bf16.gmra.mxu3 %vm3241_vm15, %v3595_v41 }
 0x2d7   : > { %v2362_v18 = vpop.permute.xlu1 %2361  ;;  %v4299_v52 = vld [vmem:[#allocation3 + $0x120] sm:$0xf] }
 0x2d8   : > { %2430 = vst.msk [vmem:[#allocation3 + $0x148] sm:$0xf] %vm1755_vm0, %v2362_v18  ;;  %v4300_v22 = vor.u32 %v4524_v3, %v4299_v52  ;;  %v4702_v3 = vld [vmem:[%s4988_s19 + $0x18] sm:$0xff]  }
 0x2d9   : > { %v3756_v42 = vpop.f32.mrf.mxu3  ;;  %v2494_v39 = vpop.permute.xlu2 %2493  ;;  %v4571_v44 = vunpack.c.h.bf16 %v4702_v3 }
 0x2da   : > { %v2492_v51 = vpop.permute.xlu0 %2491  ;;  %3358 = vmatmul.bf16.gmra.mxu1 %v4300_v22  ;;  %v3757_v12 = vadd.f32 %v6683_v2, %v3756_v42  ;;  %v4570_v22 = vunpack.c.l.bf16 %v4702_v3 }
 0x2db   : > { %2560 = vst.msk [vmem:[#allocation3 + $0x148] sm:$0xf] %vm2047_vm2, %v2492_v51 }
 0x2dc   : > { %2712 = vst.msk [vmem:[#allocation3 + $0x148] sm:$0xf] %vm2178_vm3, %v2644_v34  ;;  %v3830_v59 = vadd.f32 %v4566_v32, %v3757_v12  ;;  %v3339_v52 = vpop.f32.mrf.mxu1  ;;  %v3517_v51 = vpop.f32.mrf.mxu0 }
 0x2de   : > { %v3862_v54 = vmax.f32 %v3830_v59, 0.0 }
 0x2df   : > { %v2642_v1 = vpop.permute.xlu1 %2641 }
 0x2e0   : > { %2711 = vst.msk [vmem:[#allocation3 + $0x13c] sm:$0xf] %vm2178_vm3, %v2642_v1 }
 0x2e1   : > { %v3758_v15 = vpop.f32.mrf.mxu3  ;;  %v2648_v37 = vpop.permute.xlu2 %2647 }
 0x2e2   : > { %v3759_v45 = vadd.f32 %v6683_v2, %v3758_v15  ;;  %v1712_v60 = vpop.permute.xlu0 %1711 }
 0x2e3   : > { %1782 = vst.msk [vmem:[#allocation3 + $0x138] sm:$0xf] %vm1755_vm0, %v1712_v60  ;;  %v4313_v16 = vld [vmem:[#allocation3 + $0x144] sm:$0xf0] }
 0x2e4   : > { %v3831_v9 = vadd.f32 %v4567_v61, %v3759_v45  ;;  %2074 = vst.msk [vmem:[#allocation3 + $0x138] sm:$0xf] %vm2047_vm2, %v2004_v19  ;;  %v3341_v59 = vpop.f32.mrf.mxu1 }
 0x2e5   : > { %v3423_v6 = vpop.f32.mrf.mxu2 }
 0x2e6   : > { %v3863_v43 = vmax.f32 %v3831_v9, 0.0  ;;  %v3424_v53 = vadd.f32 %v3423_v6, %v3335_v55 }
 0x2e7   : > { %v1714_v28 = vpop.permute.xlu1 %1713  ;;  %v4526_v11 = vld [vmem:[#allocation3 + $0x13c] sm:$0xf] }
 0x2e8   : > { %v4633_v25 = vpack.c.bf16 %v3863_v43, %v3862_v54  ;;  %1783 = vst.msk [vmem:[#allocation3 + $0x144] sm:$0xf] %vm1755_vm0, %v1714_v28  ;;  %v4316_v34 = vor.u32 %v4526_v11, %v4313_v16  ;;  %v3513_v40 = vadd.f32 %v3512_v33, %v3424_v53  ;;  %v3340_v54 = vadd.f32 %v6773_v56, %v3339_v52  ;;  %v3519_v11 = vpop.f32.mrf.mxu0  ;;  %v4703_v52 = vld [vmem:[%s4988_s19 + $0x20] sm:$0xff]  }
 0x2e9   : > { %v2008_v17 = vpop.permute.xlu2 %2007 }
 0x2ea   : > { %4716 = vst [vmem:[%s6723_s8 + $0x10] sm:$0xff] %v4633_v25   ;;  %v2006_v63 = vpop.permute.xlu0 %2005  ;;  %3452 = vmatmul.bf16.gmra.mxu2 %v4316_v34  ;;  %v3571_v46 = vmax.f32 %v3513_v40, 0.0  ;;  %v3342_v25 = vadd.f32 %v6773_v56, %v3341_v59 }
 0x2eb   : > { %2075 = vst.msk [vmem:[#allocation3 + $0x144] sm:$0xf] %vm2047_vm2, %v2006_v63 }
 0x2ec   : > { %2206 = vst.msk [vmem:[#allocation3 + $0x144] sm:$0xf] %vm2178_vm3, %v2137_v10 }
 0x2ed   : > { %v3425_v23 = vpop.f32.mrf.mxu2 }
 0x2ee   : > { %v3426_v50 = vadd.f32 %v3425_v23, %v3337_v36 }
 0x2ef   : > { %v2135_v49 = vpop.permute.xlu1 %2134 }
 0x2f0   : > { %v3515_v47 = vadd.f32 %v3514_v20, %v3426_v50  ;;  %2205 = vst.msk [vmem:[#allocation3 + $0x138] sm:$0xf] %vm2178_vm3, %v2135_v49  ;;  %v3522_v49 = vpop.f32.mrf.mxu0 }
 0x2f1   : > { %v2141_v12 = vpop.permute.xlu2 %2140 }
 0x2f2   : > { %v3572_v4 = vmax.f32 %v3515_v47, 0.0  ;;  %v2364_v7 = vpop.permute.xlu0 %2363 }
 0x2f3   : > { %2431 = vst.msk [vmem:[#allocation3 + $0x154] sm:$0xf] %vm1755_vm0, %v2364_v7  ;;  %v4527_v35 = vld [vmem:[#allocation3 + $0x140] sm:$0xf0] }
 0x2f4   : > { %v3596_v8 = vpack.c.bf16 %v3572_v4, %v3571_v46  ;;  %2561 = vst.msk [vmem:[#allocation3 + $0x154] sm:$0xf] %vm2047_vm2, %v2494_v39 }
 0x2f6   : > { %4448 = vmatmul.msk.bf16.gmra.mxu3 %vm3241_vm15, %v3596_v8 }
 0x2f7   : > { %v2366_v19 = vpop.permute.xlu1 %2365  ;;  %v4311_v31 = vld [vmem:[#allocation3 + $0x138] sm:$0xf] }
 0x2f8   : > { %2432 = vst.msk [vmem:[#allocation3 + $0x160] sm:$0xf] %vm1755_vm0, %v2366_v19  ;;  %v4312_v26 = vor.u32 %v4527_v35, %v4311_v31 }
 0x2f9   : > { %v3761_v41 = vpop.f32.mrf.mxu3  ;;  %v2498_v34 = vpop.permute.xlu2 %2497 }
 0x2fa   : > { %v2496_v18 = vpop.permute.xlu0 %2495  ;;  %3363 = vmatmul.bf16.gmra.mxu1 %v4312_v26  ;;  %v3762_v42 = vadd.f32 %v6683_v2, %v3761_v41  ;;  %v3344_v58 = vpop.f32.mrf.mxu1 }
 0x2fb   : > { %2562 = vst.msk [vmem:[#allocation3 + $0x160] sm:$0xf] %vm2047_vm2, %v2496_v18  ;;  %v3345_v35 = vadd.f32 %v6773_v56, %v3344_v58 }
 0x2fc   : > { %2714 = vst.msk [vmem:[#allocation3 + $0x160] sm:$0xf] %vm2178_vm3, %v2648_v37  ;;  %v3832_v24 = vadd.f32 %v4570_v22, %v3762_v42  ;;  %v3524_v42 = vpop.f32.mrf.mxu0 }
 0x2fe   : > { %v3864_v60 = vmax.f32 %v3832_v24, 0.0 }
 0x2ff   : > { %v2646_v10 = vpop.permute.xlu1 %2645 }
 0x300   : > { %2713 = vst.msk [vmem:[#allocation3 + $0x154] sm:$0xf] %vm2178_vm3, %v2646_v10 }
 0x301   : > { %v3763_v32 = vpop.f32.mrf.mxu3  ;;  %v2652_v4 = vpop.permute.xlu2 %2651 }
 0x302   : > { %v3764_v1 = vadd.f32 %v6683_v2, %v3763_v32  ;;  %v1716_v61 = vpop.permute.xlu0 %1715  ;;  %v3346_v7 = vpop.f32.mrf.mxu1 }
 0x303   : > { %1784 = vst.msk [vmem:[#allocation3 + $0x150] sm:$0xf] %vm1755_vm0, %v1716_v61  ;;  %v4325_v6 = vld [vmem:[#allocation3 + $0x15c] sm:$0xf0]  ;;  %v3347_v3 = vadd.f32 %v6773_v56, %v3346_v7  ;;  %v4575_v61 = vunpack.c.h.bf16 %v4703_v52 }
 0x304   : > { %v3833_v15 = vadd.f32 %v4571_v44, %v3764_v1  ;;  %2076 = vst.msk [vmem:[#allocation3 + $0x150] sm:$0xf] %vm2047_vm2, %v2008_v17 }
 0x305   : > { %v3428_v45 = vpop.f32.mrf.mxu2 }
 0x306   : > { %v3865_v39 = vmax.f32 %v3833_v15, 0.0  ;;  %v3429_v16 = vadd.f32 %v3428_v45, %v3340_v54 }
 0x307   : > { %v1718_v9 = vpop.permute.xlu1 %1717  ;;  %v4529_v33 = vld [vmem:[#allocation3 + $0x154] sm:$0xf] }
 0x308   : > { %v4638_v43 = vpack.c.bf16 %v3865_v39, %v3864_v60  ;;  %1785 = vst.msk [vmem:[#allocation3 + $0x15c] sm:$0xf] %vm1755_vm0, %v1718_v9  ;;  %v4328_v28 = vor.u32 %v4529_v33, %v4325_v6  ;;  %v3518_v63 = vadd.f32 %v3517_v51, %v3429_v16  ;;  %v4574_v51 = vunpack.c.l.bf16 %v4703_v52 }
 0x309   : > { %v2012_v15 = vpop.permute.xlu2 %2011 }
 0x30a   : > { %4717 = vst [vmem:[%s6723_s8 + $0x18] sm:$0xff] %v4638_v43   ;;  %v2010_v55 = vpop.permute.xlu0 %2009  ;;  %3457 = vmatmul.bf16.gmra.mxu2 %v4328_v28  ;;  %v3573_v40 = vmax.f32 %v3518_v63, 0.0 }
 0x30b   : > { %2077 = vst.msk [vmem:[#allocation3 + $0x15c] sm:$0xf] %vm2047_vm2, %v2010_v55 }
 0x30c   : > { %2208 = vst.msk [vmem:[#allocation3 + $0x15c] sm:$0xf] %vm2178_vm3, %v2141_v12 }
 0x30d   : > { %v3430_v53 = vpop.f32.mrf.mxu2 }
 0x30e   : > { %v3431_v36 = vadd.f32 %v3430_v53, %v3342_v25 }
 0x30f   : > { %v2139_v23 = vpop.permute.xlu1 %2138 }
 0x310   : > { %v3520_v37 = vadd.f32 %v3519_v11, %v3431_v36  ;;  %2207 = vst.msk [vmem:[#allocation3 + $0x150] sm:$0xf] %vm2178_vm3, %v2139_v23 }
 0x312   : > { %v3574_v50 = vmax.f32 %v3520_v37, 0.0  ;;  %v2368_v20 = vpop.permute.xlu0 %2367  ;;  %v2145_v37 = vpop.permute.xlu2 %2144 }
 0x313   : > { %2433 = vst.msk [vmem:[#allocation3 + $0x16c] sm:$0xf] %vm1755_vm0, %v2368_v20  ;;  %v4530_v31 = vld [vmem:[#allocation3 + $0x158] sm:$0xf0] }
 0x314   : > { %v3597_v47 = vpack.c.bf16 %v3574_v50, %v3573_v40  ;;  %2563 = vst.msk [vmem:[#allocation3 + $0x16c] sm:$0xf] %vm2047_vm2, %v2498_v34 }
 0x315   : > { %v3433_v46 = vpop.f32.mrf.mxu2 }
 0x316   : > { %4449 = vmatmul.msk.bf16.gmra.mxu3 %vm3241_vm15, %v3597_v47  ;;  %v3434_v41 = vadd.f32 %v3433_v46, %v3345_v35 }
 0x317   : > { %v2370_v8 = vpop.permute.xlu1 %2369  ;;  %v4323_v19 = vld [vmem:[#allocation3 + $0x150] sm:$0xf]  ;;  %v3349_v12 = vpop.f32.mrf.mxu1 }
 0x318   : > { %2434 = vst.msk [vmem:[#allocation3 + $0x178] sm:$0xf] %vm1755_vm0, %v2370_v8  ;;  %v4324_v17 = vor.u32 %v4530_v31, %v4323_v19  ;;  %v3523_v10 = vadd.f32 %v3522_v49, %v3434_v41  ;;  %v3350_v34 = vadd.f32 %v6773_v56, %v3349_v12 }
 0x319   : > { %v3766_v26 = vpop.f32.mrf.mxu3 }
 0x31a   : > { %v2500_v18 = vpop.permute.xlu0 %2499  ;;  %3368 = vmatmul.bf16.gmra.mxu1 %v4324_v17  ;;  %v3767_v44 = vadd.f32 %v6683_v2, %v3766_v26  ;;  %v3575_v45 = vmax.f32 %v3523_v10, 0.0 }
 0x31b   : > { %2564 = vst.msk [vmem:[#allocation3 + $0x178] sm:$0xf] %vm2047_vm2, %v2500_v18  ;;  %v4704_v18 = vld [vmem:[%s4988_s19 + $0x28] sm:$0xff]  }
 0x31c   : > { %2716 = vst.msk [vmem:[#allocation3 + $0x178] sm:$0xf] %vm2178_vm3, %v2652_v4  ;;  %v3834_v60 = vadd.f32 %v4574_v51, %v3767_v44  ;;  %v4579_v10 = vunpack.c.h.bf16 %v4704_v18 }
 0x31d   : > { %v3435_v22 = vpop.f32.mrf.mxu2 }
 0x31e   : > { %v3436_v32 = vadd.f32 %v3435_v22, %v3347_v3  ;;  %v3866_v11 = vmax.f32 %v3834_v60, 0.0  ;;  %v4578_v3 = vunpack.c.l.bf16 %v4704_v18 }
 0x31f   : > { %v2650_v24 = vpop.permute.xlu1 %2649  ;;  %v3351_v63 = vpop.f32.mrf.mxu1 }
 0x320   : > { %v3525_v1 = vadd.f32 %v3524_v42, %v3436_v32  ;;  %2715 = vst.msk [vmem:[#allocation3 + $0x16c] sm:$0xf] %vm2178_vm3, %v2650_v24  ;;  %v3352_v40 = vadd.f32 %v6773_v56, %v3351_v63 }
 0x321   : > { %v3768_v59 = vpop.f32.mrf.mxu3 }
 0x322   : > { %v3576_v39 = vmax.f32 %v3525_v1, 0.0  ;;  %v3769_v9 = vadd.f32 %v6683_v2, %v3768_v59  ;;  %v1720_v33 = vpop.permute.xlu0 %1719 }
 0x323   : > { %1786 = vst.msk [vmem:[#allocation3 + $0x168] sm:$0xf] %vm1755_vm0, %v1720_v33  ;;  %v4337_v28 = vld [vmem:[#allocation3 + $0x174] sm:$0xf0] }
 0x324   : > { %v3598_v6 = vpack.c.bf16 %v3576_v39, %v3575_v45  ;;  %v3835_v54 = vadd.f32 %v4575_v61, %v3769_v9  ;;  %2078 = vst.msk [vmem:[#allocation3 + $0x168] sm:$0xf] %vm2047_vm2, %v2012_v15 }
 0x325   : > { %v3438_v43 = vpop.f32.mrf.mxu2 }
 0x326   : > { %v3867_v16 = vmax.f32 %v3835_v54, 0.0  ;;  %4450 = vmatmul.msk.bf16.gmra.mxu3 %vm3241_vm15, %v3598_v6  ;;  %v3439_v36 = vadd.f32 %v3438_v43, %v3350_v34 }
 0x327   : > { %v1722_v55 = vpop.permute.xlu1 %1721  ;;  %v4532_v25 = vld [vmem:[#allocation3 + $0x16c] sm:$0xf] }
 0x328   : > { %v4643_v58 = vpack.c.bf16 %v3867_v16, %v3866_v11  ;;  %1787 = vst.msk [vmem:[#allocation3 + $0x174] sm:$0xf] %vm1755_vm0, %v1722_v55  ;;  %v4340_v53 = vor.u32 %v4532_v25, %v4337_v28  ;;  %v3528_v20 = vadd.f32 %v6442_v27, %v3439_v36  ;;  %v4705_v28 = vld [vmem:[%s4988_s19 + $0x30] sm:$0xff]  }
 0x329   : > { %v4582_v16 = vunpack.c.l.bf16 %v4705_v28  ;;  %v4583_v34 = vunpack.c.h.bf16 %v4705_v28 }
 0x32a   : > { %4718 = vst [vmem:[%s6723_s8 + $0x20] sm:$0xff] %v4643_v58   ;;  %v2014_v23 = vpop.permute.xlu0 %2013  ;;  %3462 = vmatmul.bf16.gmra.mxu2 %v4340_v53  ;;  %v3577_v4 = vmax.f32 %v3528_v20, 0.0 }
 0x32b   : > { %2079 = vst.msk [vmem:[#allocation3 + $0x174] sm:$0xf] %vm2047_vm2, %v2014_v23 }
 0x32c   : > { %2210 = vst.msk [vmem:[#allocation3 + $0x174] sm:$0xf] %vm2178_vm3, %v2145_v37 }
 0x32d   : > { %v3440_v50 = vpop.f32.mrf.mxu2 }
 0x32e   : > { %v3441_v49 = vadd.f32 %v3440_v50, %v3352_v40 }
 0x32f   : > { %v2143_v47 = vpop.permute.xlu1 %2142 }
 0x330   : > { %v3530_v46 = vadd.f32 %v6460_v38, %v3441_v49  ;;  %2209 = vst.msk [vmem:[#allocation3 + $0x168] sm:$0xf] %vm2178_vm3, %v2143_v47 }
 0x332   : > { %v3578_v7 = vmax.f32 %v3530_v46, 0.0 }
 0x333   : > { %v4533_v17 = vld [vmem:[#allocation3 + $0x170] sm:$0xf0] }
 0x334   : > { %v3599_v8 = vpack.c.bf16 %v3578_v7, %v3577_v4 }
 0x335   : > { %v3443_v19 = vpop.f32.mrf.mxu2 }
 0x336   : > { %4451 = vmatmul.msk.bf16.gmra.mxu3 %vm3241_vm15, %v3599_v8 }
 0x337   : > { %v3354_v31 = vpop.f32.mrf.mxu1  ;;  %v4335_v35 = vld [vmem:[#allocation3 + $0x168] sm:$0xf] }
 0x338   : > { %v4336_v26 = vor.u32 %v4533_v17, %v4335_v35  ;;  %v3355_v27 = vadd.f32 %v6773_v56, %v3354_v31  ;;  %v4706_v35 = vld [vmem:[%s4988_s19 + $0x38] sm:$0xff]  }
 0x339   : > { %v3771_v41 = vpop.f32.mrf.mxu3  ;;  %v4587_v18 = vunpack.c.h.bf16 %v4706_v35 }
 0x33a   : > { %3373 = vmatmul.bf16.gmra.mxu1 %v4336_v26  ;;  %v3444_v52 = vadd.f32 %v3443_v19, %v3355_v27  ;;  %v3772_v38 = vadd.f32 %v6683_v2, %v3771_v41  ;;  %v4586_v26 = vunpack.c.l.bf16 %v4706_v35 }
 0x33c   : > { %v3533_v32 = vadd.f32 %v6483_v62, %v3444_v52  ;;  %v3836_v12 = vadd.f32 %v4578_v3, %v3772_v38 }
 0x33d   : > { %v3445_v51 = vpop.f32.mrf.mxu2 }
 0x33e   : > { %v3579_v59 = vmax.f32 %v3533_v32, 0.0  ;;  %v3868_v45 = vmax.f32 %v3836_v12, 0.0 }
 0x33f   : > { %v3356_v22 = vpop.f32.mrf.mxu1 }
 0x340   : > { %v3357_v42 = vadd.f32 %v6773_v56, %v3356_v22 }
 0x341   : > { %v3773_v44 = vpop.f32.mrf.mxu3 }
 0x342   : > { %v3446_v24 = vadd.f32 %v3445_v51, %v3357_v42  ;;  %v3774_v1 = vadd.f32 %v6683_v2, %v3773_v44 }
 0x344   : > { %v3535_v61 = vadd.f32 %v6501_v13, %v3446_v24  ;;  %v3837_v15 = vadd.f32 %v4579_v10, %v3774_v1 }
 0x346   : > { %v3580_v60 = vmax.f32 %v3535_v61, 0.0  ;;  %v3869_v39 = vmax.f32 %v3837_v15, 0.0 }
 0x348   : > { %v3600_v9 = vpack.c.bf16 %v3580_v60, %v3579_v59  ;;  %v4648_v33 = vpack.c.bf16 %v3869_v39, %v3868_v45  ;;  %v4707_v39 = vld [vmem:[%s4988_s19 + $0x40] sm:$0xff]  }
 0x34a   : > { %4719 = vst [vmem:[%s6723_s8 + $0x28] sm:$0xff] %v4648_v33   ;;  %4452 = vmatmul.msk.bf16.gmra.mxu3 %vm3241_vm15, %v3600_v9  ;;  %v4590_v33 = vunpack.c.l.bf16 %v4707_v39 }
 0x34d   : > { %v3448_v6 = vpop.f32.mrf.mxu2 }
 0x355   : > { %v3450_v58 = vpop.f32.mrf.mxu2 }
 0x357   : > { %v3359_v54 = vpop.f32.mrf.mxu1 }
 0x358   : > { %v3360_v43 = vadd.f32 %v6773_v56, %v3359_v54 }
 0x359   : > { %v3776_v62 = vpop.f32.mrf.mxu3 }
 0x35a   : > { %v3449_v11 = vadd.f32 %v3448_v6, %v3360_v43  ;;  %v3777_v13 = vadd.f32 %v6683_v2, %v3776_v62  ;;  %v4591_v62 = vunpack.c.h.bf16 %v4707_v39 }
 0x35c   : > { %v3538_v63 = vadd.f32 %v6519_v0, %v3449_v11  ;;  %v3838_v36 = vadd.f32 %v4582_v16, %v3777_v13 }
 0x35e   : > { %v3581_v20 = vmax.f32 %v3538_v63, 0.0  ;;  %v3870_v49 = vmax.f32 %v3838_v36, 0.0 }
 0x35f   : > { %v3361_v55 = vpop.f32.mrf.mxu1 }
 0x360   : > { %v3362_v25 = vadd.f32 %v6773_v56, %v3361_v55 }
 0x361   : > { %v3778_v53 = vpop.f32.mrf.mxu3 }
 0x362   : > { %v3451_v23 = vadd.f32 %v3450_v58, %v3362_v25  ;;  %v3779_v37 = vadd.f32 %v6683_v2, %v3778_v53 }
 0x364   : > { %v3540_v40 = vadd.f32 %v6535_v57, %v3451_v23  ;;  %v3839_v50 = vadd.f32 %v4583_v34, %v3779_v37 }
 0x366   : > { %v3582_v47 = vmax.f32 %v3540_v40, 0.0  ;;  %v3871_v46 = vmax.f32 %v3839_v50, 0.0  ;;  %v4708_v50 = vld [vmem:[%s4988_s19 + $0x48] sm:$0xff]  }
 0x368   : > { %v3601_v4 = vpack.c.bf16 %v3582_v47, %v3581_v20  ;;  %v4653_v7 = vpack.c.bf16 %v3871_v46, %v3870_v49  ;;  %v4595_v49 = vunpack.c.h.bf16 %v4708_v50 }
 0x36a   : > { %4720 = vst [vmem:[%s6723_s8 + $0x30] sm:$0xff] %v4653_v7   ;;  %4453 = vmatmul.msk.bf16.gmra.mxu3 %vm3241_vm15, %v3601_v4 }
 0x36d   : > { %v3453_v8 = vpop.f32.mrf.mxu2 }
 0x375   : > { %v3455_v52 = vpop.f32.mrf.mxu2 }
 0x377   : > { %v3364_v19 = vpop.f32.mrf.mxu1 }
 0x378   : > { %v3365_v31 = vadd.f32 %v6773_v56, %v3364_v19 }
 0x379   : > { %v3781_v0 = vpop.f32.mrf.mxu3 }
 0x37a   : > { %v3454_v17 = vadd.f32 %v3453_v8, %v3365_v31  ;;  %v3782_v57 = vadd.f32 %v6683_v2, %v3781_v0 }
 0x37c   : > { %v3543_v38 = vadd.f32 %v6560_v29, %v3454_v17  ;;  %v3840_v22 = vadd.f32 %v4586_v26, %v3782_v57  ;;  %v4709_v26 = vld [vmem:[%s4988_s19 + $0x50] sm:$0xff]  }
 0x37e   : > { %v3583_v32 = vmax.f32 %v3543_v38, 0.0  ;;  %v3872_v12 = vmax.f32 %v3840_v22, 0.0 }
 0x37f   : > { %v3366_v41 = vpop.f32.mrf.mxu1 }
 0x380   : > { %v3367_v27 = vadd.f32 %v6773_v56, %v3366_v41  ;;  %v4598_v41 = vunpack.c.l.bf16 %v4709_v26 }
 0x381   : > { %v3783_v3 = vpop.f32.mrf.mxu3 }
 0x382   : > { %v3456_v42 = vadd.f32 %v3455_v52, %v3367_v27  ;;  %v3784_v10 = vadd.f32 %v6683_v2, %v3783_v3  ;;  %v4599_v3 = vunpack.c.h.bf16 %v4709_v26 }
 0x384   : > { %v3545_v51 = vadd.f32 %v6580_v14, %v3456_v42  ;;  %v3841_v44 = vadd.f32 %v4587_v18, %v3784_v10 }
 0x386   : > { %v3584_v24 = vmax.f32 %v3545_v51, 0.0  ;;  %v3873_v1 = vmax.f32 %v3841_v44, 0.0 }
 0x388   : > { %v3602_v61 = vpack.c.bf16 %v3584_v24, %v3583_v32  ;;  %v4658_v15 = vpack.c.bf16 %v3873_v1, %v3872_v12 }
 0x38a   : > { %4721 = vst [vmem:[%s6723_s8 + $0x38] sm:$0xff] %v4658_v15   ;;  %4454 = vmatmul.msk.bf16.gmra.mxu3 %vm3241_vm15, %v3602_v61 }
 0x38d   : > { %v3458_v59 = vpop.f32.mrf.mxu2 }
 0x395   : > { %v3460_v43 = vpop.f32.mrf.mxu2 }
 0x397   : > { %v3369_v45 = vpop.f32.mrf.mxu1 }
 0x398   : > { %v3370_v60 = vadd.f32 %v6773_v56, %v3369_v45 }
 0x399   : > { %v3786_v29 = vpop.f32.mrf.mxu3 }
 0x39a   : > { %v3459_v9 = vadd.f32 %v3458_v59, %v3370_v60  ;;  %v3787_v14 = vadd.f32 %v6683_v2, %v3786_v29 }
 0x39c   : > { %v3548_v11 = vadd.f32 %v6593_v5, %v3459_v9  ;;  %v3842_v16 = vadd.f32 %v4590_v33, %v3787_v14  ;;  %v4594_v5 = vunpack.c.l.bf16 %v4708_v50  ;;  %v4801_v33 = vld [vmem:[%s6950_s6] ss:$0 sm:$0xff] }
 0x39e   : > { %v3585_v58 = vmax.f32 %v3548_v11, 0.0  ;;  %v3874_v53 = vmax.f32 %v3842_v16, 0.0  ;;  %v4711_v11 = vld [vmem:[%s4988_s19 + $0x60] sm:$0xff]  }
 0x39f   : > { %v3371_v6 = vpop.f32.mrf.mxu1  ;;  %v4606_v16 = vunpack.c.l.bf16 %v4711_v11 }
 0x3a0   : > { %v3372_v54 = vadd.f32 %v6773_v56, %v3371_v6 }
 0x3a1   : > { %v3788_v28 = vpop.f32.mrf.mxu3 }
 0x3a2   : > { %v3461_v13 = vadd.f32 %v3460_v43, %v3372_v54  ;;  %v3789_v55 = vadd.f32 %v6683_v2, %v3788_v28 }
 0x3a4   : > { %v3550_v25 = vadd.f32 %v6617_v21, %v3461_v13  ;;  %v3843_v34 = vadd.f32 %v4591_v62, %v3789_v55 }
 0x3a6   : > { %v3586_v63 = vmax.f32 %v3550_v25, 0.0  ;;  %v3875_v36 = vmax.f32 %v3843_v34, 0.0 }
 0x3a8   : > { %v3603_v23 = vpack.c.bf16 %v3586_v63, %v3585_v58  ;;  %v4663_v37 = vpack.c.bf16 %v3875_v36, %v3874_v53 }
 0x3a9   : > { %v3791_v40 = vpop.f32.mrf.mxu3 }
 0x3aa   : > { %4722 = vst [vmem:[%s6723_s8 + $0x40] sm:$0xff] %v4663_v37   ;;  %4455 = vmatmul.msk.bf16.gmra.mxu3 %vm3241_vm15, %v3603_v23  ;;  %v3792_v20 = vadd.f32 %v6683_v2, %v3791_v40  ;;  %v4712_v37 = vld [vmem:[%s4988_s19 + $0x68] sm:$0xff]  }
 0x3ab   : > { %v4610_v40 = vunpack.c.l.bf16 %v4712_v37 }
 0x3ac   : > { %v3844_v21 = vadd.f32 %v4594_v5, %v3792_v20  ;;  %v4611_v5 = vunpack.c.h.bf16 %v4712_v37 }
 0x3ad   : > { %v3463_v19 = vpop.f32.mrf.mxu2 }
 0x3ae   : > { %v3876_v7 = vmax.f32 %v3844_v21, 0.0 }
 0x3b1   : > { %v3793_v47 = vpop.f32.mrf.mxu3 }
 0x3b2   : > { %v3794_v46 = vadd.f32 %v6683_v2, %v3793_v47 }
 0x3b4   : > { %v3845_v4 = vadd.f32 %v4595_v49, %v3794_v46 }
 0x3b5   : > { %v3465_v38 = vpop.f32.mrf.mxu2 }
 0x3b6   : > { %v3877_v8 = vmax.f32 %v3845_v4, 0.0 }
 0x3b7   : > { %v3374_v0 = vpop.f32.mrf.mxu1 }
 0x3b8   : > { %v4668_v31 = vpack.c.bf16 %v3877_v8, %v3876_v7  ;;  %v3375_v17 = vadd.f32 %v6773_v56, %v3374_v0 }
 0x3b9   : > { %v3796_v35 = vpop.f32.mrf.mxu3 }
 0x3ba   : > { %4723 = vst [vmem:[%s6723_s8 + $0x48] sm:$0xff] %v4668_v31   ;;  %v3464_v57 = vadd.f32 %v3463_v19, %v3375_v17  ;;  %v3797_v27 = vadd.f32 %v6683_v2, %v3796_v35  ;;  %v4713_v19 = vld [vmem:[%s4988_s19 + $0x70] sm:$0xff]  }
 0x3bb   : > { %v4614_v0 = vunpack.c.l.bf16 %v4713_v19  ;;  %v4615_v35 = vunpack.c.h.bf16 %v4713_v19 }
 0x3bc   : > { %v3553_v42 = vadd.f32 %v6642_v30, %v3464_v57  ;;  %v3846_v10 = vadd.f32 %v4598_v41, %v3797_v27  ;;  %v4710_v30 = vld [vmem:[%s4988_s19 + $0x58] sm:$0xff]  }
 0x3bd   : > { %v4602_v29 = vunpack.c.l.bf16 %v4710_v30  ;;  %v4603_v39 = vunpack.c.h.bf16 %v4710_v30 }
 0x3be   : > { %v3587_v24 = vmax.f32 %v3553_v42, 0.0  ;;  %v3878_v1 = vmax.f32 %v3846_v10, 0.0 }
 0x3bf   : > { %v3376_v18 = vpop.f32.mrf.mxu1 }
 0x3c0   : > { %v3377_v52 = vadd.f32 %v6773_v56, %v3376_v18 }
 0x3c1   : > { %v3798_v22 = vpop.f32.mrf.mxu3 }
 0x3c2   : > { %v3466_v51 = vadd.f32 %v3465_v38, %v3377_v52  ;;  %v3799_v44 = vadd.f32 %v6683_v2, %v3798_v22  ;;  %v4714_v38 = vld [vmem:[%s4988_s19 + $0x78] sm:$0xff]   ;;  %s4816_s19 = sshra.s32 %s3970_s23, 4  ;;  %s4817_s19 = int_to_ptr.hbm [resolvable:$true] %s4816_s19 }
 0x3c3   : > { %v4618_v22 = vunpack.c.l.bf16 %v4714_v38  ;;  %v4619_v10 = vunpack.c.h.bf16 %v4714_v38  ;;  %s4818_s20 = scalar_lea.hbm %s4817_s19, 128  ;;  %p4823_p0 = scmp.lt.s32.totalorder %s4817_s19, %s6951_s7 }
 0x3c4   : > { %v3555_v32 = vadd.f32 %v6663_v48, %v3466_v51  ;;  %v3847_v12 = vadd.f32 %v4599_v3, %v3799_v44  ;;  %p4819_p11 = scmp.ne.s32.totalorder %s4817_s19, %s4818_s20  ;;  %p4824_p1 = scmp.lt.s32.totalorder %s4822_s13, %s4818_s20 }
 0x3c6   : > { %v3588_v61 = vmax.f32 %v3555_v32, 0.0  ;;  %v3879_v15 = vmax.f32 %v3847_v12, 0.0  ;;  %p4820_p12 = pnand %p4819_p11, %p4949_p5  ;;  %p4825_p2 = por %p4824_p1, %p4823_p0 }
 0x3c8   : > { %v3604_v59 = vpack.c.bf16 %v3588_v61, %v3587_v24  ;;  %v4673_v56 = vpack.c.bf16 %v3879_v15, %v3878_v1  ;;  %p4821_p13 = pneg %p4820_p12 }
 0x3ca   : > { %4724 = vst [vmem:[%s6723_s8 + $0x50] sm:$0xff] %v4673_v56   ;;  %4456 = vmatmul.msk.bf16.gmra.mxu3 %vm3241_vm15, %v3604_v59  ;;  %p4826_p3 = pnand %p4825_p2, %p4821_p13 }
 0x3cd   : > { %v3801_v45 = vpop.f32.mrf.mxu3 }
 0x3ce   : > { %v3802_v60 = vadd.f32 %v6683_v2, %v3801_v45  ;;  %v4607_v2 = vunpack.c.h.bf16 %v4711_v11 }
 0x3d0   : > { %v3848_v48 = vadd.f32 %v4602_v29, %v3802_v60 }
 0x3d2   : > { %v3880_v54 = vmax.f32 %v3848_v48, 0.0 }
 0x3d5   : > { %v3803_v9 = vpop.f32.mrf.mxu3 }
 0x3d6   : > { %v3804_v14 = vadd.f32 %v4801_v33, %v3803_v9 }
 0x3d8   : > { %v3849_v6 = vadd.f32 %v4603_v39, %v3804_v14 }
 0x3da   : > { %v3881_v62 = vmax.f32 %v3849_v6, 0.0 }
 0x3dc   : > { %v4678_v43 = vpack.c.bf16 %v3881_v62, %v3880_v54 }
 0x3de   : > { %4725 = vst [vmem:[%s6723_s8 + $0x58] sm:$0xff] %v4678_v43  }
 0x3ed   : > { %v3806_v28 = vpop.f32.mrf.mxu3 }
 0x3ee   : > { %v3807_v13 = vadd.f32 %v4801_v33, %v3806_v28 }
 0x3f0   : > { %v3850_v25 = vadd.f32 %v4606_v16, %v3807_v13 }
 0x3f2   : > { %v3882_v53 = vmax.f32 %v3850_v25, 0.0 }
 0x3f5   : > { %v3808_v55 = vpop.f32.mrf.mxu3 }
 0x3f6   : > { %v3809_v34 = vadd.f32 %v4801_v33, %v3808_v55 }
 0x3f8   : > { %v3851_v58 = vadd.f32 %v4607_v2, %v3809_v34 }
 0x3fa   : > { %v3883_v63 = vmax.f32 %v3851_v58, 0.0 }
 0x3fc   : > { %v4683_v36 = vpack.c.bf16 %v3883_v63, %v3882_v53 }
 0x3fe   : > { %4726 = vst [vmem:[%s6723_s8 + $0x60] sm:$0xff] %v4683_v36  }
 0x40d   : > { %v3811_v23 = vpop.f32.mrf.mxu3 }
 0x40e   : > { %v3812_v50 = vadd.f32 %v4801_v33, %v3811_v23 }
 0x410   : > { %v3852_v49 = vadd.f32 %v4610_v40, %v3812_v50 }
 0x412   : > { %v3884_v46 = vmax.f32 %v3852_v49, 0.0 }
 0x415   : > { %v3813_v20 = vpop.f32.mrf.mxu3 }
 0x416   : > { %v3814_v47 = vadd.f32 %v4801_v33, %v3813_v20 }
 0x418   : > { %v3853_v21 = vadd.f32 %v4611_v5, %v3814_v47 }
 0x41a   : > { %v3885_v4 = vmax.f32 %v3853_v21, 0.0 }
 0x41c   : > { %v4688_v7 = vpack.c.bf16 %v3885_v4, %v3884_v46 }
 0x41e   : > { %4727 = vst [vmem:[%s6723_s8 + $0x68] sm:$0xff] %v4688_v7  }
 0x42d   : > { %v3816_v8 = vpop.f32.mrf.mxu3 }
 0x42e   : > { %v3817_v31 = vadd.f32 %v4801_v33, %v3816_v8 }
 0x430   : > { %v3854_v26 = vadd.f32 %v4614_v0, %v3817_v31 }
 0x432   : > { %v3886_v27 = vmax.f32 %v3854_v26, 0.0 }
 0x435   : > { %v3818_v17 = vpop.f32.mrf.mxu3 }
 0x436   : > { %v3819_v57 = vadd.f32 %v4801_v33, %v3818_v17 }
 0x438   : > { %v3855_v41 = vadd.f32 %v4615_v35, %v3819_v57 }
 0x43a   : > { %v3887_v18 = vmax.f32 %v3855_v41, 0.0 }
 0x43c   : > { %v4693_v52 = vpack.c.bf16 %v3887_v18, %v3886_v27 }
 0x43e   : > { %4728 = vst [vmem:[%s6723_s8 + $0x70] sm:$0xff] %v4693_v52  }
 0x44d   : > { %v3821_v3 = vpop.f32.mrf.mxu3 }
 0x44e   : > { %v3822_v42 = vadd.f32 %v4801_v33, %v3821_v3 }
 0x450   : > { %v3856_v44 = vadd.f32 %v4618_v22, %v3822_v42 }
 0x452   : > { %v3888_v24 = vmax.f32 %v3856_v44, 0.0 }
 0x455   : > { %v3823_v51 = vpop.f32.mrf.mxu3 }
 0x456   : > { %v3824_v32 = vadd.f32 %v4801_v33, %v3823_v51 }
 0x458   : > { %v3857_v12 = vadd.f32 %v4619_v10, %v3824_v32 }
 0x45a   : > { %v3889_v1 = vmax.f32 %v3857_v12, 0.0 }
 0x45c   : > { %v4698_v61 = vpack.c.bf16 %v3889_v1, %v3888_v24 }
 0x45e   : > { %4729 = vst [vmem:[%s6723_s8 + $0x78] sm:$0xff] %v4698_v61  }
 0x45f   : > { %4829 = shalt.err (!%p4826_p3)
}
 0x460   : > { %s4870_s22 = smov 4  }
 0x461   : > { %4748 = dma.vmem_to_hbm [thread:$0]  (%p4949_p5), %s3968_s18, 2048, %s3970_s23, %s3955_s28, %s4868_s21, %s4868_s21, %s4870_s22  }
 0x462 PF: > { %p4754_p4 = scmp.ge.s32.totalorder %s4864_s27, 2  ;;  %s3984_s8 = sand.u32 1, %s4852_s24  }
 0x463   : > { %s3985_s16 = scalar_lea.sflag [#allocation5], %s3984_s8 }
 0x464   : > { %p4751_p7 = pnand %p4754_p4, %p4953_p6 }
 0x466   : > { %p4752_p8 = pneg %p4751_p7 }
 0x468   : > { %4847 = dma.done.wait (%p4752_p8), %s3985_s16, 2048  }
 0x469   : > { %4849 = vsyncadd (%p4752_p8), %s3985_s16, 4294965248  ;;  %p17_p9 = scmp.ge.s32.totalorder %s4936_s30, 4   ;;  %s6986_s24 = smov %s4856_s25 }
 0x46a   : > { %s6987_s25 = smov %s4860_s26  ;;  %s6988_s26 = smov %s4947_s10 }
 0x46b   : > { %s6989_s27 = smov %s4936_s30  ;;  %19 = sbr.rel (!%p17_p9) target bundleno = 3 (0x3), region = 85 }
 0x470   :  { %3991 = vsyncpa [#allocation5], 1 }
 0x471   :  { %3993 = vsyncpa [#allocation5 + $0x1], 1 }

</bundles_post_ra>
